<compile_context>
chip_gen: v7x
topology: tpu7x:2x2x1
jax: 0.10.0
libtpu: 0.0.40
codegen_flags: <defaults>
</compile_context>

<pallas_src>
import functools

import jax
import jax.numpy as jnp
from jax import lax
from jax.experimental import pallas as pl
from jax.experimental.pallas import tpu as pltpu


def _round_up(x, m):
    return ((x + m - 1) // m) * m


@functools.lru_cache(maxsize=None)
def _tpu_budget():
    """(vmem_limit_bytes, max_tile_m), generation-gated with a conservative fallback."""
    try:
        vmem = int(pltpu.get_tpu_info().vmem_capacity_bytes)
    except Exception:
        return 32 * 1024 * 1024, 512
    if vmem >= 100 * 1024 * 1024:          # v5e / v6e: 128 MiB physical VMEM
        return 64 * 1024 * 1024, 1024
    return 40 * 1024 * 1024, 1024          # v7x: 64 MiB per TensorCore


def _pick_tile_m(M, tile_max):
    """Pick tile_m (multiple of 8) that divides the (possibly padded) M. Avoid padding."""
    if M <= tile_max:
        m_pad = _round_up(M, 8)
        return m_pad, m_pad
    if M % 8 == 0:
        t = (tile_max // 8) * 8
        while t >= 8:
            if M % t == 0:
                return t, M
            t -= 8
    t = min(tile_max, _round_up(M, 8))     # ragged fallback (pads)
    return t, _round_up(M, t)


# ----------------------------- Pallas kernel ------------------------------- #

def _conv_kernel(*refs, act, slope, with_stats, with_prologue, mask_rows, tile_m, real_m):
    """One M-tile of: [optional BN+LeakyReLU patch prologue] -> matmul (full-K, resident
    weight) -> [optional per-tile BN partial stats] -> fused activation -> store.
    """
    it = iter(refs)
    p_ref = next(it)
    w_ref = next(it)
    sc_ref = next(it) if with_prologue else None
    sh_ref = next(it) if with_prologue else None
    y_ref = next(it)
    stats_ref = next(it) if with_stats else None

    p = p_ref[...]                                            # (tile_m, K) bf16
    if with_prologue:
        pf = p.astype(jnp.float32) * sc_ref[...] + sh_ref[...]
        pf = jnp.maximum(pf, slope * pf)                      # LeakyReLU(0.2)
        p = pf.astype(p_ref.dtype)
    if mask_rows:
        # Ragged last tile with a BN prologue: keep padded rows exactly zero so the
        # fused output stats stay correct.
        row = pl.program_id(0) * tile_m + lax.broadcasted_iota(jnp.int32, (tile_m, 1), 0)
        p = jnp.where(row < real_m, p, jnp.zeros_like(p))

    y = jnp.dot(p, w_ref[...], preferred_element_type=jnp.float32)   # (tile_m, C) f32

    if with_stats:
        c = y.shape[1]
        s = jnp.sum(y, axis=0, keepdims=True)
        sq = jnp.sum(y * y, axis=0, keepdims=True)
        stats_ref[...] = jnp.concatenate(
            [s, sq, jnp.zeros((6, c), jnp.float32)], axis=0).reshape(1, 8, c)

    if act == "leaky":
        y = jnp.maximum(y, slope * y)
    elif act == "sigmoid":
        y = 1.0 / (1.0 + jnp.exp(-y))                         # exact; head is tiny
    y_ref[...] = y.astype(y_ref.dtype)


# ----------------------------- kernel wrapper ------------------------------ #

def conv_matmul(patches, weight, *, act="none", with_stats=False,
                in_scale=None, in_shift=None, out_dtype=jnp.bfloat16, slope=0.2):
    """patches (M, K) @ weight (K, C), single resident K tile, fused prologue/epilogue.

    Returns y (m_pad, C) or (y, stats) where stats is (n_m, 8, C) with per-tile partial
    sums in sublane 0 and sums-of-squares in sublane 1.
    """
    M, K = patches.shape
    Kw, C = weight.shape
    assert Kw == K
    with_prologue = in_scale is not None

    vmem_limit, tile_max = _tpu_budget()
    tile_m, m_pad = _pick_tile_m(M, tile_max)
    if m_pad != M:
        patches = jnp.pad(patches, ((0, m_pad - M), (0, 0)))
    n_m = m_pad // tile_m

    in_arrays = [patches, weight]
    in_specs = [
        pl.BlockSpec((tile_m, K), lambda m: (m, 0)),
        pl.BlockSpec((K, C), lambda m: (0, 0)),       # full weight, resident in VMEM
    ]
    if with_prologue:
        in_arrays += [in_scale.reshape(1, K).astype(jnp.float32),
                      in_shift.reshape(1, K).astype(jnp.float32)]
        in_specs += [pl.BlockSpec((1, K), lambda m: (0, 0)),
                     pl.BlockSpec((1, K), lambda m: (0, 0))]

    out_shapes = [jax.ShapeDtypeStruct((m_pad, C), out_dtype)]
    out_specs = [pl.BlockSpec((tile_m, C), lambda m: (m, 0))]
    if with_stats:
        out_shapes.append(jax.ShapeDtypeStruct((n_m, 8, C), jnp.float32))
        out_specs.append(pl.BlockSpec((1, 8, C), lambda m: (m, 0, 0)))

    kernel = functools.partial(
        _conv_kernel, act=act, slope=slope, with_stats=with_stats,
        with_prologue=with_prologue,
        mask_rows=(with_prologue and m_pad != M),
        tile_m=tile_m, real_m=M)

    outs = pl.pallas_call(
        kernel,
        out_shape=tuple(out_shapes),
        grid=(n_m,),
        in_specs=in_specs,
        out_specs=tuple(out_specs),
        compiler_params=pltpu.CompilerParams(
            dimension_semantics=("parallel",),
            vmem_limit_bytes=vmem_limit,
        ),
    )(*in_arrays)

    if with_stats:
        return outs
    return outs[0]


# ------------------------------ JAX glue ----------------------------------- #

def im2col_s2d_k4s2p1(x):
    """Patch matrix for a 4x4 / stride-2 / pad-1 conv via factor-2 space-to-depth.

    Only a 4-tap concat of the s2d tensor is materialized (4x input bytes, not 16x).
    Column order is (DY, DX, ph, pw, c) with kernel offsets dy = 2*DY+ph, dx = 2*DX+pw.
    """
    N, H, W, C = x.shape
    xp = jnp.pad(x, ((0, 0), (1, 1), (1, 1), (0, 0)))            # (N, H+2, W+2, C)
    hp, wp = H + 2, W + 2
    xsd = xp.reshape(N, hp // 2, 2, wp // 2, 2, C)                # (n, i, ph, j, pw, c)
    xsd = jnp.transpose(xsd, (0, 1, 3, 2, 4, 5)).reshape(N, hp // 2, wp // 2, 4 * C)
    ho, wo = hp // 2 - 1, wp // 2 - 1                             # == H//2, W//2
    taps = []
    for dy in range(2):
        for dx in range(2):
            taps.append(xsd[:, dy:dy + ho, dx:dx + wo, :])
    patches = jnp.concatenate(taps, axis=-1)                      # (N, ho, wo, 16*C)
    return patches.reshape(N * ho * wo, 16 * C), ho, wo


def im2col_k3s1p0(x):
    """Plain 9-tap im2col for the tiny 3x3 / stride-1 / pad-0 head conv."""
    N, H, W, C = x.shape
    ho, wo = H - 2, W - 2
    cols = []
    for dy in range(3):
        for dx in range(3):
            cols.append(x[:, dy:dy + ho, dx:dx + wo, :])
    patches = jnp.concatenate(cols, axis=-1)                      # (N, ho, wo, 9*C)
    return patches.reshape(N * ho * wo, 9 * C), ho, wo


def w_k4s2_to_matmul(w_oihw):
    """PyTorch (Co, Ci, 4, 4) -> (16*Ci, Co) in (DY, DX, ph, pw, Ci) row order."""
    co, ci = w_oihw.shape[0], w_oihw.shape[1]
    w = jnp.transpose(w_oihw, (2, 3, 1, 0))            # (dy, dx, Ci, Co)
    w = w.reshape(2, 2, 2, 2, ci, co)                  # (DY, ph, DX, pw, Ci, Co)
    w = jnp.transpose(w, (0, 2, 1, 3, 4, 5))           # (DY, DX, ph, pw, Ci, Co)
    return w.reshape(16 * ci, co)


def w_k3s1_to_matmul(w_oihw):
    """PyTorch (Co, Ci, 3, 3) -> (9*Ci, Co) in (dy, dx, Ci) row order."""
    co = w_oihw.shape[0]
    return jnp.transpose(w_oihw, (2, 3, 1, 0)).reshape(-1, co)


def bn_scale_shift(stats, gamma, beta, m_real, eps=1e-5):
    """Reduce per-tile partial stats; fold training-mode BN (biased var) to scale/shift."""
    ssum = jnp.sum(stats[:, 0, :], axis=0, keepdims=True)        # (1, C)
    ssq = jnp.sum(stats[:, 1, :], axis=0, keepdims=True)         # (1, C)
    mean = ssum / m_real
    var = jnp.maximum(ssq / m_real - mean * mean, 0.0)
    rstd = lax.rsqrt(var + eps)
    scale = gamma * rstd
    shift = beta - mean * scale
    return scale, shift                                          # each (1, C) f32


def init_params(key, img_channels):
    k1, k2, k3, k4 = jax.random.split(key, 4)
    std = 0.02  # DCGAN-style init; deterministic via PRNGKey
    w1 = std * jax.random.normal(k1, (64, img_channels, 4, 4), jnp.float32)
    w2 = std * jax.random.normal(k2, (128, 64, 4, 4), jnp.float32)
    w3 = std * jax.random.normal(k3, (256, 128, 4, 4), jnp.float32)
    w4 = std * jax.random.normal(k4, (1, 256, 3, 3), jnp.float32)
    # Lane-dense output layouts: pad C_out 64 -> 128 (layer 1) and 1 -> 128 (head).
    w1m = jnp.pad(w_k4s2_to_matmul(w1), ((0, 0), (0, 64)))
    w4m = jnp.pad(w_k3s1_to_matmul(w4), ((0, 0), (0, 127)))
    return {
        "w1": w1m.astype(jnp.bfloat16),
        "w2": w_k4s2_to_matmul(w2).astype(jnp.bfloat16),
        "g2": jnp.ones((1, 128), jnp.float32),
        "b2": jnp.zeros((1, 128), jnp.float32),
        "w3": w_k4s2_to_matmul(w3).astype(jnp.bfloat16),
        "g3": jnp.ones((1, 256), jnp.float32),
        "b3": jnp.zeros((1, 256), jnp.float32),
        "w4": w4m.astype(jnp.bfloat16),
    }


@jax.jit
def discriminator_forward(x_nchw, params):
    x = jnp.transpose(x_nchw, (0, 2, 3, 1)).astype(jnp.bfloat16)  # NCHW -> NHWC, bf16
    N = x.shape[0]

    # Block 1: Conv(4,2,1) + LeakyReLU(0.2).  128-wide lane-dense output, slice to 64.
    p, ho, wo = im2col_s2d_k4s2p1(x)
    m1 = N * ho * wo
    y1 = conv_matmul(p, params["w1"], act="leaky")
    x = y1[:m1, :64].reshape(N, ho, wo, 64)

    # Block 2: Conv(4,2,1).  BN2 stats fused into the matmul; BN2+LeakyReLU is applied
    # to block-3's patch prologue (im2col is a pure per-channel gather).
    p, ho, wo = im2col_s2d_k4s2p1(x)
    m2 = N * ho * wo
    y2, stats2 = conv_matmul(p, params["w2"], act="none", with_stats=True)
    scale2, shift2 = bn_scale_shift(stats2, params["g2"], params["b2"], m2)
    x = y2[:m2].reshape(N, ho, wo, 128)

    # Block 3: (BN2 + LeakyReLU on patches) -> Conv(4,2,1); BN3 stats fused.
    p, ho, wo = im2col_s2d_k4s2p1(x)
    m3 = N * ho * wo
    y3, stats3 = conv_matmul(p, params["w3"], act="none", with_stats=True,
                             in_scale=jnp.tile(scale2, (1, 16)),
                             in_shift=jnp.tile(shift2, (1, 16)))
    scale3, shift3 = bn_scale_shift(stats3, params["g3"], params["b3"], m3)
    x = y3[:m3].reshape(N, ho, wo, 256)

    # Block 4: (BN3 + LeakyReLU on patches) -> Conv(3,1,0) -> Sigmoid (exact).
    p, ho, wo = im2col_k3s1p0(x)
    m4 = N * ho * wo
    y4 = conv_matmul(p, params["w4"], act="sigmoid", out_dtype=jnp.float32,
                     in_scale=jnp.tile(scale3, (1, 9)),
                     in_shift=jnp.tile(shift3, (1, 9)))
    out = y4[:m4, :1].reshape(N, ho, wo, 1)
    return jnp.transpose(out, (0, 3, 1, 2))                       # NHWC -> NCHW


if __name__ == "__main__":
    key = jax.random.PRNGKey(0)
    kx, kp = jax.random.split(key)

    img_channels, batch, hw = 3, 2, 32  # 32x32 -> 16 -> 8 -> 4 -> (3x3 conv) -> 2x2
    x = jax.random.normal(kx, (batch, img_channels, hw, hw), jnp.float32)
    params = init_params(kp, img_channels)

    out = discriminator_forward(x, params)
    out = jax.block_until_ready(out)

    assert out.shape == (batch, 1, 2, 2), out.shape
    assert bool(jnp.all(jnp.isfinite(out))), "non-finite output"
    assert bool(jnp.all((out >= 0.0) & (out <= 1.0))), "sigmoid range violated"
    print("KERNEL_OK")
</pallas_src>

<mosaic_0001>
module attributes {stable_mosaic.version = 11 : i64} {
  func.func @_conv_kernel(%arg0: i32, %arg1: memref<512x48xbf16, #tpu.memory_space<vmem>>, %arg2: memref<48x128xbf16, #tpu.memory_space<vmem>>, %arg3: memref<512x128xbf16, #tpu.memory_space<vmem>>) attributes {dimension_semantics = [#tpu.dimension_semantics<parallel>], iteration_bounds = array<i64: 1>, scalar_prefetch = 0 : i64, scratch_operands = 0 : i64, tpu.core_type = #tpu.core_type<tc>, window_params = [{transform_indices = @transform_0, window_bounds = array<i64: 512, 48>}, {pipeline_mode = #tpu.pipeline_mode<synchronous>, transform_indices = @transform_1, window_bounds = array<i64: 48, 128>}, {transform_indices = @transform_2, window_bounds = array<i64: 512, 128>}]} {
    %c0 = arith.constant 0 : index
    %c0_0 = arith.constant 0 : index
    %0 = vector.load %arg1[%c0, %c0_0] : memref<512x48xbf16, #tpu.memory_space<vmem>>, vector<512x48xbf16>
    %c0_1 = arith.constant 0 : index
    %c0_2 = arith.constant 0 : index
    %1 = vector.load %arg2[%c0_1, %c0_2] : memref<48x128xbf16, #tpu.memory_space<vmem>>, vector<48x128xbf16>
    %cst = arith.constant dense<0.000000e+00> : vector<512x128xf32>
    %2 = tpu.matmul %0, %1, %cst {dimension_numbers = #tpu.dot_dimension_numbers<[1], [0], [0], [1], [0, 0, 1, 1], [], []>} : vector<512x48xbf16>, vector<48x128xbf16>, vector<512x128xf32> -> vector<512x128xf32>
    %cst_3 = arith.constant 2.000000e-01 : f32
    %3 = vector.broadcast %cst_3 : f32 to vector<512x128xf32>
    %4 = arith.mulf %3, %2 : vector<512x128xf32>
    %5 = arith.maximumf %2, %4 : vector<512x128xf32>
    %6 = arith.truncf %5 : vector<512x128xf32> to vector<512x128xbf16>
    %c0_4 = arith.constant 0 : index
    %c0_5 = arith.constant 0 : index
    %7 = vector.load %arg3[%c0_4, %c0_5] : memref<512x128xbf16, #tpu.memory_space<vmem>>, vector<512x128xbf16>
    tpu.vector_store %arg3[%c0_4, %c0_5], %6 {strides = array<i32>} : memref<512x128xbf16, #tpu.memory_space<vmem>>, vector<512x128xbf16>,
    return
  }
  func.func @transform_0(%arg0: i32) -> (i32, i32) {
    %c0_i32 = arith.constant 0 : i32
    %c0_i32_0 = arith.constant 0 : i32
    return %arg0, %c0_i32 : i32, i32
  }
  func.func @transform_1(%arg0: i32) -> (i32, i32) {
    %c0_i32 = arith.constant 0 : i32
    %c0_i32_0 = arith.constant 0 : i32
    %c0_i32_1 = arith.constant 0 : i32
    return %c0_i32, %c0_i32_0 : i32, i32
  }
  func.func @transform_2(%arg0: i32) -> (i32, i32) {
    %c0_i32 = arith.constant 0 : i32
    %c0_i32_0 = arith.constant 0 : i32
    return %arg0, %c0_i32 : i32, i32
  }
}

module attributes {stable_mosaic.version = 11 : i64} {
  func.func @_conv_kernel(%arg0: i32, %arg1: memref<128x1024xbf16, #tpu.memory_space<vmem>>, %arg2: memref<1024x128xbf16, #tpu.memory_space<vmem>>, %arg3: memref<128x128xbf16, #tpu.memory_space<vmem>>, %arg4: memref<1x8x128xf32, #tpu.memory_space<vmem>>) attributes {dimension_semantics = [#tpu.dimension_semantics<parallel>], iteration_bounds = array<i64: 1>, scalar_prefetch = 0 : i64, scratch_operands = 0 : i64, tpu.core_type = #tpu.core_type<tc>, window_params = [{transform_indices = @transform_0, window_bounds = array<i64: 128, 1024>}, {pipeline_mode = #tpu.pipeline_mode<synchronous>, transform_indices = @transform_1, window_bounds = array<i64: 1024, 128>}, {transform_indices = @transform_2, window_bounds = array<i64: 128, 128>}, {transform_indices = @transform_3, window_bounds = array<i64: 1, 8, 128>}]} {
    %c0 = arith.constant 0 : index
    %c0_0 = arith.constant 0 : index
    %0 = vector.load %arg1[%c0, %c0_0] : memref<128x1024xbf16, #tpu.memory_space<vmem>>, vector<128x1024xbf16>
    %c0_1 = arith.constant 0 : index
    %c0_2 = arith.constant 0 : index
    %1 = vector.load %arg2[%c0_1, %c0_2] : memref<1024x128xbf16, #tpu.memory_space<vmem>>, vector<1024x128xbf16>
    %cst = arith.constant dense<0.000000e+00> : vector<128x128xf32>
    %2 = tpu.matmul %0, %1, %cst {dimension_numbers = #tpu.dot_dimension_numbers<[1], [0], [0], [1], [0, 0, 1, 1], [], []>} : vector<128x1024xbf16>, vector<1024x128xbf16>, vector<128x128xf32> -> vector<128x128xf32>
    %cst_3 = arith.constant dense<0.000000e+00> : vector<128xf32>
    %3 = vector.multi_reduction <add>, %2, %cst_3 [0] : vector<128x128xf32> to vector<128xf32>
    %4 = vector.shape_cast %3 : vector<128xf32> to vector<1x128xf32>
    %5 = arith.mulf %2, %2 : vector<128x128xf32>
    %cst_4 = arith.constant dense<0.000000e+00> : vector<128xf32>
    %6 = vector.multi_reduction <add>, %5, %cst_4 [0] : vector<128x128xf32> to vector<128xf32>
    %7 = vector.shape_cast %6 : vector<128xf32> to vector<1x128xf32>
    %cst_5 = arith.constant 0.000000e+00 : f32
    %8 = vector.broadcast %cst_5 : f32 to vector<6x128xf32>
    %9 = tpu.concatenate %4, %7, %8 in 0 : vector<1x128xf32>, vector<1x128xf32>, vector<6x128xf32> -> vector<8x128xf32>
    %10 = vector.shape_cast %9 : vector<8x128xf32> to vector<1x8x128xf32>
    %c0_6 = arith.constant 0 : index
    %c0_7 = arith.constant 0 : index
    %c0_8 = arith.constant 0 : index
    %11 = vector.load %arg4[%c0_6, %c0_7, %c0_8] : memref<1x8x128xf32, #tpu.memory_space<vmem>>, vector<1x8x128xf32>
    tpu.vector_store %arg4[%c0_6, %c0_7, %c0_8], %10 {strides = array<i32>} : memref<1x8x128xf32, #tpu.memory_space<vmem>>, vector<1x8x128xf32>,
    %12 = arith.truncf %2 : vector<128x128xf32> to vector<128x128xbf16>
    %c0_9 = arith.constant 0 : index
    %c0_10 = arith.constant 0 : index
    %13 = vector.load %arg3[%c0_9, %c0_10] : memref<128x128xbf16, #tpu.memory_space<vmem>>, vector<128x128xbf16>
    tpu.vector_store %arg3[%c0_9, %c0_10], %12 {strides = array<i32>} : memref<128x128xbf16, #tpu.memory_space<vmem>>, vector<128x128xbf16>,
    return
  }
  func.func @transform_0(%arg0: i32) -> (i32, i32) {
    %c0_i32 = arith.constant 0 : i32
    %c0_i32_0 = arith.constant 0 : i32
    return %arg0, %c0_i32 : i32, i32
  }
  func.func @transform_1(%arg0: i32) -> (i32, i32) {
    %c0_i32 = arith.constant 0 : i32
    %c0_i32_0 = arith.constant 0 : i32
    %c0_i32_1 = arith.constant 0 : i32
    return %c0_i32, %c0_i32_0 : i32, i32
  }
  func.func @transform_2(%arg0: i32) -> (i32, i32) {
    %c0_i32 = arith.constant 0 : i32
    %c0_i32_0 = arith.constant 0 : i32
    return %arg0, %c0_i32 : i32, i32
  }
  func.func @transform_3(%arg0: i32) -> (i32, i32, i32) {
    %c0_i32 = arith.constant 0 : i32
    %c0_i32_0 = arith.constant 0 : i32
    %c0_i32_1 = arith.constant 0 : i32
    return %arg0, %c0_i32, %c0_i32_0 : i32, i32, i32
  }
}

module attributes {stable_mosaic.version = 11 : i64} {
  func.func @_conv_kernel(%arg0: i32, %arg1: memref<32x2048xbf16, #tpu.memory_space<vmem>>, %arg2: memref<2048x256xbf16, #tpu.memory_space<vmem>>, %arg3: memref<1x2048xf32, #tpu.memory_space<vmem>>, %arg4: memref<1x2048xf32, #tpu.memory_space<vmem>>, %arg5: memref<32x256xbf16, #tpu.memory_space<vmem>>, %arg6: memref<1x8x256xf32, #tpu.memory_space<vmem>>) attributes {dimension_semantics = [#tpu.dimension_semantics<parallel>], iteration_bounds = array<i64: 1>, scalar_prefetch = 0 : i64, scratch_operands = 0 : i64, tpu.core_type = #tpu.core_type<tc>, window_params = [{transform_indices = @transform_0, window_bounds = array<i64: 32, 2048>}, {pipeline_mode = #tpu.pipeline_mode<synchronous>, transform_indices = @transform_1, window_bounds = array<i64: 2048, 256>}, {pipeline_mode = #tpu.pipeline_mode<synchronous>, transform_indices = @transform_2, window_bounds = array<i64: 1, 2048>}, {pipeline_mode = #tpu.pipeline_mode<synchronous>, transform_indices = @transform_3, window_bounds = array<i64: 1, 2048>}, {transform_indices = @transform_4, window_bounds = array<i64: 32, 256>}, {transform_indices = @transform_5, window_bounds = array<i64: 1, 8, 256>}]} {
    %c0 = arith.constant 0 : index
    %c0_0 = arith.constant 0 : index
    %0 = vector.load %arg1[%c0, %c0_0] : memref<32x2048xbf16, #tpu.memory_space<vmem>>, vector<32x2048xbf16>
    %1 = arith.extf %0 : vector<32x2048xbf16> to vector<32x2048xf32>
    %c0_1 = arith.constant 0 : index
    %c0_2 = arith.constant 0 : index
    %2 = vector.load %arg3[%c0_1, %c0_2] : memref<1x2048xf32, #tpu.memory_space<vmem>>, vector<1x2048xf32>
    %3 = vector.broadcast %2 : vector<1x2048xf32> to vector<32x2048xf32>
    %4 = arith.mulf %1, %3 : vector<32x2048xf32>
    %c0_3 = arith.constant 0 : index
    %c0_4 = arith.constant 0 : index
    %5 = vector.load %arg4[%c0_3, %c0_4] : memref<1x2048xf32, #tpu.memory_space<vmem>>, vector<1x2048xf32>
    %6 = vector.broadcast %5 : vector<1x2048xf32> to vector<32x2048xf32>
    %7 = arith.addf %4, %6 : vector<32x2048xf32>
    %cst = arith.constant 2.000000e-01 : f32
    %8 = vector.broadcast %cst : f32 to vector<32x2048xf32>
    %9 = arith.mulf %8, %7 : vector<32x2048xf32>
    %10 = arith.maximumf %7, %9 : vector<32x2048xf32>
    %11 = arith.truncf %10 : vector<32x2048xf32> to vector<32x2048xbf16>
    %c0_5 = arith.constant 0 : index
    %c0_6 = arith.constant 0 : index
    %12 = vector.load %arg2[%c0_5, %c0_6] : memref<2048x256xbf16, #tpu.memory_space<vmem>>, vector<2048x256xbf16>
    %cst_7 = arith.constant dense<0.000000e+00> : vector<32x256xf32>
    %13 = tpu.matmul %11, %12, %cst_7 {dimension_numbers = #tpu.dot_dimension_numbers<[1], [0], [0], [1], [0, 0, 1, 1], [], []>} : vector<32x2048xbf16>, vector<2048x256xbf16>, vector<32x256xf32> -> vector<32x256xf32>
    %cst_8 = arith.constant dense<0.000000e+00> : vector<256xf32>
    %14 = vector.multi_reduction <add>, %13, %cst_8 [0] : vector<32x256xf32> to vector<256xf32>
    %15 = vector.shape_cast %14 : vector<256xf32> to vector<1x256xf32>
    %16 = arith.mulf %13, %13 : vector<32x256xf32>
    %cst_9 = arith.constant dense<0.000000e+00> : vector<256xf32>
    %17 = vector.multi_reduction <add>, %16, %cst_9 [0] : vector<32x256xf32> to vector<256xf32>
    %18 = vector.shape_cast %17 : vector<256xf32> to vector<1x256xf32>
    %cst_10 = arith.constant 0.000000e+00 : f32
    %19 = vector.broadcast %cst_10 : f32 to vector<6x256xf32>
    %20 = tpu.concatenate %15, %18, %19 in 0 : vector<1x256xf32>, vector<1x256xf32>, vector<6x256xf32> -> vector<8x256xf32>
    %21 = vector.shape_cast %20 : vector<8x256xf32> to vector<1x8x256xf32>
    %c0_11 = arith.constant 0 : index
    %c0_12 = arith.constant 0 : index
    %c0_13 = arith.constant 0 : index
    %22 = vector.load %arg6[%c0_11, %c0_12, %c0_13] : memref<1x8x256xf32, #tpu.memory_space<vmem>>, vector<1x8x256xf32>
    tpu.vector_store %arg6[%c0_11, %c0_12, %c0_13], %21 {strides = array<i32>} : memref<1x8x256xf32, #tpu.memory_space<vmem>>, vector<1x8x256xf32>,
    %23 = arith.truncf %13 : vector<32x256xf32> to vector<32x256xbf16>
    %c0_14 = arith.constant 0 : index
    %c0_15 = arith.constant 0 : index
    %24 = vector.load %arg5[%c0_14, %c0_15] : memref<32x256xbf16, #tpu.memory_space<vmem>>, vector<32x256xbf16>
    tpu.vector_store %arg5[%c0_14, %c0_15], %23 {strides = array<i32>} : memref<32x256xbf16, #tpu.memory_space<vmem>>, vector<32x256xbf16>,
    return
  }
  func.func @transform_0(%arg0: i32) -> (i32, i32) {
    %c0_i32 = arith.constant 0 : i32
    %c0_i32_0 = arith.constant 0 : i32
    return %arg0, %c0_i32 : i32, i32
  }
  func.func @transform_1(%arg0: i32) -> (i32, i32) {
    %c0_i32 = arith.constant 0 : i32
    %c0_i32_0 = arith.constant 0 : i32
    %c0_i32_1 = arith.constant 0 : i32
    return %c0_i32, %c0_i32_0 : i32, i32
  }
  func.func @transform_2(%arg0: i32) -> (i32, i32) {
    %c0_i32 = arith.constant 0 : i32
    %c0_i32_0 = arith.constant 0 : i32
    %c0_i32_1 = arith.constant 0 : i32
    return %c0_i32, %c0_i32_0 : i32, i32
  }
  func.func @transform_3(%arg0: i32) -> (i32, i32) {
    %c0_i32 = arith.constant 0 : i32
    %c0_i32_0 = arith.constant 0 : i32
    %c0_i32_1 = arith.constant 0 : i32
    return %c0_i32, %c0_i32_0 : i32, i32
  }
  func.func @transform_4(%arg0: i32) -> (i32, i32) {
    %c0_i32 = arith.constant 0 : i32
    %c0_i32_0 = arith.constant 0 : i32
    return %arg0, %c0_i32 : i32, i32
  }
  func.func @transform_5(%arg0: i32) -> (i32, i32, i32) {
    %c0_i32 = arith.constant 0 : i32
    %c0_i32_0 = arith.constant 0 : i32
    %c0_i32_1 = arith.constant 0 : i32
    return %arg0, %c0_i32, %c0_i32_0 : i32, i32, i32
  }
}

module attributes {stable_mosaic.version = 11 : i64} {
  func.func @_conv_kernel(%arg0: i32, %arg1: memref<8x2304xbf16, #tpu.memory_space<vmem>>, %arg2: memref<2304x128xbf16, #tpu.memory_space<vmem>>, %arg3: memref<1x2304xf32, #tpu.memory_space<vmem>>, %arg4: memref<1x2304xf32, #tpu.memory_space<vmem>>, %arg5: memref<8x128xf32, #tpu.memory_space<vmem>>) attributes {dimension_semantics = [#tpu.dimension_semantics<parallel>], iteration_bounds = array<i64: 1>, scalar_prefetch = 0 : i64, scratch_operands = 0 : i64, tpu.core_type = #tpu.core_type<tc>, window_params = [{transform_indices = @transform_0, window_bounds = array<i64: 8, 2304>}, {pipeline_mode = #tpu.pipeline_mode<synchronous>, transform_indices = @transform_1, window_bounds = array<i64: 2304, 128>}, {pipeline_mode = #tpu.pipeline_mode<synchronous>, transform_indices = @transform_2, window_bounds = array<i64: 1, 2304>}, {pipeline_mode = #tpu.pipeline_mode<synchronous>, transform_indices = @transform_3, window_bounds = array<i64: 1, 2304>}, {transform_indices = @transform_4, window_bounds = array<i64: 8, 128>}]} {
    %c0 = arith.constant 0 : index
    %c0_0 = arith.constant 0 : index
    %0 = vector.load %arg1[%c0, %c0_0] : memref<8x2304xbf16, #tpu.memory_space<vmem>>, vector<8x2304xbf16>
    %1 = arith.extf %0 : vector<8x2304xbf16> to vector<8x2304xf32>
    %c0_1 = arith.constant 0 : index
    %c0_2 = arith.constant 0 : index
    %2 = vector.load %arg3[%c0_1, %c0_2] : memref<1x2304xf32, #tpu.memory_space<vmem>>, vector<1x2304xf32>
    %3 = vector.broadcast %2 : vector<1x2304xf32> to vector<8x2304xf32>
    %4 = arith.mulf %1, %3 : vector<8x2304xf32>
    %c0_3 = arith.constant 0 : index
    %c0_4 = arith.constant 0 : index
    %5 = vector.load %arg4[%c0_3, %c0_4] : memref<1x2304xf32, #tpu.memory_space<vmem>>, vector<1x2304xf32>
    %6 = vector.broadcast %5 : vector<1x2304xf32> to vector<8x2304xf32>
    %7 = arith.addf %4, %6 : vector<8x2304xf32>
    %cst = arith.constant 2.000000e-01 : f32
    %8 = vector.broadcast %cst : f32 to vector<8x2304xf32>
    %9 = arith.mulf %8, %7 : vector<8x2304xf32>
    %10 = arith.maximumf %7, %9 : vector<8x2304xf32>
    %11 = arith.truncf %10 : vector<8x2304xf32> to vector<8x2304xbf16>
    %c0_5 = arith.constant 0 : index
    %c0_6 = arith.constant 0 : index
    %12 = vector.load %arg2[%c0_5, %c0_6] : memref<2304x128xbf16, #tpu.memory_space<vmem>>, vector<2304x128xbf16>
    %cst_7 = arith.constant dense<0.000000e+00> : vector<8x128xf32>
    %13 = tpu.matmul %11, %12, %cst_7 {dimension_numbers = #tpu.dot_dimension_numbers<[1], [0], [0], [1], [0, 0, 1, 1], [], []>} : vector<8x2304xbf16>, vector<2304x128xbf16>, vector<8x128xf32> -> vector<8x128xf32>
    %cst_8 = arith.constant 0.000000e+00 : f32
    %14 = vector.broadcast %cst_8 : f32 to vector<8x128xf32>
    %15 = arith.subf %14, %13 : vector<8x128xf32>
    %16 = math.exp %15 : vector<8x128xf32>
    %cst_9 = arith.constant 1.000000e+00 : f32
    %17 = vector.broadcast %cst_9 : f32 to vector<8x128xf32>
    %18 = arith.addf %17, %16 : vector<8x128xf32>
    %cst_10 = arith.constant 1.000000e+00 : f32
    %19 = vector.broadcast %cst_10 : f32 to vector<8x128xf32>
    %20 = arith.divf %19, %18 : vector<8x128xf32>
    %c0_11 = arith.constant 0 : index
    %c0_12 = arith.constant 0 : index
    %21 = vector.load %arg5[%c0_11, %c0_12] : memref<8x128xf32, #tpu.memory_space<vmem>>, vector<8x128xf32>
    tpu.vector_store %arg5[%c0_11, %c0_12], %20 {strides = array<i32>} : memref<8x128xf32, #tpu.memory_space<vmem>>, vector<8x128xf32>,
    return
  }
  func.func @transform_0(%arg0: i32) -> (i32, i32) {
    %c0_i32 = arith.constant 0 : i32
    %c0_i32_0 = arith.constant 0 : i32
    return %arg0, %c0_i32 : i32, i32
  }
  func.func @transform_1(%arg0: i32) -> (i32, i32) {
    %c0_i32 = arith.constant 0 : i32
    %c0_i32_0 = arith.constant 0 : i32
    %c0_i32_1 = arith.constant 0 : i32
    return %c0_i32, %c0_i32_0 : i32, i32
  }
  func.func @transform_2(%arg0: i32) -> (i32, i32) {
    %c0_i32 = arith.constant 0 : i32
    %c0_i32_0 = arith.constant 0 : i32
    %c0_i32_1 = arith.constant 0 : i32
    return %c0_i32, %c0_i32_0 : i32, i32
  }
  func.func @transform_3(%arg0: i32) -> (i32, i32) {
    %c0_i32 = arith.constant 0 : i32
    %c0_i32_0 = arith.constant 0 : i32
    %c0_i32_1 = arith.constant 0 : i32
    return %c0_i32, %c0_i32_0 : i32, i32
  }
  func.func @transform_4(%arg0: i32) -> (i32, i32) {
    %c0_i32 = arith.constant 0 : i32
    %c0_i32_0 = arith.constant 0 : i32
    return %arg0, %c0_i32 : i32, i32
  }
}

</mosaic_0001>

<bundles_post_ra>
// kernel: discriminator_forward.4
= control target key start
LH: loop header
LB: loop body
LE: loop exit
PB: predicated region body
PF: predicated region fallthrough
CT: control target
= control target key end

     0   :  { %vm260_vm0 = vcmask 392192   ;;  %s1878_s1 = inlined_call_operand.vmem [shape: bf16[48,128], index: 1, kind: input, shape index: {}]   ;;  %s1879_s0 = inlined_call_operand.vmem [shape: bf16[512,48], index: 0, kind: input, shape index: {}]   ;;  %s1880_s2 = inlined_call_operand.vmem [shape: bf16[512,128], index: 2, kind: output, shape index: {}]  }
   0x1   :  { %v1595_v0 = vld [vmem:[%s1878_s1] sm:$0xff]   ;;  %v1596_v1 = vld [vmem:[%s1878_s1 + $0x8] sm:$0xff]   ;;  %v1597_v2 = vld [vmem:[%s1878_s1 + $0x10] sm:$0xff]  }
   0x2   :  { %1519 = vmatprep.subr.bf16.mxu0 %v1595_v0  ;;  %1589 = vmatprep.subr.bf16.mxu1 %v1595_v0  ;;  %v1598_v3 = vld [vmem:[%s1879_s0] sm:$0xff]   ;;  %v1600_v5 = vld [vmem:[%s1879_s0 + $0x8] sm:$0xff]   ;;  %v1602_v7 = vld [vmem:[%s1879_s0 + $0x10] sm:$0xff]  }
   0x3   :  { %1520 = vmatpush3.bf16.msra.mxu0 %v1595_v0  ;;  %1592 = vmatpush3.bf16.msra.mxu1 %v1595_v0  ;;  %v1599_v4 = vld [vmem:[%s1879_s0 + $0x80] sm:$0xff]   ;;  %v1601_v6 = vld [vmem:[%s1879_s0 + $0x88] sm:$0xff]   ;;  %v1603_v8 = vld [vmem:[%s1879_s0 + $0x90] sm:$0xff]  }
   0x4   :  { %1521 = vmatprep.subr.bf16.mxu0 %v1596_v1  ;;  %1590 = vmatprep.subr.bf16.mxu1 %v1596_v1  ;;  %v1604_v9 = vld [vmem:[%s1879_s0 + $0x18] sm:$0xff]   ;;  %v1606_v11 = vld [vmem:[%s1879_s0 + $0x20] sm:$0xff]   ;;  %v1608_v13 = vld [vmem:[%s1879_s0 + $0x28] sm:$0xff]  }
   0x5   :  { %1525 = vmatprep.mubr.msk.bf16.mxu0 %vm260_vm0, %v1598_v3  ;;  %1557 = vmatprep.mubr.msk.bf16.mxu1 %vm260_vm0, %v1599_v4  ;;  %v1605_v10 = vld [vmem:[%s1879_s0 + $0x98] sm:$0xff]   ;;  %v1607_v12 = vld [vmem:[%s1879_s0 + $0xa0] sm:$0xff]   ;;  %v1609_v14 = vld [vmem:[%s1879_s0 + $0xa8] sm:$0xff]  }
   0x6   :  { %v1610_v15 = vld [vmem:[%s1879_s0 + $0x30] sm:$0xff]   ;;  %v1612_v17 = vld [vmem:[%s1879_s0 + $0x38] sm:$0xff]   ;;  %v1614_v19 = vld [vmem:[%s1879_s0 + $0x40] sm:$0xff]  }
   0x7   :  { %1522 = vmatpush3.bf16.msra.mxu0 %v1596_v1  ;;  %1593 = vmatpush3.bf16.msra.mxu1 %v1596_v1  ;;  %v1611_v16 = vld [vmem:[%s1879_s0 + $0xb0] sm:$0xff]   ;;  %v1613_v18 = vld [vmem:[%s1879_s0 + $0xb8] sm:$0xff]   ;;  %v1615_v20 = vld [vmem:[%s1879_s0 + $0xc0] sm:$0xff]  }
   0x8   :  { %1523 = vmatprep.subr.bf16.mxu0 %v1597_v2  ;;  %1591 = vmatprep.subr.bf16.mxu1 %v1597_v2  ;;  %v1616_v21 = vld [vmem:[%s1879_s0 + $0x48] sm:$0xff]   ;;  %v1618_v23 = vld [vmem:[%s1879_s0 + $0x50] sm:$0xff]   ;;  %v1620_v25 = vld [vmem:[%s1879_s0 + $0x58] sm:$0xff]  }
   0x9   :  { %v1617_v22 = vld [vmem:[%s1879_s0 + $0xc8] sm:$0xff]   ;;  %v1619_v24 = vld [vmem:[%s1879_s0 + $0xd0] sm:$0xff]   ;;  %v1621_v26 = vld [vmem:[%s1879_s0 + $0xd8] sm:$0xff]  }
   0xa   :  { %v1622_v27 = vld [vmem:[%s1879_s0 + $0x60] sm:$0xff]   ;;  %v1624_v29 = vld [vmem:[%s1879_s0 + $0x68] sm:$0xff]   ;;  %v1626_v31 = vld [vmem:[%s1879_s0 + $0x70] sm:$0xff]  }
   0xb   :  { %1524 = vmatpush3.bf16.msra.mxu0 %v1597_v2  ;;  %1594 = vmatpush3.bf16.msra.mxu1 %v1597_v2  ;;  %v1623_v28 = vld [vmem:[%s1879_s0 + $0xe0] sm:$0xff]   ;;  %v1625_v30 = vld [vmem:[%s1879_s0 + $0xe8] sm:$0xff]   ;;  %v1627_v32 = vld [vmem:[%s1879_s0 + $0xf0] sm:$0xff]  }
   0xc   :  { %v1628_v33 = vld [vmem:[%s1879_s0 + $0x78] sm:$0xff]  }
   0xd   :  { %v1629_v34 = vld [vmem:[%s1879_s0 + $0xf8] sm:$0xff]  }
   0xe   :  { %1526 = vmatmul.mubr.msk.bf16.vlgmr.msra.gmra.mrb[0].mxu0 %vm260_vm0, %v1600_v5  ;;  %1558 = vmatmul.mubr.msk.bf16.vlgmr.msra.gmra.mrb[0].mxu1 %vm260_vm0, %v1601_v6 }
   0xf   :  { %1529 = vmatprep.mubr.msk.bf16.mxu0 %vm260_vm0, %v1602_v7  ;;  %1561 = vmatprep.mubr.msk.bf16.mxu1 %vm260_vm0, %v1603_v8 }
  0x16   :  { %1530 = vmatmul.mubr.msk.bf16.gmra.mrb[4].mxu0 %vm260_vm0, %v1604_v9  ;;  %1562 = vmatmul.mubr.msk.bf16.gmra.mrb[4].mxu1 %vm260_vm0, %v1605_v10 }
  0x17   :  { %1533 = vmatprep.mubr.msk.bf16.mxu0 %vm260_vm0, %v1606_v11  ;;  %1565 = vmatprep.mubr.msk.bf16.mxu1 %vm260_vm0, %v1607_v12 }
  0x1e   :  { %1534 = vmatmul.mubr.msk.bf16.gmra.mrb[8].mxu0 %vm260_vm0, %v1608_v13  ;;  %1566 = vmatmul.mubr.msk.bf16.gmra.mrb[8].mxu1 %vm260_vm0, %v1609_v14 }
  0x1f   :  { %1537 = vmatprep.mubr.msk.bf16.mxu0 %vm260_vm0, %v1610_v15  ;;  %1569 = vmatprep.mubr.msk.bf16.mxu1 %vm260_vm0, %v1611_v16 }
  0x26   :  { %1538 = vmatmul.mubr.msk.bf16.gmra.mrb[12].mxu0 %vm260_vm0, %v1612_v17  ;;  %1570 = vmatmul.mubr.msk.bf16.gmra.mrb[12].mxu1 %vm260_vm0, %v1613_v18 }
  0x27   :  { %1541 = vmatprep.mubr.msk.bf16.mxu0 %vm260_vm0, %v1614_v19  ;;  %1573 = vmatprep.mubr.msk.bf16.mxu1 %vm260_vm0, %v1615_v20 }
  0x2e   :  { %1542 = vmatmul.mubr.msk.bf16.gmra.mrb[16].mxu0 %vm260_vm0, %v1616_v21  ;;  %1574 = vmatmul.mubr.msk.bf16.gmra.mrb[16].mxu1 %vm260_vm0, %v1617_v22 }
  0x2f   :  { %1545 = vmatprep.mubr.msk.bf16.mxu0 %vm260_vm0, %v1618_v23  ;;  %1577 = vmatprep.mubr.msk.bf16.mxu1 %vm260_vm0, %v1619_v24 }
  0x36   :  { %1546 = vmatmul.mubr.msk.bf16.gmra.mrb[20].mxu0 %vm260_vm0, %v1620_v25  ;;  %1578 = vmatmul.mubr.msk.bf16.gmra.mrb[20].mxu1 %vm260_vm0, %v1621_v26 }
  0x37   :  { %1549 = vmatprep.mubr.msk.bf16.mxu0 %vm260_vm0, %v1622_v27  ;;  %1581 = vmatprep.mubr.msk.bf16.mxu1 %vm260_vm0, %v1623_v28 }
  0x3e   :  { %1550 = vmatmul.mubr.msk.bf16.gmra.mrb[24].mxu0 %vm260_vm0, %v1624_v29  ;;  %1582 = vmatmul.mubr.msk.bf16.gmra.mrb[24].mxu1 %vm260_vm0, %v1625_v30 }
  0x3f   :  { %1553 = vmatprep.mubr.msk.bf16.mxu0 %vm260_vm0, %v1626_v31  ;;  %1585 = vmatprep.mubr.msk.bf16.mxu1 %vm260_vm0, %v1627_v32 }
  0x46   :  { %1554 = vmatmul.mubr.msk.bf16.gmra.mrb[28].mxu0 %vm260_vm0, %v1628_v33  ;;  %1586 = vmatmul.mubr.msk.bf16.gmra.mrb[28].mxu1 %vm260_vm0, %v1629_v34 }
  0xe1   :  { %v1527_v35 = vpop.f32.mrb[0].mxu0  ;;  %v1559_v36 = vpop.f32.mrb[0].mxu1 }
  0xe2   :  { %v648_v37 = vmul.f32 0.2, %v1527_v35  ;;  %v680_v38 = vmul.f32 0.2, %v1559_v36  ;;  %v391_v39 = vpop.f32.mrb[1].mxu0  ;;  %v519_v40 = vpop.f32.mrb[1].mxu1 }
  0xe3   :  { %v646_v41 = vmul.f32 0.2, %v391_v39  ;;  %v678_v42 = vmul.f32 0.2, %v519_v40  ;;  %v1528_v43 = vpop.f32.mrb[2].mxu0  ;;  %v1560_v44 = vpop.f32.mrb[2].mxu1 }
  0xe4   :  { %v649_v45 = vmul.f32 0.2, %v1528_v43  ;;  %v681_v46 = vmul.f32 0.2, %v1560_v44  ;;  %v394_v47 = vpop.f32.mrb[3].mxu0  ;;  %v522_v48 = vpop.f32.mrb[3].mxu1  ;;  %v712_v51 = vmax.f32 %v1527_v35, %v648_v37  ;;  %v744_v52 = vmax.f32 %v1559_v36, %v680_v38 }
  0xe5   :  { %v647_v49 = vmul.f32 0.2, %v394_v47  ;;  %v679_v50 = vmul.f32 0.2, %v522_v48  ;;  %v710_v55 = vmax.f32 %v391_v39, %v646_v41  ;;  %v742_v56 = vmax.f32 %v519_v40, %v678_v42 }
  0xe6   :  { %v713_v53 = vmax.f32 %v1528_v43, %v649_v45  ;;  %v745_v54 = vmax.f32 %v1560_v44, %v681_v46 }
  0xe7   :  { %v711_v57 = vmax.f32 %v394_v47, %v647_v49  ;;  %v743_v58 = vmax.f32 %v522_v48, %v679_v50 }
  0xe8   :  { %v1301_v59 = vpack.c.bf16 %v713_v53, %v712_v51  ;;  %v1381_v60 = vpack.c.bf16 %v745_v54, %v744_v52 }
  0xe9   :  { %v1296_v61 = vpack.c.bf16 %v711_v57, %v710_v55  ;;  %v1376_v62 = vpack.c.bf16 %v743_v58, %v742_v56  ;;  %v1531_v63 = vpop.f32.mrb[4].mxu0  ;;  %v1563_v0 = vpop.f32.mrb[4].mxu1 }
  0xea   :  { %1453 = vst [vmem:[%s1880_s2 + $0x8] sm:$0xff] %v1301_v59   ;;  %1469 = vst [vmem:[%s1880_s2 + $0x88] sm:$0xff] %v1381_v60   ;;  %v652_v1 = vmul.f32 0.2, %v1531_v63  ;;  %v684_v2 = vmul.f32 0.2, %v1563_v0 }
  0xeb   :  { %v407_v3 = vpop.f32.mrb[5].mxu0  ;;  %v535_v4 = vpop.f32.mrb[5].mxu1  ;;  %1297 = vst [vmem:[%s1880_s2] sm:$0xff] %v1296_v61   ;;  %1468 = vst [vmem:[%s1880_s2 + $0x80] sm:$0xff] %v1376_v62  }
  0xec   :  { %v650_v5 = vmul.f32 0.2, %v407_v3  ;;  %v682_v6 = vmul.f32 0.2, %v535_v4  ;;  %v1532_v7 = vpop.f32.mrb[6].mxu0  ;;  %v1564_v8 = vpop.f32.mrb[6].mxu1  ;;  %v716_v15 = vmax.f32 %v1531_v63, %v652_v1  ;;  %v748_v16 = vmax.f32 %v1563_v0, %v684_v2 }
  0xed   :  { %v653_v9 = vmul.f32 0.2, %v1532_v7  ;;  %v685_v10 = vmul.f32 0.2, %v1564_v8  ;;  %v410_v11 = vpop.f32.mrb[7].mxu0  ;;  %v538_v12 = vpop.f32.mrb[7].mxu1 }
  0xee   :  { %v651_v13 = vmul.f32 0.2, %v410_v11  ;;  %v683_v14 = vmul.f32 0.2, %v538_v12  ;;  %v714_v19 = vmax.f32 %v407_v3, %v650_v5  ;;  %v746_v20 = vmax.f32 %v535_v4, %v682_v6 }
  0xef   :  { %v717_v17 = vmax.f32 %v1532_v7, %v653_v9  ;;  %v749_v18 = vmax.f32 %v1564_v8, %v685_v10 }
  0xf0   :  { %v715_v21 = vmax.f32 %v410_v11, %v651_v13  ;;  %v747_v22 = vmax.f32 %v538_v12, %v683_v14 }
  0xf1   :  { %v1311_v23 = vpack.c.bf16 %v717_v17, %v716_v15  ;;  %v1391_v24 = vpack.c.bf16 %v749_v18, %v748_v16  ;;  %v1535_v27 = vpop.f32.mrb[8].mxu0  ;;  %v1567_v28 = vpop.f32.mrb[8].mxu1 }
  0xf2   :  { %v1306_v25 = vpack.c.bf16 %v715_v21, %v714_v19  ;;  %v1386_v26 = vpack.c.bf16 %v747_v22, %v746_v20  ;;  %v656_v29 = vmul.f32 0.2, %v1535_v27  ;;  %v688_v30 = vmul.f32 0.2, %v1567_v28  ;;  %v423_v31 = vpop.f32.mrb[9].mxu0  ;;  %v551_v32 = vpop.f32.mrb[9].mxu1 }
  0xf3   :  { %1455 = vst [vmem:[%s1880_s2 + $0x18] sm:$0xff] %v1311_v23   ;;  %1471 = vst [vmem:[%s1880_s2 + $0x98] sm:$0xff] %v1391_v24   ;;  %v654_v33 = vmul.f32 0.2, %v423_v31  ;;  %v686_v34 = vmul.f32 0.2, %v551_v32 }
  0xf4   :  { %1454 = vst [vmem:[%s1880_s2 + $0x10] sm:$0xff] %v1306_v25   ;;  %1470 = vst [vmem:[%s1880_s2 + $0x90] sm:$0xff] %v1386_v26   ;;  %v1536_v35 = vpop.f32.mrb[10].mxu0  ;;  %v1568_v36 = vpop.f32.mrb[10].mxu1  ;;  %v720_v43 = vmax.f32 %v1535_v27, %v656_v29  ;;  %v752_v44 = vmax.f32 %v1567_v28, %v688_v30 }
  0xf5   :  { %v657_v37 = vmul.f32 0.2, %v1536_v35  ;;  %v689_v38 = vmul.f32 0.2, %v1568_v36  ;;  %v426_v39 = vpop.f32.mrb[11].mxu0  ;;  %v554_v40 = vpop.f32.mrb[11].mxu1  ;;  %v718_v47 = vmax.f32 %v423_v31, %v654_v33  ;;  %v750_v48 = vmax.f32 %v551_v32, %v686_v34 }
  0xf6   :  { %v655_v41 = vmul.f32 0.2, %v426_v39  ;;  %v687_v42 = vmul.f32 0.2, %v554_v40 }
  0xf7   :  { %v721_v45 = vmax.f32 %v1536_v35, %v657_v37  ;;  %v753_v46 = vmax.f32 %v1568_v36, %v689_v38 }
  0xf8   :  { %v719_v49 = vmax.f32 %v426_v39, %v655_v41  ;;  %v751_v50 = vmax.f32 %v554_v40, %v687_v42 }
  0xf9   :  { %v1321_v51 = vpack.c.bf16 %v721_v45, %v720_v43  ;;  %v1401_v52 = vpack.c.bf16 %v753_v46, %v752_v44  ;;  %v1539_v55 = vpop.f32.mrb[12].mxu0  ;;  %v1571_v56 = vpop.f32.mrb[12].mxu1 }
  0xfa   :  { %v1316_v53 = vpack.c.bf16 %v719_v49, %v718_v47  ;;  %v1396_v54 = vpack.c.bf16 %v751_v50, %v750_v48  ;;  %v660_v57 = vmul.f32 0.2, %v1539_v55  ;;  %v692_v58 = vmul.f32 0.2, %v1571_v56  ;;  %v439_v59 = vpop.f32.mrb[13].mxu0  ;;  %v567_v60 = vpop.f32.mrb[13].mxu1 }
  0xfb   :  { %1457 = vst [vmem:[%s1880_s2 + $0x28] sm:$0xff] %v1321_v51   ;;  %1473 = vst [vmem:[%s1880_s2 + $0xa8] sm:$0xff] %v1401_v52   ;;  %v658_v61 = vmul.f32 0.2, %v439_v59  ;;  %v690_v62 = vmul.f32 0.2, %v567_v60 }
  0xfc   :  { %1456 = vst [vmem:[%s1880_s2 + $0x20] sm:$0xff] %v1316_v53   ;;  %1472 = vst [vmem:[%s1880_s2 + $0xa0] sm:$0xff] %v1396_v54   ;;  %v1540_v63 = vpop.f32.mrb[14].mxu0  ;;  %v1572_v0 = vpop.f32.mrb[14].mxu1  ;;  %v724_v7 = vmax.f32 %v1539_v55, %v660_v57  ;;  %v756_v8 = vmax.f32 %v1571_v56, %v692_v58 }
  0xfd   :  { %v661_v1 = vmul.f32 0.2, %v1540_v63  ;;  %v693_v2 = vmul.f32 0.2, %v1572_v0  ;;  %v442_v3 = vpop.f32.mrb[15].mxu0  ;;  %v570_v4 = vpop.f32.mrb[15].mxu1  ;;  %v722_v11 = vmax.f32 %v439_v59, %v658_v61  ;;  %v754_v12 = vmax.f32 %v567_v60, %v690_v62 }
  0xfe   :  { %v659_v5 = vmul.f32 0.2, %v442_v3  ;;  %v691_v6 = vmul.f32 0.2, %v570_v4 }
  0xff   :  { %v725_v9 = vmax.f32 %v1540_v63, %v661_v1  ;;  %v757_v10 = vmax.f32 %v1572_v0, %v693_v2 }
 0x100   :  { %v723_v13 = vmax.f32 %v442_v3, %v659_v5  ;;  %v755_v14 = vmax.f32 %v570_v4, %v691_v6 }
 0x101   :  { %v1331_v15 = vpack.c.bf16 %v725_v9, %v724_v7  ;;  %v1411_v16 = vpack.c.bf16 %v757_v10, %v756_v8  ;;  %v1543_v19 = vpop.f32.mrb[16].mxu0  ;;  %v1575_v20 = vpop.f32.mrb[16].mxu1 }
 0x102   :  { %v1326_v17 = vpack.c.bf16 %v723_v13, %v722_v11  ;;  %v1406_v18 = vpack.c.bf16 %v755_v14, %v754_v12  ;;  %v664_v21 = vmul.f32 0.2, %v1543_v19  ;;  %v696_v22 = vmul.f32 0.2, %v1575_v20  ;;  %v455_v23 = vpop.f32.mrb[17].mxu0  ;;  %v583_v24 = vpop.f32.mrb[17].mxu1 }
 0x103   :  { %1459 = vst [vmem:[%s1880_s2 + $0x38] sm:$0xff] %v1331_v15   ;;  %1475 = vst [vmem:[%s1880_s2 + $0xb8] sm:$0xff] %v1411_v16   ;;  %v662_v25 = vmul.f32 0.2, %v455_v23  ;;  %v694_v26 = vmul.f32 0.2, %v583_v24 }
 0x104   :  { %1458 = vst [vmem:[%s1880_s2 + $0x30] sm:$0xff] %v1326_v17   ;;  %1474 = vst [vmem:[%s1880_s2 + $0xb0] sm:$0xff] %v1406_v18   ;;  %v1544_v27 = vpop.f32.mrb[18].mxu0  ;;  %v1576_v28 = vpop.f32.mrb[18].mxu1  ;;  %v728_v35 = vmax.f32 %v1543_v19, %v664_v21  ;;  %v760_v36 = vmax.f32 %v1575_v20, %v696_v22 }
 0x105   :  { %v665_v29 = vmul.f32 0.2, %v1544_v27  ;;  %v697_v30 = vmul.f32 0.2, %v1576_v28  ;;  %v458_v31 = vpop.f32.mrb[19].mxu0  ;;  %v586_v32 = vpop.f32.mrb[19].mxu1  ;;  %v726_v39 = vmax.f32 %v455_v23, %v662_v25  ;;  %v758_v40 = vmax.f32 %v583_v24, %v694_v26 }
 0x106   :  { %v663_v33 = vmul.f32 0.2, %v458_v31  ;;  %v695_v34 = vmul.f32 0.2, %v586_v32 }
 0x107   :  { %v729_v37 = vmax.f32 %v1544_v27, %v665_v29  ;;  %v761_v38 = vmax.f32 %v1576_v28, %v697_v30 }
 0x108   :  { %v727_v41 = vmax.f32 %v458_v31, %v663_v33  ;;  %v759_v42 = vmax.f32 %v586_v32, %v695_v34 }
 0x109   :  { %v1341_v43 = vpack.c.bf16 %v729_v37, %v728_v35  ;;  %v1421_v44 = vpack.c.bf16 %v761_v38, %v760_v36  ;;  %v1547_v47 = vpop.f32.mrb[20].mxu0  ;;  %v1579_v48 = vpop.f32.mrb[20].mxu1 }
 0x10a   :  { %v1336_v45 = vpack.c.bf16 %v727_v41, %v726_v39  ;;  %v1416_v46 = vpack.c.bf16 %v759_v42, %v758_v40  ;;  %v668_v49 = vmul.f32 0.2, %v1547_v47  ;;  %v700_v50 = vmul.f32 0.2, %v1579_v48  ;;  %v471_v51 = vpop.f32.mrb[21].mxu0  ;;  %v599_v52 = vpop.f32.mrb[21].mxu1 }
 0x10b   :  { %1461 = vst [vmem:[%s1880_s2 + $0x48] sm:$0xff] %v1341_v43   ;;  %1477 = vst [vmem:[%s1880_s2 + $0xc8] sm:$0xff] %v1421_v44   ;;  %v666_v53 = vmul.f32 0.2, %v471_v51  ;;  %v698_v54 = vmul.f32 0.2, %v599_v52 }
 0x10c   :  { %1460 = vst [vmem:[%s1880_s2 + $0x40] sm:$0xff] %v1336_v45   ;;  %1476 = vst [vmem:[%s1880_s2 + $0xc0] sm:$0xff] %v1416_v46   ;;  %v1548_v55 = vpop.f32.mrb[22].mxu0  ;;  %v1580_v56 = vpop.f32.mrb[22].mxu1  ;;  %v732_v63 = vmax.f32 %v1547_v47, %v668_v49  ;;  %v764_v0 = vmax.f32 %v1579_v48, %v700_v50 }
 0x10d   :  { %v669_v57 = vmul.f32 0.2, %v1548_v55  ;;  %v701_v58 = vmul.f32 0.2, %v1580_v56  ;;  %v474_v59 = vpop.f32.mrb[23].mxu0  ;;  %v602_v60 = vpop.f32.mrb[23].mxu1  ;;  %v730_v3 = vmax.f32 %v471_v51, %v666_v53  ;;  %v762_v4 = vmax.f32 %v599_v52, %v698_v54 }
 0x10e   :  { %v667_v61 = vmul.f32 0.2, %v474_v59  ;;  %v699_v62 = vmul.f32 0.2, %v602_v60 }
 0x10f   :  { %v733_v1 = vmax.f32 %v1548_v55, %v669_v57  ;;  %v765_v2 = vmax.f32 %v1580_v56, %v701_v58 }
 0x110   :  { %v731_v5 = vmax.f32 %v474_v59, %v667_v61  ;;  %v763_v6 = vmax.f32 %v602_v60, %v699_v62 }
 0x111   :  { %v1351_v7 = vpack.c.bf16 %v733_v1, %v732_v63  ;;  %v1431_v8 = vpack.c.bf16 %v765_v2, %v764_v0  ;;  %v1551_v11 = vpop.f32.mrb[24].mxu0  ;;  %v1583_v12 = vpop.f32.mrb[24].mxu1 }
 0x112   :  { %v1346_v9 = vpack.c.bf16 %v731_v5, %v730_v3  ;;  %v1426_v10 = vpack.c.bf16 %v763_v6, %v762_v4  ;;  %v672_v13 = vmul.f32 0.2, %v1551_v11  ;;  %v704_v14 = vmul.f32 0.2, %v1583_v12  ;;  %v487_v15 = vpop.f32.mrb[25].mxu0  ;;  %v615_v16 = vpop.f32.mrb[25].mxu1 }
 0x113   :  { %1463 = vst [vmem:[%s1880_s2 + $0x58] sm:$0xff] %v1351_v7   ;;  %1479 = vst [vmem:[%s1880_s2 + $0xd8] sm:$0xff] %v1431_v8   ;;  %v670_v17 = vmul.f32 0.2, %v487_v15  ;;  %v702_v18 = vmul.f32 0.2, %v615_v16 }
 0x114   :  { %1462 = vst [vmem:[%s1880_s2 + $0x50] sm:$0xff] %v1346_v9   ;;  %1478 = vst [vmem:[%s1880_s2 + $0xd0] sm:$0xff] %v1426_v10   ;;  %v1552_v19 = vpop.f32.mrb[26].mxu0  ;;  %v1584_v20 = vpop.f32.mrb[26].mxu1  ;;  %v736_v27 = vmax.f32 %v1551_v11, %v672_v13  ;;  %v768_v28 = vmax.f32 %v1583_v12, %v704_v14 }
 0x115   :  { %v673_v21 = vmul.f32 0.2, %v1552_v19  ;;  %v705_v22 = vmul.f32 0.2, %v1584_v20  ;;  %v490_v23 = vpop.f32.mrb[27].mxu0  ;;  %v618_v24 = vpop.f32.mrb[27].mxu1  ;;  %v734_v31 = vmax.f32 %v487_v15, %v670_v17  ;;  %v766_v32 = vmax.f32 %v615_v16, %v702_v18 }
 0x116   :  { %v671_v25 = vmul.f32 0.2, %v490_v23  ;;  %v703_v26 = vmul.f32 0.2, %v618_v24 }
 0x117   :  { %v737_v29 = vmax.f32 %v1552_v19, %v673_v21  ;;  %v769_v30 = vmax.f32 %v1584_v20, %v705_v22 }
 0x118   :  { %v735_v33 = vmax.f32 %v490_v23, %v671_v25  ;;  %v767_v34 = vmax.f32 %v618_v24, %v703_v26 }
 0x119   :  { %v1361_v35 = vpack.c.bf16 %v737_v29, %v736_v27  ;;  %v1441_v36 = vpack.c.bf16 %v769_v30, %v768_v28  ;;  %v1555_v39 = vpop.f32.mrb[28].mxu0  ;;  %v1587_v40 = vpop.f32.mrb[28].mxu1 }
 0x11a   :  { %v1356_v37 = vpack.c.bf16 %v735_v33, %v734_v31  ;;  %v1436_v38 = vpack.c.bf16 %v767_v34, %v766_v32  ;;  %v676_v41 = vmul.f32 0.2, %v1555_v39  ;;  %v708_v42 = vmul.f32 0.2, %v1587_v40  ;;  %v503_v43 = vpop.f32.mrb[29].mxu0  ;;  %v631_v44 = vpop.f32.mrb[29].mxu1 }
 0x11b   :  { %1465 = vst [vmem:[%s1880_s2 + $0x68] sm:$0xff] %v1361_v35   ;;  %1481 = vst [vmem:[%s1880_s2 + $0xe8] sm:$0xff] %v1441_v36   ;;  %v674_v45 = vmul.f32 0.2, %v503_v43  ;;  %v706_v46 = vmul.f32 0.2, %v631_v44 }
 0x11c   :  { %1464 = vst [vmem:[%s1880_s2 + $0x60] sm:$0xff] %v1356_v37   ;;  %1480 = vst [vmem:[%s1880_s2 + $0xe0] sm:$0xff] %v1436_v38   ;;  %v1556_v47 = vpop.f32.mrb[30].mxu0  ;;  %v1588_v48 = vpop.f32.mrb[30].mxu1  ;;  %v740_v55 = vmax.f32 %v1555_v39, %v676_v41  ;;  %v772_v56 = vmax.f32 %v1587_v40, %v708_v42 }
 0x11d   :  { %v677_v49 = vmul.f32 0.2, %v1556_v47  ;;  %v709_v50 = vmul.f32 0.2, %v1588_v48  ;;  %v506_v51 = vpop.f32.mrb[31].mxu0  ;;  %v634_v52 = vpop.f32.mrb[31].mxu1  ;;  %v738_v59 = vmax.f32 %v503_v43, %v674_v45  ;;  %v770_v60 = vmax.f32 %v631_v44, %v706_v46 }
 0x11e   :  { %v675_v53 = vmul.f32 0.2, %v506_v51  ;;  %v707_v54 = vmul.f32 0.2, %v634_v52 }
 0x11f   :  { %v741_v57 = vmax.f32 %v1556_v47, %v677_v49  ;;  %v773_v58 = vmax.f32 %v1588_v48, %v709_v50 }
 0x120   :  { %v739_v61 = vmax.f32 %v506_v51, %v675_v53  ;;  %v771_v62 = vmax.f32 %v634_v52, %v707_v54 }
 0x121   :  { %v1371_v63 = vpack.c.bf16 %v741_v57, %v740_v55  ;;  %v1451_v0 = vpack.c.bf16 %v773_v58, %v772_v56 }
 0x122   :  { %v1366_v1 = vpack.c.bf16 %v739_v61, %v738_v59  ;;  %v1446_v2 = vpack.c.bf16 %v771_v62, %v770_v60 }
 0x123   :  { %1467 = vst [vmem:[%s1880_s2 + $0x78] sm:$0xff] %v1371_v63   ;;  %1483 = vst [vmem:[%s1880_s2 + $0xf8] sm:$0xff] %v1451_v0  }
 0x124   :  { %1466 = vst [vmem:[%s1880_s2 + $0x70] sm:$0xff] %v1366_v1   ;;  %1482 = vst [vmem:[%s1880_s2 + $0xf0] sm:$0xff] %v1446_v2  }

// kernel: discriminator_forward.5
= control target key start
LH: loop header
LB: loop body
LE: loop exit
PB: predicated region body
PF: predicated region fallthrough
CT: control target
= control target key end

     0   :  { %vm1356_vm0 = vcmask 1040384   ;;  %vm1358_vm1 = vcmask 1041408   ;;  %s2455_s1 = inlined_call_operand.vmem [shape: bf16[1024,128], index: 1, kind: input, shape index: {}]   ;;  %s2456_s0 = inlined_call_operand.vmem [shape: bf16[128,1024], index: 0, kind: input, shape index: {}]   ;;  %s2457_s2 = inlined_call_operand.vmem [shape: bf16[128,128], index: 2, kind: output, shape index: {0}]   ;;  %s2458_s3 = inlined_call_operand.vmem [shape: f32[1,8,128], index: 3, kind: output, shape index: {1}]  }
   0x1   :  { %v1912_v0 = vld [vmem:[%s2455_s1 + $0x40] sm:$0xff]   ;;  %v1916_v4 = vld [vmem:[%s2455_s1 + $0x48] sm:$0xff]   ;;  %v1920_v8 = vld [vmem:[%s2455_s1 + $0x50] sm:$0xff]  }
   0x2   :  { %v1913_v1 = vld [vmem:[%s2455_s1 + $0xc0] sm:$0xff]   ;;  %1656 = vmatprep.subr.bf16.mxu0 %v1912_v0  ;;  %v1917_v5 = vld [vmem:[%s2455_s1 + $0xc8] sm:$0xff]   ;;  %v1921_v9 = vld [vmem:[%s2455_s1 + $0xd0] sm:$0xff]  }
   0x3   :  { %v1914_v2 = vld [vmem:[%s2455_s1] sm:$0xff]   ;;  %1720 = vmatprep.subr.bf16.mxu1 %v1913_v1  ;;  %v1918_v6 = vld [vmem:[%s2455_s1 + $0x8] sm:$0xff]   ;;  %v1922_v10 = vld [vmem:[%s2455_s1 + $0x10] sm:$0xff]  }
   0x4   :  { %v1915_v3 = vld [vmem:[%s2455_s1 + $0x80] sm:$0xff]   ;;  %1657 = vmatpush3.bf16.msra.mxu0 %v1914_v2  ;;  %v1919_v7 = vld [vmem:[%s2455_s1 + $0x88] sm:$0xff]   ;;  %v1923_v11 = vld [vmem:[%s2455_s1 + $0x90] sm:$0xff]  }
   0x5   :  { %1721 = vmatpush3.bf16.msra.mxu1 %v1915_v3  ;;  %1658 = vmatprep.subr.bf16.mxu0 %v1916_v4  ;;  %v1924_v12 = vld [vmem:[%s2455_s1 + $0x58] sm:$0xff]   ;;  %v1928_v16 = vld [vmem:[%s2455_s1 + $0x60] sm:$0xff]   ;;  %v1932_v20 = vld [vmem:[%s2455_s1 + $0x68] sm:$0xff]  }
   0x6   :  { %1722 = vmatprep.subr.bf16.mxu1 %v1917_v5  ;;  %v1925_v13 = vld [vmem:[%s2455_s1 + $0xd8] sm:$0xff]   ;;  %v1929_v17 = vld [vmem:[%s2455_s1 + $0xe0] sm:$0xff]   ;;  %v1933_v21 = vld [vmem:[%s2455_s1 + $0xe8] sm:$0xff]  }
   0x7   :  { %v1926_v14 = vld [vmem:[%s2455_s1 + $0x18] sm:$0xff]   ;;  %v1930_v18 = vld [vmem:[%s2455_s1 + $0x20] sm:$0xff]   ;;  %v1934_v22 = vld [vmem:[%s2455_s1 + $0x28] sm:$0xff]  }
   0x8   :  { %1659 = vmatpush3.bf16.msra.mxu0 %v1918_v6  ;;  %v1927_v15 = vld [vmem:[%s2455_s1 + $0x98] sm:$0xff]   ;;  %v1931_v19 = vld [vmem:[%s2455_s1 + $0xa0] sm:$0xff]   ;;  %v1935_v23 = vld [vmem:[%s2455_s1 + $0xa8] sm:$0xff]  }
   0x9   :  { %1723 = vmatpush3.bf16.msra.mxu1 %v1919_v7  ;;  %1660 = vmatprep.subr.bf16.mxu0 %v1920_v8  ;;  %v1936_v24 = vld [vmem:[%s2455_s1 + $0x70] sm:$0xff]   ;;  %v1940_v28 = vld [vmem:[%s2455_s1 + $0x78] sm:$0xff]   ;;  %v14_v32 = vld [vmem:[%s2456_s0] sm:$0xff] }
   0xa   :  { %1724 = vmatprep.subr.bf16.mxu1 %v1921_v9  ;;  %v1937_v25 = vld [vmem:[%s2455_s1 + $0xf0] sm:$0xff]   ;;  %v1941_v29 = vld [vmem:[%s2455_s1 + $0xf8] sm:$0xff]   ;;  %v18_v33 = vld [vmem:[%s2456_s0 + $0x20] sm:$0xff] }
   0xb   :  { %v1938_v26 = vld [vmem:[%s2455_s1 + $0x30] sm:$0xff]   ;;  %v1942_v30 = vld [vmem:[%s2455_s1 + $0x38] sm:$0xff]   ;;  %v15_v34 = vld [vmem:[%s2456_s0 + $0x8] sm:$0xff]  ;;  %v1449_v35 = vcombine.low %v14_v32, %v18_v33  ;;  %v1450_v36 = vcombine.high %v14_v32, %v18_v33 }
   0xc   :  { %1661 = vmatpush3.bf16.msra.mxu0 %v1922_v10  ;;  %v1939_v27 = vld [vmem:[%s2455_s1 + $0xb0] sm:$0xff]   ;;  %v1943_v31 = vld [vmem:[%s2455_s1 + $0xb8] sm:$0xff]   ;;  %v19_v37 = vld [vmem:[%s2456_s0 + $0x28] sm:$0xff] }
   0xd   :  { %1725 = vmatpush3.bf16.msra.mxu1 %v1923_v11  ;;  %1662 = vmatprep.subr.bf16.mxu0 %v1924_v12  ;;  %v1451_v38 = vcombine.low %v15_v34, %v19_v37  ;;  %v1452_v39 = vcombine.high %v15_v34, %v19_v37  ;;  %v1944_v40 = vld [vmem:[%s2455_s1 + $0x140] sm:$0xff]   ;;  %v23_v47 = vld [vmem:[%s2456_s0 + $0x48] sm:$0xff]  ;;  %v1952_v62 = vld [vmem:[%s2455_s1 + $0x150] sm:$0xff]  }
   0xe   :  { %1726 = vmatprep.subr.bf16.mxu1 %v1925_v13  ;;  %942 = vmatprep.mubr.bf16.mxu0 %v1450_v36  ;;  %v1945_v41 = vld [vmem:[%s2455_s1 + $0x100] sm:$0xff]   ;;  %v27_v48 = vld [vmem:[%s2456_s0 + $0x68] sm:$0xff]  ;;  %v1953_v63 = vld [vmem:[%s2455_s1 + $0x110] sm:$0xff]  }
   0xf   :  { %1039 = vmatprep.mubr.bf16.mxu1 %v1452_v39  ;;  %v1946_v42 = vld [vmem:[%s2455_s1 + $0x1c0] sm:$0xff]   ;;  %v1460_v49 = vcombine.high %v23_v47, %v27_v48  ;;  %v1948_v50 = vld [vmem:[%s2455_s1 + $0x148] sm:$0xff]   ;;  %v1459_v53 = vcombine.low %v23_v47, %v27_v48  ;;  %v1954_v0 = vld [vmem:[%s2455_s1 + $0x1d0] sm:$0xff]  }
  0x10   :  { %1663 = vmatpush3.bf16.msra.mxu0 %v1926_v14  ;;  %v1947_v43 = vld [vmem:[%s2455_s1 + $0x180] sm:$0xff]   ;;  %v1949_v52 = vld [vmem:[%s2455_s1 + $0x108] sm:$0xff]   ;;  %v1955_v1 = vld [vmem:[%s2455_s1 + $0x190] sm:$0xff]  }
  0x11   :  { %1727 = vmatpush3.bf16.msra.mxu1 %v1927_v15  ;;  %1664 = vmatprep.subr.bf16.mxu0 %v1928_v16  ;;  %v22_v44 = vld [vmem:[%s2456_s0 + $0x40] sm:$0xff]  ;;  %v1950_v54 = vld [vmem:[%s2455_s1 + $0x1c8] sm:$0xff]   ;;  %v1956_v10 = vld [vmem:[%s2455_s1 + $0x158] sm:$0xff]  }
  0x12   :  { %1728 = vmatprep.subr.bf16.mxu1 %v1929_v17  ;;  %v26_v45 = vld [vmem:[%s2456_s0 + $0x60] sm:$0xff]  ;;  %v1951_v55 = vld [vmem:[%s2455_s1 + $0x188] sm:$0xff]   ;;  %v1957_v11 = vld [vmem:[%s2455_s1 + $0x118] sm:$0xff]  }
  0x13   :  { %v1458_v46 = vcombine.high %v22_v44, %v26_v45  ;;  %v1457_v51 = vcombine.low %v22_v44, %v26_v45  ;;  %v30_v56 = vld [vmem:[%s2456_s0 + $0x80] sm:$0xff]  ;;  %v31_v58 = vld [vmem:[%s2456_s0 + $0x88] sm:$0xff]  ;;  %v1958_v12 = vld [vmem:[%s2455_s1 + $0x1d8] sm:$0xff]  }
  0x14   :  { %1665 = vmatpush3.bf16.msra.mxu0 %v1930_v18  ;;  %v34_v57 = vld [vmem:[%s2456_s0 + $0xa0] sm:$0xff]  ;;  %v35_v59 = vld [vmem:[%s2456_s0 + $0xa8] sm:$0xff]  ;;  %v1959_v13 = vld [vmem:[%s2455_s1 + $0x198] sm:$0xff]  }
  0x15   :  { %1729 = vmatpush3.bf16.msra.mxu1 %v1931_v19  ;;  %1666 = vmatprep.subr.bf16.mxu0 %v1932_v20  ;;  %v1466_v60 = vcombine.high %v30_v56, %v34_v57  ;;  %v1468_v61 = vcombine.high %v31_v58, %v35_v59  ;;  %v1465_v2 = vcombine.low %v30_v56, %v34_v57  ;;  %v38_v3 = vld [vmem:[%s2456_s0 + $0xc0] sm:$0xff]  ;;  %v39_v5 = vld [vmem:[%s2456_s0 + $0xc8] sm:$0xff]  ;;  %v1969_v39 = vld [vmem:[%s2455_s1 + $0x130] sm:$0xff]  }
  0x16   :  { %1730 = vmatprep.subr.bf16.mxu1 %v1933_v21  ;;  %v42_v4 = vld [vmem:[%s2456_s0 + $0xe0] sm:$0xff]  ;;  %v1467_v6 = vcombine.low %v31_v58, %v35_v59  ;;  %v43_v8 = vld [vmem:[%s2456_s0 + $0xe8] sm:$0xff]  ;;  %v1973_v48 = vld [vmem:[%s2455_s1 + $0x138] sm:$0xff]  }
  0x17   :  { %v1474_v7 = vcombine.high %v38_v3, %v42_v4  ;;  %v1476_v9 = vcombine.high %v39_v5, %v43_v8  ;;  %v46_v14 = vld [vmem:[%s2456_s0 + $0x100] sm:$0xff]  ;;  %v47_v16 = vld [vmem:[%s2456_s0 + $0x108] sm:$0xff]  ;;  %v1473_v19 = vcombine.low %v38_v3, %v42_v4  ;;  %v1475_v21 = vcombine.low %v39_v5, %v43_v8  ;;  %v25_v8 = vld [vmem:[%s2456_s0 + $0x58] sm:$0xff] }
  0x18   :  { %1667 = vmatpush3.bf16.msra.mxu0 %v1934_v22  ;;  %v50_v15 = vld [vmem:[%s2456_s0 + $0x120] sm:$0xff]  ;;  %v51_v17 = vld [vmem:[%s2456_s0 + $0x128] sm:$0xff] }
  0x19   :  { %1731 = vmatpush3.bf16.msra.mxu1 %v1935_v23  ;;  %1668 = vmatprep.subr.bf16.mxu0 %v1936_v24  ;;  %v1960_v18 = vld [vmem:[%s2455_s1 + $0x160] sm:$0xff]   ;;  %v1482_v22 = vcombine.high %v46_v14, %v50_v15  ;;  %v1484_v24 = vcombine.high %v47_v16, %v51_v17  ;;  %v1966_v32 = vld [vmem:[%s2455_s1 + $0x1e8] sm:$0xff]   ;;  %v1481_v34 = vcombine.low %v46_v14, %v50_v15  ;;  %v32_v14 = vld [vmem:[%s2456_s0 + $0x90] sm:$0xff] }
  0x1a   :  { %1732 = vmatprep.subr.bf16.mxu1 %v1937_v25  ;;  %v1961_v20 = vld [vmem:[%s2455_s1 + $0x120] sm:$0xff]   ;;  %v1967_v33 = vld [vmem:[%s2455_s1 + $0x1a8] sm:$0xff]   ;;  %v36_v15 = vld [vmem:[%s2456_s0 + $0xb0] sm:$0xff] }
  0x1b   :  { %v1962_v23 = vld [vmem:[%s2455_s1 + $0x1e0] sm:$0xff]   ;;  %v63_v44 = vld [vmem:[%s2456_s0 + $0x188] sm:$0xff] }
  0x1c   :  { %1669 = vmatpush3.bf16.msra.mxu0 %v1938_v26  ;;  %v1963_v25 = vld [vmem:[%s2455_s1 + $0x1a0] sm:$0xff]   ;;  %v67_v45 = vld [vmem:[%s2456_s0 + $0x1a8] sm:$0xff] }
  0x1d   :  { %1733 = vmatpush3.bf16.msra.mxu1 %v1939_v27  ;;  %1670 = vmatprep.subr.bf16.mxu0 %v1940_v28  ;;  %v54_v26 = vld [vmem:[%s2456_s0 + $0x140] sm:$0xff]  ;;  %v1964_v28 = vld [vmem:[%s2455_s1 + $0x168] sm:$0xff]   ;;  %v1499_v59 = vcombine.low %v63_v44, %v67_v45 }
  0x1e   :  { %1734 = vmatprep.subr.bf16.mxu1 %v1941_v29  ;;  %v58_v27 = vld [vmem:[%s2456_s0 + $0x160] sm:$0xff]  ;;  %v55_v29 = vld [vmem:[%s2456_s0 + $0x148] sm:$0xff] }
  0x1f   :  { %v1490_v36 = vcombine.high %v54_v26, %v58_v27  ;;  %v1489_v47 = vcombine.low %v54_v26, %v58_v27  ;;  %v71_v56 = vld [vmem:[%s2456_s0 + $0x1c8] sm:$0xff]  ;;  %v1469_v26 = vcombine.low %v32_v14, %v36_v15 }
  0x20   :  { %1671 = vmatpush3.bf16.msra.mxu0 %v1942_v30  ;;  %v59_v30 = vld [vmem:[%s2456_s0 + $0x168] sm:$0xff] }
  0x21   :  { %1735 = vmatpush3.bf16.msra.mxu1 %v1943_v31  ;;  %1784 = vmatprep.subr.bf16.mxu0 %v1944_v40  ;;  %v1965_v31 = vld [vmem:[%s2455_s1 + $0x128] sm:$0xff]   ;;  %v1492_v37 = vcombine.high %v55_v29, %v59_v30  ;;  %v1970_v40 = vld [vmem:[%s2455_s1 + $0x1f0] sm:$0xff]  }
  0x22   :  { %1848 = vmatprep.subr.bf16.mxu1 %v1946_v42  ;;  %v66_v42 = vld [vmem:[%s2456_s0 + $0x1a0] sm:$0xff]  ;;  %v75_v57 = vld [vmem:[%s2456_s0 + $0x1e8] sm:$0xff] }
  0x23   :  { %943 = vmatmul.mubr.bf16.vlgmr.msra.gmra.mrb[0].mxu0 %v1449_v35  ;;  %v1483_v35 = vcombine.low %v47_v16, %v51_v17  ;;  %v1507_v3 = vcombine.low %v71_v56, %v75_v57  ;;  %v33_v16 = vld [vmem:[%s2456_s0 + $0x98] sm:$0xff] }
  0x24   :  { %1040 = vmatmul.mubr.bf16.vlgmr.msra.gmra.mrb[0].mxu1 %v1451_v38  ;;  %1785 = vmatpush3.bf16.msra.mxu0 %v1945_v41  ;;  %v1968_v38 = vld [vmem:[%s2455_s1 + $0x170] sm:$0xff]   ;;  %v62_v41 = vld [vmem:[%s2456_s0 + $0x180] sm:$0xff]  ;;  %v37_v17 = vld [vmem:[%s2456_s0 + $0xb8] sm:$0xff] }
  0x25   :  { %1849 = vmatpush3.bf16.msra.mxu1 %v1947_v43  ;;  %950 = vmatprep.mubr.bf16.mxu0 %v1458_v46  ;;  %v1971_v43 = vld [vmem:[%s2455_s1 + $0x1b0] sm:$0xff]   ;;  %v1972_v46 = vld [vmem:[%s2455_s1 + $0x178] sm:$0xff]   ;;  %v1497_v58 = vcombine.low %v62_v41, %v66_v42  ;;  %v1471_v27 = vcombine.low %v33_v16, %v37_v17 }
  0x26   :  { %1047 = vmatprep.mubr.bf16.mxu1 %v1460_v49  ;;  %1786 = vmatprep.subr.bf16.mxu0 %v1948_v50  ;;  %v1491_v49 = vcombine.low %v55_v29, %v59_v30  ;;  %v1498_v50 = vcombine.high %v62_v41, %v66_v42  ;;  %v48_v30 = vld [vmem:[%s2456_s0 + $0x110] sm:$0xff]  ;;  %v61_v41 = vld [vmem:[%s2456_s0 + $0x178] sm:$0xff] }
  0x27   :  { %1850 = vmatprep.subr.bf16.mxu1 %v1950_v54  ;;  %v70_v54 = vld [vmem:[%s2456_s0 + $0x1c0] sm:$0xff] }
  0x28   :  { %1787 = vmatpush3.bf16.msra.mxu0 %v1949_v52  ;;  %v1500_v52 = vcombine.high %v63_v44, %v67_v45 }
  0x29   :  { %1851 = vmatpush3.bf16.msra.mxu1 %v1951_v55  ;;  %1788 = vmatprep.subr.bf16.mxu0 %v1952_v62  ;;  %v74_v55 = vld [vmem:[%s2456_s0 + $0x1e0] sm:$0xff]  ;;  %v16_v62 = vld [vmem:[%s2456_s0 + $0x10] sm:$0xff] }
  0x2a   :  { %1852 = vmatprep.subr.bf16.mxu1 %v1954_v0  ;;  %v17_v0 = vld [vmem:[%s2456_s0 + $0x18] sm:$0xff] }
  0x2b   :  { %951 = vmatmul.mubr.bf16.gmra.mrb[4].mxu0 %v1457_v51  ;;  %v1974_v51 = vld [vmem:[%s2455_s1 + $0x1f8] sm:$0xff]  }
  0x2c   :  { %1048 = vmatmul.mubr.bf16.gmra.mrb[4].mxu1 %v1459_v53  ;;  %958 = vmatprep.mubr.bf16.mxu0 %v1466_v60  ;;  %v1975_v53 = vld [vmem:[%s2455_s1 + $0x1b8] sm:$0xff]   ;;  %v1506_v60 = vcombine.high %v70_v54, %v74_v55 }
  0x2d   :  { %1055 = vmatprep.mubr.bf16.mxu1 %v1468_v61  ;;  %1789 = vmatpush3.bf16.msra.mxu0 %v1953_v63  ;;  %v1508_v61 = vcombine.high %v71_v56, %v75_v57  ;;  %v20_v63 = vld [vmem:[%s2456_s0 + $0x30] sm:$0xff]  ;;  %v73_v56 = vld [vmem:[%s2456_s0 + $0x1d8] sm:$0xff] }
  0x2e   :  { %1853 = vmatpush3.bf16.msra.mxu1 %v1955_v1  ;;  %1790 = vmatprep.subr.bf16.mxu0 %v1956_v10  ;;  %v21_v1 = vld [vmem:[%s2456_s0 + $0x38] sm:$0xff]  ;;  %v1454_v4 = vcombine.high %v16_v62, %v20_v63  ;;  %v1453_v10 = vcombine.low %v16_v62, %v20_v63 }
  0x2f   :  { %1854 = vmatprep.subr.bf16.mxu1 %v1958_v12  ;;  %v1456_v5 = vcombine.high %v17_v0, %v21_v1  ;;  %v77_v57 = vld [vmem:[%s2456_s0 + $0x1f8] sm:$0xff] }
  0x30   :  { %v1511_v63 = vcombine.low %v73_v56, %v77_v57 }
  0x31   :  { %1791 = vmatpush3.bf16.msra.mxu0 %v1957_v11  ;;  %v1455_v11 = vcombine.low %v17_v0, %v21_v1 }
  0x32   :  { %1855 = vmatpush3.bf16.msra.mxu1 %v1959_v13  ;;  %1792 = vmatprep.subr.bf16.mxu0 %v1960_v18 }
  0x33   :  { %959 = vmatmul.mubr.bf16.gmra.mrb[8].mxu0 %v1465_v2  ;;  %1856 = vmatprep.subr.bf16.mxu1 %v1962_v23  ;;  %v1505_v2 = vcombine.low %v70_v54, %v74_v55  ;;  %v44_v23 = vld [vmem:[%s2456_s0 + $0xf0] sm:$0xff] }
  0x34   :  { %1056 = vmatmul.mubr.bf16.gmra.mrb[8].mxu1 %v1467_v6  ;;  %966 = vmatprep.mubr.bf16.mxu0 %v1474_v7  ;;  %v24_v6 = vld [vmem:[%s2456_s0 + $0x50] sm:$0xff] }
  0x35   :  { %1063 = vmatprep.mubr.bf16.mxu1 %v1476_v9  ;;  %1793 = vmatpush3.bf16.msra.mxu0 %v1961_v20  ;;  %v28_v7 = vld [vmem:[%s2456_s0 + $0x70] sm:$0xff]  ;;  %v29_v9 = vld [vmem:[%s2456_s0 + $0x78] sm:$0xff]  ;;  %v1470_v20 = vcombine.high %v32_v14, %v36_v15 }
  0x36   :  { %1857 = vmatpush3.bf16.msra.mxu1 %v1963_v25  ;;  %1794 = vmatprep.subr.bf16.mxu0 %v1964_v28  ;;  %v1462_v12 = vcombine.high %v24_v6, %v28_v7  ;;  %v1464_v13 = vcombine.high %v25_v8, %v29_v9  ;;  %v1461_v18 = vcombine.low %v24_v6, %v28_v7  ;;  %v45_v25 = vld [vmem:[%s2456_s0 + $0xf8] sm:$0xff]  ;;  %v72_v54 = vld [vmem:[%s2456_s0 + $0x1d0] sm:$0xff] }
  0x37   :  { %1858 = vmatprep.subr.bf16.mxu1 %v1966_v32  ;;  %v49_v32 = vld [vmem:[%s2456_s0 + $0x118] sm:$0xff]  ;;  %v76_v55 = vld [vmem:[%s2456_s0 + $0x1f0] sm:$0xff] }
  0x38   :  { %v1509_v62 = vcombine.low %v72_v54, %v76_v55 }
  0x39   :  { %1795 = vmatpush3.bf16.msra.mxu0 %v1965_v31  ;;  %v52_v31 = vld [vmem:[%s2456_s0 + $0x130] sm:$0xff] }
  0x3a   :  { %1859 = vmatpush3.bf16.msra.mxu1 %v1967_v33  ;;  %1796 = vmatprep.subr.bf16.mxu0 %v1968_v38  ;;  %v53_v33 = vld [vmem:[%s2456_s0 + $0x138] sm:$0xff]  ;;  %v56_v38 = vld [vmem:[%s2456_s0 + $0x150] sm:$0xff]  ;;  %v1485_v42 = vcombine.low %v48_v30, %v52_v31 }
  0x3b   :  { %967 = vmatmul.mubr.bf16.gmra.mrb[12].mxu0 %v1473_v19  ;;  %1860 = vmatprep.subr.bf16.mxu1 %v1970_v40  ;;  %v1463_v19 = vcombine.low %v25_v8, %v29_v9  ;;  %v57_v40 = vld [vmem:[%s2456_s0 + $0x158] sm:$0xff] }
  0x3c   :  { %1064 = vmatmul.mubr.bf16.gmra.mrb[12].mxu1 %v1475_v21  ;;  %974 = vmatprep.mubr.bf16.mxu0 %v1482_v22  ;;  %v1472_v21 = vcombine.high %v33_v16, %v37_v17  ;;  %v40_v22 = vld [vmem:[%s2456_s0 + $0xd0] sm:$0xff]  ;;  %v1496_v45 = vcombine.high %v57_v40, %v61_v41 }
  0x3d   :  { %1071 = vmatprep.mubr.bf16.mxu1 %v1484_v24  ;;  %1797 = vmatpush3.bf16.msra.mxu0 %v1969_v39  ;;  %v41_v24 = vld [vmem:[%s2456_s0 + $0xd8] sm:$0xff]  ;;  %v1478_v28 = vcombine.high %v40_v22, %v44_v23  ;;  %v60_v39 = vld [vmem:[%s2456_s0 + $0x170] sm:$0xff] }
  0x3e   :  { %1861 = vmatpush3.bf16.msra.mxu1 %v1971_v43  ;;  %1798 = vmatprep.subr.bf16.mxu0 %v1972_v46  ;;  %v1480_v29 = vcombine.high %v41_v24, %v45_v25  ;;  %v1487_v43 = vcombine.low %v49_v32, %v53_v33  ;;  %v1494_v44 = vcombine.high %v56_v38, %v60_v39  ;;  %v64_v46 = vld [vmem:[%s2456_s0 + $0x190] sm:$0xff] }
  0x3f   :  { %1862 = vmatprep.subr.bf16.mxu1 %v1974_v51  ;;  %v1495_v51 = vcombine.low %v57_v40, %v61_v41 }
  0x41   :  { %1799 = vmatpush3.bf16.msra.mxu0 %v1973_v48  ;;  %v65_v48 = vld [vmem:[%s2456_s0 + $0x198] sm:$0xff] }
  0x42   :  { %1863 = vmatpush3.bf16.msra.mxu1 %v1975_v53 }
  0x43   :  { %975 = vmatmul.mubr.bf16.gmra.mrb[16].mxu0 %v1481_v34  ;;  %v1477_v34 = vcombine.low %v40_v22, %v44_v23 }
  0x44   :  { %1072 = vmatmul.mubr.bf16.gmra.mrb[16].mxu1 %v1483_v35  ;;  %982 = vmatprep.mubr.bf16.mxu0 %v1490_v36  ;;  %v1479_v35 = vcombine.low %v41_v24, %v45_v25  ;;  %v1486_v36 = vcombine.high %v48_v30, %v52_v31 }
  0x45   :  { %1079 = vmatprep.mubr.bf16.mxu1 %v1492_v37  ;;  %v1488_v37 = vcombine.high %v49_v32, %v53_v33 }
  0x4b   :  { %983 = vmatmul.mubr.bf16.gmra.mrb[20].mxu0 %v1489_v47  ;;  %v68_v47 = vld [vmem:[%s2456_s0 + $0x1b0] sm:$0xff] }
  0x4c   :  { %1080 = vmatmul.mubr.bf16.gmra.mrb[20].mxu1 %v1491_v49  ;;  %990 = vmatprep.mubr.bf16.mxu0 %v1498_v50  ;;  %v69_v49 = vld [vmem:[%s2456_s0 + $0x1b8] sm:$0xff]  ;;  %v1493_v50 = vcombine.low %v56_v38, %v60_v39 }
  0x4d   :  { %1087 = vmatprep.mubr.bf16.mxu1 %v1500_v52  ;;  %v1502_v52 = vcombine.high %v64_v46, %v68_v47  ;;  %v1504_v53 = vcombine.high %v65_v48, %v69_v49 }
  0x53   :  { %991 = vmatmul.mubr.bf16.gmra.mrb[24].mxu0 %v1497_v58  ;;  %v1501_v58 = vcombine.low %v64_v46, %v68_v47 }
  0x54   :  { %1088 = vmatmul.mubr.bf16.gmra.mrb[24].mxu1 %v1499_v59  ;;  %998 = vmatprep.mubr.bf16.mxu0 %v1506_v60  ;;  %v1503_v59 = vcombine.low %v65_v48, %v69_v49  ;;  %v1510_v60 = vcombine.high %v72_v54, %v76_v55 }
  0x55   :  { %1095 = vmatprep.mubr.bf16.mxu1 %v1508_v61  ;;  %v1512_v61 = vcombine.high %v73_v56, %v77_v57 }
  0x5b   :  { %999 = vmatmul.mubr.bf16.gmra.mrb[28].mxu0 %v1505_v2 }
  0x5c   :  { %1096 = vmatmul.mubr.bf16.gmra.mrb[28].mxu1 %v1507_v3  ;;  %1136 = vmatprep.mubr.bf16.mxu0 %v1454_v4 }
  0x5d   :  { %1233 = vmatprep.mubr.bf16.mxu1 %v1456_v5 }
  0x63   :  { %1137 = vmatmul.mubr.bf16.vlgmr.msra.gmra.mrb[32].mxu0 %v1453_v10 }
  0x64   :  { %1234 = vmatmul.mubr.bf16.vlgmr.msra.gmra.mrb[32].mxu1 %v1455_v11  ;;  %1144 = vmatprep.mubr.bf16.mxu0 %v1462_v12 }
  0x65   :  { %1241 = vmatprep.mubr.bf16.mxu1 %v1464_v13 }
  0x6b   :  { %1145 = vmatmul.mubr.bf16.gmra.mrb[36].mxu0 %v1461_v18 }
  0x6c   :  { %1242 = vmatmul.mubr.bf16.gmra.mrb[36].mxu1 %v1463_v19  ;;  %1152 = vmatprep.mubr.bf16.mxu0 %v1470_v20 }
  0x6d   :  { %1249 = vmatprep.mubr.bf16.mxu1 %v1472_v21 }
  0x73   :  { %1153 = vmatmul.mubr.bf16.gmra.mrb[40].mxu0 %v1469_v26 }
  0x74   :  { %1250 = vmatmul.mubr.bf16.gmra.mrb[40].mxu1 %v1471_v27  ;;  %1160 = vmatprep.mubr.bf16.mxu0 %v1478_v28 }
  0x75   :  { %1257 = vmatprep.mubr.bf16.mxu1 %v1480_v29 }
  0x7b   :  { %1161 = vmatmul.mubr.bf16.gmra.mrb[44].mxu0 %v1477_v34 }
  0x7c   :  { %1258 = vmatmul.mubr.bf16.gmra.mrb[44].mxu1 %v1479_v35  ;;  %1168 = vmatprep.mubr.bf16.mxu0 %v1486_v36 }
  0x7d   :  { %1265 = vmatprep.mubr.bf16.mxu1 %v1488_v37 }
  0x83   :  { %1169 = vmatmul.mubr.bf16.gmra.mrb[48].mxu0 %v1485_v42 }
  0x84   :  { %1266 = vmatmul.mubr.bf16.gmra.mrb[48].mxu1 %v1487_v43  ;;  %1176 = vmatprep.mubr.bf16.mxu0 %v1494_v44 }
  0x85   :  { %1273 = vmatprep.mubr.bf16.mxu1 %v1496_v45 }
  0x8b   :  { %1177 = vmatmul.mubr.bf16.gmra.mrb[52].mxu0 %v1493_v50 }
  0x8c   :  { %1274 = vmatmul.mubr.bf16.gmra.mrb[52].mxu1 %v1495_v51  ;;  %1184 = vmatprep.mubr.bf16.mxu0 %v1502_v52 }
  0x8d   :  { %1281 = vmatprep.mubr.bf16.mxu1 %v1504_v53 }
  0x93   :  { %1185 = vmatmul.mubr.bf16.gmra.mrb[56].mxu0 %v1501_v58 }
  0x94   :  { %1282 = vmatmul.mubr.bf16.gmra.mrb[56].mxu1 %v1503_v59  ;;  %1192 = vmatprep.mubr.bf16.mxu0 %v1510_v60 }
  0x95   :  { %1289 = vmatprep.mubr.bf16.mxu1 %v1512_v61 }
  0x9b   :  { %1193 = vmatmul.mubr.bf16.gmra.mrb[60].mxu0 %v1509_v62 }
  0x9c   :  { %1290 = vmatmul.mubr.bf16.gmra.mrb[60].mxu1 %v1511_v63 }
  0xf6   :  { %v1672_v0 = vpop.f32.mrb[0].mxu0 }
  0xf7   :  { %v1736_v1 = vpop.f32.mrb[0].mxu1  ;;  %v1673_v2 = vpop.f32.mrb[1].mxu0 }
  0xf8   :  { %v1674_v3 = vadd.f32 %v1673_v2, %v1672_v0  ;;  %v1737_v4 = vpop.f32.mrb[1].mxu1  ;;  %v1675_v5 = vpop.f32.mrb[2].mxu0 }
  0xf9   :  { %v1738_v6 = vadd.f32 %v1737_v4, %v1736_v1  ;;  %v1739_v7 = vpop.f32.mrb[2].mxu1  ;;  %v1676_v8 = vpop.f32.mrb[3].mxu0 }
  0xfa   :  { %v1677_v9 = vadd.f32 %v1676_v8, %v1675_v5  ;;  %v1740_v10 = vpop.f32.mrb[3].mxu1 }
  0xfb   :  { %v2380_v11 = vadd.f32 %v1738_v6, %v1674_v3  ;;  %v1741_v12 = vadd.f32 %v1740_v10, %v1739_v7 }
  0xfd   :  { %v2382_v13 = vadd.f32 %v1741_v12, %v1677_v9 }
  0xfe   :  { %v1678_v14 = vpop.f32.mrb[4].mxu0 }
  0xff   :  { %v1742_v15 = vpop.f32.mrb[4].mxu1  ;;  %v1679_v16 = vpop.f32.mrb[5].mxu0 }
 0x100   :  { %v1680_v17 = vadd.f32 %v1679_v16, %v1678_v14  ;;  %v1743_v18 = vpop.f32.mrb[5].mxu1  ;;  %v1681_v19 = vpop.f32.mrb[6].mxu0 }
 0x101   :  { %v1744_v20 = vadd.f32 %v1743_v18, %v1742_v15  ;;  %v1745_v21 = vpop.f32.mrb[6].mxu1  ;;  %v1682_v22 = vpop.f32.mrb[7].mxu0 }
 0x102   :  { %v1683_v23 = vadd.f32 %v1682_v22, %v1681_v19  ;;  %v1746_v24 = vpop.f32.mrb[7].mxu1 }
 0x103   :  { %v2384_v25 = vadd.f32 %v1744_v20, %v1680_v17  ;;  %v1747_v26 = vadd.f32 %v1746_v24, %v1745_v21 }
 0x105   :  { %v2386_v27 = vadd.f32 %v1747_v26, %v1683_v23 }
 0x106   :  { %v1684_v28 = vpop.f32.mrb[8].mxu0 }
 0x107   :  { %v1748_v29 = vpop.f32.mrb[8].mxu1  ;;  %v1685_v30 = vpop.f32.mrb[9].mxu0 }
 0x108   :  { %v1686_v31 = vadd.f32 %v1685_v30, %v1684_v28  ;;  %v1749_v32 = vpop.f32.mrb[9].mxu1  ;;  %v1687_v33 = vpop.f32.mrb[10].mxu0 }
 0x109   :  { %v1750_v34 = vadd.f32 %v1749_v32, %v1748_v29  ;;  %v1751_v35 = vpop.f32.mrb[10].mxu1  ;;  %v1688_v36 = vpop.f32.mrb[11].mxu0 }
 0x10a   :  { %v1689_v37 = vadd.f32 %v1688_v36, %v1687_v33  ;;  %v1752_v38 = vpop.f32.mrb[11].mxu1 }
 0x10b   :  { %v2388_v39 = vadd.f32 %v1750_v34, %v1686_v31  ;;  %v1753_v40 = vadd.f32 %v1752_v38, %v1751_v35 }
 0x10d   :  { %v2390_v41 = vadd.f32 %v1753_v40, %v1689_v37 }
 0x10e   :  { %v1690_v42 = vpop.f32.mrb[12].mxu0 }
 0x10f   :  { %v1754_v43 = vpop.f32.mrb[12].mxu1  ;;  %v1691_v44 = vpop.f32.mrb[13].mxu0 }
 0x110   :  { %v1692_v45 = vadd.f32 %v1691_v44, %v1690_v42  ;;  %v1755_v46 = vpop.f32.mrb[13].mxu1  ;;  %v1693_v47 = vpop.f32.mrb[14].mxu0 }
 0x111   :  { %v1756_v48 = vadd.f32 %v1755_v46, %v1754_v43  ;;  %v1757_v49 = vpop.f32.mrb[14].mxu1  ;;  %v1694_v50 = vpop.f32.mrb[15].mxu0 }
 0x112   :  { %v1695_v51 = vadd.f32 %v1694_v50, %v1693_v47  ;;  %v1758_v52 = vpop.f32.mrb[15].mxu1 }
 0x113   :  { %v2392_v53 = vadd.f32 %v1756_v48, %v1692_v45  ;;  %v1759_v54 = vadd.f32 %v1758_v52, %v1757_v49 }
 0x115   :  { %v2394_v55 = vadd.f32 %v1759_v54, %v1695_v51 }
 0x116   :  { %v1696_v56 = vpop.f32.mrb[16].mxu0 }
 0x117   :  { %v1760_v57 = vpop.f32.mrb[16].mxu1  ;;  %v1697_v58 = vpop.f32.mrb[17].mxu0 }
 0x118   :  { %v1698_v59 = vadd.f32 %v1697_v58, %v1696_v56  ;;  %v1761_v60 = vpop.f32.mrb[17].mxu1  ;;  %v1699_v61 = vpop.f32.mrb[18].mxu0 }
 0x119   :  { %v1762_v62 = vadd.f32 %v1761_v60, %v1760_v57  ;;  %v1763_v63 = vpop.f32.mrb[18].mxu1  ;;  %v1700_v0 = vpop.f32.mrb[19].mxu0 }
 0x11a   :  { %v1701_v1 = vadd.f32 %v1700_v0, %v1699_v61  ;;  %v1764_v2 = vpop.f32.mrb[19].mxu1 }
 0x11b   :  { %v2396_v3 = vadd.f32 %v1762_v62, %v1698_v59  ;;  %v1765_v4 = vadd.f32 %v1764_v2, %v1763_v63 }
 0x11d   :  { %v2398_v5 = vadd.f32 %v1765_v4, %v1701_v1 }
 0x11e   :  { %v1702_v6 = vpop.f32.mrb[20].mxu0 }
 0x11f   :  { %v1766_v7 = vpop.f32.mrb[20].mxu1  ;;  %v1703_v8 = vpop.f32.mrb[21].mxu0 }
 0x120   :  { %v1704_v9 = vadd.f32 %v1703_v8, %v1702_v6  ;;  %v1767_v10 = vpop.f32.mrb[21].mxu1  ;;  %v1705_v12 = vpop.f32.mrb[22].mxu0 }
 0x121   :  { %v1768_v14 = vadd.f32 %v1767_v10, %v1766_v7  ;;  %v1769_v15 = vpop.f32.mrb[22].mxu1  ;;  %v1706_v16 = vpop.f32.mrb[23].mxu0 }
 0x122   :  { %v1707_v17 = vadd.f32 %v1706_v16, %v1705_v12  ;;  %v1770_v18 = vpop.f32.mrb[23].mxu1 }
 0x123   :  { %v2400_v19 = vadd.f32 %v1768_v14, %v1704_v9  ;;  %v1771_v20 = vadd.f32 %v1770_v18, %v1769_v15 }
 0x125   :  { %v2402_v21 = vadd.f32 %v1771_v20, %v1707_v17 }
 0x126   :  { %v1708_v22 = vpop.f32.mrb[24].mxu0 }
 0x127   :  { %v1772_v23 = vpop.f32.mrb[24].mxu1  ;;  %v1709_v24 = vpop.f32.mrb[25].mxu0 }
 0x128   :  { %v1710_v26 = vadd.f32 %v1709_v24, %v1708_v22  ;;  %v1773_v28 = vpop.f32.mrb[25].mxu1  ;;  %v1711_v29 = vpop.f32.mrb[26].mxu0 }
 0x129   :  { %v1774_v30 = vadd.f32 %v1773_v28, %v1772_v23  ;;  %v1775_v31 = vpop.f32.mrb[26].mxu1  ;;  %v1712_v32 = vpop.f32.mrb[27].mxu0 }
 0x12a   :  { %v1713_v33 = vadd.f32 %v1712_v32, %v1711_v29  ;;  %v1776_v34 = vpop.f32.mrb[27].mxu1 }
 0x12b   :  { %v2404_v35 = vadd.f32 %v1774_v30, %v1710_v26  ;;  %v1777_v36 = vadd.f32 %v1776_v34, %v1775_v31 }
 0x12d   :  { %v2406_v37 = vadd.f32 %v1777_v36, %v1713_v33 }
 0x12e   :  { %v1714_v38 = vpop.f32.mrb[28].mxu0 }
 0x12f   :  { %v1778_v40 = vpop.f32.mrb[28].mxu1  ;;  %v1715_v42 = vpop.f32.mrb[29].mxu0 }
 0x130   :  { %v1716_v43 = vadd.f32 %v1715_v42, %v1714_v38  ;;  %v1779_v44 = vpop.f32.mrb[29].mxu1  ;;  %v1717_v45 = vpop.f32.mrb[30].mxu0 }
 0x131   :  { %v1780_v46 = vadd.f32 %v1779_v44, %v1778_v40  ;;  %v1781_v47 = vpop.f32.mrb[30].mxu1  ;;  %v1718_v48 = vpop.f32.mrb[31].mxu0 }
 0x132   :  { %v1719_v49 = vadd.f32 %v1718_v48, %v1717_v45  ;;  %v1782_v50 = vpop.f32.mrb[31].mxu1 }
 0x133   :  { %v2408_v51 = vadd.f32 %v1780_v46, %v1716_v43  ;;  %v1783_v52 = vadd.f32 %v1782_v50, %v1781_v47 }
 0x135   :  { %v2410_v54 = vadd.f32 %v1783_v52, %v1719_v49 }
 0x136   :  { %v1800_v56 = vpop.f32.mrb[32].mxu0 }
 0x137   :  { %v1864_v57 = vpop.f32.mrb[32].mxu1  ;;  %v1801_v58 = vpop.f32.mrb[33].mxu0 }
 0x138   :  { %v1802_v59 = vadd.f32 %v1801_v58, %v1800_v56  ;;  %v1865_v60 = vpop.f32.mrb[33].mxu1  ;;  %v1803_v61 = vpop.f32.mrb[34].mxu0 }
 0x139   :  { %v1866_v62 = vadd.f32 %v1865_v60, %v1864_v57  ;;  %v1867_v63 = vpop.f32.mrb[34].mxu1  ;;  %v1804_v0 = vpop.f32.mrb[35].mxu0 }
 0x13a   :  { %v1139_v1 = vadd.f32 %v1802_v59, %v2380_v11  ;;  %v1805_v2 = vadd.f32 %v1804_v0, %v1803_v61  ;;  %v1868_v4 = vpop.f32.mrb[35].mxu1 }
 0x13b   :  { %v1869_v6 = vadd.f32 %v1868_v4, %v1867_v63 }
 0x13c   :  { %v1236_v7 = vadd.f32 %v1866_v62, %v1139_v1  ;;  %v1142_v8 = vadd.f32 %v1805_v2, %v2382_v13 }
 0x13e   :  { %v1239_v9 = vadd.f32 %v1869_v6, %v1142_v8  ;;  %v1806_v10 = vpop.f32.mrb[36].mxu0  ;;  %v1319_v12 = vmul.f32 %v1236_v7, %v1236_v7 }
 0x13f   :  { %v1870_v14 = vpop.f32.mrb[36].mxu1  ;;  %v1807_v15 = vpop.f32.mrb[37].mxu0 }
 0x140   :  { %v1298_v16 = vadd.f32 %v1239_v9, %v1236_v7  ;;  %v1320_v17 = vmul.f32 %v1239_v9, %v1239_v9  ;;  %v1612_v18 = vpack.c.bf16 %v1239_v9, %v1236_v7  ;;  %v1808_v20 = vadd.f32 %v1807_v15, %v1806_v10  ;;  %v1871_v22 = vpop.f32.mrb[37].mxu1  ;;  %v1809_v23 = vpop.f32.mrb[38].mxu0 }
 0x141   :  { %v1872_v24 = vadd.f32 %v1871_v22, %v1870_v14  ;;  %v1873_v26 = vpop.f32.mrb[38].mxu1  ;;  %v1810_v11 = vpop.f32.mrb[39].mxu0 }
 0x142   :  { %v1335_v28 = vadd.f32 %v1320_v17, %v1319_v12  ;;  %1613 = vst [vmem:[%s2457_s2] sm:$0xff] %v1612_v18   ;;  %v1147_v13 = vadd.f32 %v1808_v20, %v2384_v25  ;;  %v1811_v29 = vadd.f32 %v1810_v11, %v1809_v23  ;;  %v1874_v30 = vpop.f32.mrb[39].mxu1 }
 0x143   :  { %v1875_v31 = vadd.f32 %v1874_v30, %v1873_v26 }
 0x144   :  { %v1244_v32 = vadd.f32 %v1872_v24, %v1147_v13  ;;  %v1150_v33 = vadd.f32 %v1811_v29, %v2386_v27 }
 0x146   :  { %v1299_v34 = vadd.f32 %v1298_v16, %v1244_v32  ;;  %v1321_v36 = vmul.f32 %v1244_v32, %v1244_v32  ;;  %v1247_v38 = vadd.f32 %v1875_v31, %v1150_v33  ;;  %v1812_v40 = vpop.f32.mrb[40].mxu0 }
 0x147   :  { %v1876_v42 = vpop.f32.mrb[40].mxu1  ;;  %v1813_v43 = vpop.f32.mrb[41].mxu0 }
 0x148   :  { %v1336_v44 = vadd.f32 %v1335_v28, %v1321_v36  ;;  %v1300_v45 = vadd.f32 %v1299_v34, %v1247_v38  ;;  %v1322_v46 = vmul.f32 %v1247_v38, %v1247_v38  ;;  %v1617_v47 = vpack.c.bf16 %v1247_v38, %v1244_v32  ;;  %v1877_v48 = vpop.f32.mrb[41].mxu1  ;;  %v1815_v49 = vpop.f32.mrb[42].mxu0 }
 0x149   :  { %v1814_v50 = vadd.f32 %v1813_v43, %v1812_v40  ;;  %v1878_v25 = vadd.f32 %v1877_v48, %v1876_v42  ;;  %v1879_v52 = vpop.f32.mrb[42].mxu1  ;;  %v1816_v56 = vpop.f32.mrb[43].mxu0 }
 0x14a   :  { %v1337_v57 = vadd.f32 %v1336_v44, %v1322_v46  ;;  %1649 = vst [vmem:[%s2457_s2 + $0x8] sm:$0xff] %v1617_v47   ;;  %v1817_v27 = vadd.f32 %v1816_v56, %v1815_v49  ;;  %v1880_v58 = vpop.f32.mrb[43].mxu1 }
 0x14b   :  { %v1155_v59 = vadd.f32 %v1814_v50, %v2388_v39  ;;  %v1881_v60 = vadd.f32 %v1880_v58, %v1879_v52 }
 0x14c   :  { %v1158_v61 = vadd.f32 %v1817_v27, %v2390_v41 }
 0x14d   :  { %v1252_v62 = vadd.f32 %v1878_v25, %v1155_v59 }
 0x14e   :  { %v1255_v63 = vadd.f32 %v1881_v60, %v1158_v61  ;;  %v1818_v0 = vpop.f32.mrb[44].mxu0 }
 0x14f   :  { %v1301_v1 = vadd.f32 %v1300_v45, %v1252_v62  ;;  %v1323_v2 = vmul.f32 %v1252_v62, %v1252_v62  ;;  %v1882_v4 = vpop.f32.mrb[44].mxu1  ;;  %v1819_v6 = vpop.f32.mrb[45].mxu0 }
 0x150   :  { %v1324_v7 = vmul.f32 %v1255_v63, %v1255_v63  ;;  %v1622_v8 = vpack.c.bf16 %v1255_v63, %v1252_v62  ;;  %v1820_v9 = vadd.f32 %v1819_v6, %v1818_v0  ;;  %v1883_v10 = vpop.f32.mrb[45].mxu1  ;;  %v1821_v12 = vpop.f32.mrb[46].mxu0 }
 0x151   :  { %v1338_v14 = vadd.f32 %v1337_v57, %v1323_v2  ;;  %v1302_v15 = vadd.f32 %v1301_v1, %v1255_v63  ;;  %v1884_v16 = vadd.f32 %v1883_v10, %v1882_v4  ;;  %v1885_v17 = vpop.f32.mrb[46].mxu1  ;;  %v1822_v39 = vpop.f32.mrb[47].mxu0 }
 0x152   :  { %1650 = vst [vmem:[%s2457_s2 + $0x10] sm:$0xff] %v1622_v8   ;;  %v1163_v41 = vadd.f32 %v1820_v9, %v2392_v53  ;;  %v1823_v18 = vadd.f32 %v1822_v39, %v1821_v12  ;;  %v1886_v20 = vpop.f32.mrb[47].mxu1 }
 0x153   :  { %v1339_v22 = vadd.f32 %v1338_v14, %v1324_v7  ;;  %v1887_v23 = vadd.f32 %v1886_v20, %v1885_v17 }
 0x154   :  { %v1260_v24 = vadd.f32 %v1884_v16, %v1163_v41  ;;  %v1166_v26 = vadd.f32 %v1823_v18, %v2394_v55 }
 0x156   :  { %v1303_v11 = vadd.f32 %v1302_v15, %v1260_v24  ;;  %v1325_v28 = vmul.f32 %v1260_v24, %v1260_v24  ;;  %v1263_v13 = vadd.f32 %v1887_v23, %v1166_v26  ;;  %v1824_v29 = vpop.f32.mrb[48].mxu0 }
 0x157   :  { %v1888_v30 = vpop.f32.mrb[48].mxu1  ;;  %v1825_v31 = vpop.f32.mrb[49].mxu0 }
 0x158   :  { %v1340_v32 = vadd.f32 %v1339_v22, %v1325_v28  ;;  %v1304_v33 = vadd.f32 %v1303_v11, %v1263_v13  ;;  %v1326_v34 = vmul.f32 %v1263_v13, %v1263_v13  ;;  %v1627_v36 = vpack.c.bf16 %v1263_v13, %v1260_v24  ;;  %v1889_v38 = vpop.f32.mrb[49].mxu1  ;;  %v1827_v40 = vpop.f32.mrb[50].mxu0 }
 0x159   :  { %v1826_v53 = vadd.f32 %v1825_v31, %v1824_v29  ;;  %v1890_v42 = vadd.f32 %v1889_v38, %v1888_v30  ;;  %v1891_v43 = vpop.f32.mrb[50].mxu1  ;;  %v1828_v44 = vpop.f32.mrb[51].mxu0 }
 0x15a   :  { %v1341_v45 = vadd.f32 %v1340_v32, %v1326_v34  ;;  %1651 = vst [vmem:[%s2457_s2 + $0x18] sm:$0xff] %v1627_v36   ;;  %v1829_v55 = vadd.f32 %v1828_v44, %v1827_v40  ;;  %v1892_v46 = vpop.f32.mrb[51].mxu1 }
 0x15b   :  { %v1171_v47 = vadd.f32 %v1826_v53, %v2396_v3  ;;  %v1893_v48 = vadd.f32 %v1892_v46, %v1891_v43 }
 0x15c   :  { %v1174_v49 = vadd.f32 %v1829_v55, %v2398_v5 }
 0x15d   :  { %v1268_v50 = vadd.f32 %v1890_v42, %v1171_v47 }
 0x15e   :  { %v1271_v25 = vadd.f32 %v1893_v48, %v1174_v49  ;;  %v1830_v52 = vpop.f32.mrb[52].mxu0 }
 0x15f   :  { %v1305_v56 = vadd.f32 %v1304_v33, %v1268_v50  ;;  %v1327_v57 = vmul.f32 %v1268_v50, %v1268_v50  ;;  %v1894_v27 = vpop.f32.mrb[52].mxu1  ;;  %v1831_v58 = vpop.f32.mrb[53].mxu0 }
 0x160   :  { %v1328_v59 = vmul.f32 %v1271_v25, %v1271_v25  ;;  %v1632_v60 = vpack.c.bf16 %v1271_v25, %v1268_v50  ;;  %v1832_v61 = vadd.f32 %v1831_v58, %v1830_v52  ;;  %v1895_v62 = vpop.f32.mrb[53].mxu1  ;;  %v1833_v63 = vpop.f32.mrb[54].mxu0 }
 0x161   :  { %v1342_v0 = vadd.f32 %v1341_v45, %v1327_v57  ;;  %v1306_v1 = vadd.f32 %v1305_v56, %v1271_v25  ;;  %v1896_v2 = vadd.f32 %v1895_v62, %v1894_v27  ;;  %v1897_v4 = vpop.f32.mrb[54].mxu1  ;;  %v1834_v3 = vpop.f32.mrb[55].mxu0 }
 0x162   :  { %1652 = vst [vmem:[%s2457_s2 + $0x20] sm:$0xff] %v1632_v60   ;;  %v1179_v5 = vadd.f32 %v1832_v61, %v2400_v19  ;;  %v1835_v6 = vadd.f32 %v1834_v3, %v1833_v63  ;;  %v1898_v7 = vpop.f32.mrb[55].mxu1 }
 0x163   :  { %v1343_v8 = vadd.f32 %v1342_v0, %v1328_v59  ;;  %v1899_v9 = vadd.f32 %v1898_v7, %v1897_v4 }
 0x164   :  { %v1276_v10 = vadd.f32 %v1896_v2, %v1179_v5  ;;  %v1182_v12 = vadd.f32 %v1835_v6, %v2402_v21 }
 0x166   :  { %v1307_v14 = vadd.f32 %v1306_v1, %v1276_v10  ;;  %v1329_v15 = vmul.f32 %v1276_v10, %v1276_v10  ;;  %v1279_v16 = vadd.f32 %v1899_v9, %v1182_v12  ;;  %v1836_v17 = vpop.f32.mrb[56].mxu0 }
 0x167   :  { %v1900_v39 = vpop.f32.mrb[56].mxu1  ;;  %v1837_v41 = vpop.f32.mrb[57].mxu0 }
 0x168   :  { %v1344_v18 = vadd.f32 %v1343_v8, %v1329_v15  ;;  %v1308_v20 = vadd.f32 %v1307_v14, %v1279_v16  ;;  %v1330_v22 = vmul.f32 %v1279_v16, %v1279_v16  ;;  %v1637_v23 = vpack.c.bf16 %v1279_v16, %v1276_v10  ;;  %v1901_v24 = vpop.f32.mrb[57].mxu1  ;;  %v1839_v26 = vpop.f32.mrb[58].mxu0 }
 0x169   :  { %v1838_v19 = vadd.f32 %v1837_v41, %v1836_v17  ;;  %v1902_v11 = vadd.f32 %v1901_v24, %v1900_v39  ;;  %v1903_v28 = vpop.f32.mrb[58].mxu1  ;;  %v1840_v13 = vpop.f32.mrb[59].mxu0 }
 0x16a   :  { %v1345_v29 = vadd.f32 %v1344_v18, %v1330_v22  ;;  %1653 = vst [vmem:[%s2457_s2 + $0x28] sm:$0xff] %v1637_v23   ;;  %v1841_v21 = vadd.f32 %v1840_v13, %v1839_v26  ;;  %v1904_v30 = vpop.f32.mrb[59].mxu1 }
 0x16b   :  { %v1187_v31 = vadd.f32 %v1838_v19, %v2404_v35  ;;  %v1905_v32 = vadd.f32 %v1904_v30, %v1903_v28 }
 0x16c   :  { %v1190_v33 = vadd.f32 %v1841_v21, %v2406_v37 }
 0x16d   :  { %v1284_v34 = vadd.f32 %v1902_v11, %v1187_v31 }
 0x16e   :  { %v1287_v36 = vadd.f32 %v1905_v32, %v1190_v33  ;;  %v1842_v38 = vpop.f32.mrb[60].mxu0 }
 0x16f   :  { %v1309_v40 = vadd.f32 %v1308_v20, %v1284_v34  ;;  %v1331_v53 = vmul.f32 %v1284_v34, %v1284_v34  ;;  %v1906_v42 = vpop.f32.mrb[60].mxu1  ;;  %v1843_v43 = vpop.f32.mrb[61].mxu0 }
 0x170   :  { %v1332_v44 = vmul.f32 %v1287_v36, %v1287_v36  ;;  %v1642_v45 = vpack.c.bf16 %v1287_v36, %v1284_v34  ;;  %v1844_v55 = vadd.f32 %v1843_v43, %v1842_v38  ;;  %v1907_v46 = vpop.f32.mrb[61].mxu1  ;;  %v1845_v47 = vpop.f32.mrb[62].mxu0 }
 0x171   :  { %v1346_v48 = vadd.f32 %v1345_v29, %v1331_v53  ;;  %v1310_v49 = vadd.f32 %v1309_v40, %v1287_v36  ;;  %v1908_v50 = vadd.f32 %v1907_v46, %v1906_v42  ;;  %v1909_v25 = vpop.f32.mrb[62].mxu1  ;;  %v1846_v35 = vpop.f32.mrb[63].mxu0 }
 0x172   :  { %1654 = vst [vmem:[%s2457_s2 + $0x30] sm:$0xff] %v1642_v45   ;;  %v1195_v37 = vadd.f32 %v1844_v55, %v2408_v51  ;;  %v1847_v52 = vadd.f32 %v1846_v35, %v1845_v47  ;;  %v1910_v56 = vpop.f32.mrb[63].mxu1 }
 0x173   :  { %v1347_v57 = vadd.f32 %v1346_v48, %v1332_v44  ;;  %v1911_v27 = vadd.f32 %v1910_v56, %v1909_v25 }
 0x174   :  { %v1292_v58 = vadd.f32 %v1908_v50, %v1195_v37  ;;  %v1198_v59 = vadd.f32 %v1847_v52, %v2410_v54 }
 0x176   :  { %v1311_v60 = vadd.f32 %v1310_v49, %v1292_v58  ;;  %v1333_v61 = vmul.f32 %v1292_v58, %v1292_v58  ;;  %v1295_v62 = vadd.f32 %v1911_v27, %v1198_v59 }
 0x178   :  { %v1348_v63 = vadd.f32 %v1347_v57, %v1333_v61  ;;  %v1312_v0 = vadd.f32 %v1311_v60, %v1295_v62  ;;  %v1334_v1 = vmul.f32 %v1295_v62, %v1295_v62  ;;  %v1647_v2 = vpack.c.bf16 %v1295_v62, %v1292_v58 }
 0x17a   :  { %v1313_v4 = vrot.slane %v1312_v0, 4  ;;  %v1349_v3 = vadd.f32 %v1348_v63, %v1334_v1  ;;  %1655 = vst [vmem:[%s2457_s2 + $0x38] sm:$0xff] %v1647_v2  }
 0x17c   :  { %v1314_v51 = vadd.f32 %v1313_v4, %v1312_v0  ;;  %v1350_v5 = vrot.slane %v1349_v3, 4 }
 0x17e   :  { %v1315_v6 = vrot.slane %v1314_v51, 2  ;;  %v1351_v7 = vadd.f32 %v1350_v5, %v1349_v3 }
 0x180   :  { %v1316_v8 = vadd.f32 %v1315_v6, %v1314_v51  ;;  %v1352_v9 = vrot.slane %v1351_v7, 2 }
 0x182   :  { %v1317_v54 = vrot.slane %v1316_v8, 1  ;;  %v1353_v10 = vadd.f32 %v1352_v9, %v1351_v7 }
 0x184   :  { %v1354_v12 = vrot.slane %v1353_v10, 1  ;;  %v1318_v14 = vadd.f32 %v1317_v54, %v1316_v8 }
 0x186   :  { %v1355_v15 = vadd.f32 %v1354_v12, %v1353_v10 }
 0x188   :  { %v1357_v16 = vsel %vm1356_vm0, %v1318_v14, %v1355_v15 }
 0x189   :  { %v1359_v17 = vsel %vm1358_vm1, %v1357_v16, 0.0 }
 0x18a   :  { %1360 = vst [vmem:[%s2458_s3] sm:$0xff] %v1359_v17 }

// kernel: discriminator_forward.6
= control target key start
LH: loop header
LB: loop body
LE: loop exit
PB: predicated region body
PF: predicated region fallthrough
CT: control target
= control target key end

     0   :  { %v119_v37 = vlaneseq  ;;  %vm2575_vm0 = vcmask 1040384   ;;  %vm2578_vm1 = vcmask 1041408   ;;  %s4589_s1 = inlined_call_operand.vmem [shape: bf16[2048,256], index: 1, kind: input, shape index: {}]   ;;  %s4590_s0 = inlined_call_operand.vmem [shape: bf16[32,2048], index: 0, kind: input, shape index: {}]   ;;  %s4591_s2 = inlined_call_operand.vmem [shape: f32[1,2048], index: 2, kind: input, shape index: {}]   ;;  %s4592_s3 = inlined_call_operand.vmem [shape: f32[1,2048], index: 3, kind: input, shape index: {}]   ;;  %s4593_s4 = inlined_call_operand.vmem [shape: bf16[32,256], index: 4, kind: output, shape index: {0}]   ;;  %s4594_s5 = inlined_call_operand.vmem [shape: f32[1,8,256], index: 5, kind: output, shape index: {1}]  }
   0x1   :  { %v2939_v0 = vld [vmem:[%s4589_s1 + $0x4] ss:$8 sps:$4 sm:$0xff]   ;;  %v2943_v2 = vld [vmem:[%s4589_s1] ss:$8 sps:$4 sm:$0xff]   ;;  %v2945_v4 = vld [vmem:[%s4589_s1 + $0x14] ss:$8 sps:$4 sm:$0xff]  }
   0x2   :  { %v2941_v1 = vld [vmem:[%s4589_s1 + $0x404] ss:$8 sps:$4 sm:$0xff]   ;;  %2107 = vmatprep.subr.bf16.mxu1 %v2939_v0  ;;  %v2944_v3 = vld [vmem:[%s4589_s1 + $0x400] ss:$8 sps:$4 sm:$0xff]   ;;  %v2947_v5 = vld [vmem:[%s4589_s1 + $0x414] ss:$8 sps:$4 sm:$0xff]  }
   0x3   :  { %2319 = vmatprep.subr.bf16.mxu0 %v2941_v1  ;;  %2108 = vmatpush1.bf16.msra.mxu1 %v2943_v2  ;;  %v2949_v6 = vld [vmem:[%s4589_s1 + $0x10] ss:$8 sps:$4 sm:$0xff]   ;;  %v2951_v8 = vld [vmem:[%s4589_s1 + $0x24] ss:$8 sps:$4 sm:$0xff]   ;;  %v2955_v10 = vld [vmem:[%s4589_s1 + $0x20] ss:$8 sps:$4 sm:$0xff]  }
   0x4   :  { %2320 = vmatpush1.bf16.msra.mxu0 %v2944_v3  ;;  %2109 = vmatprep.subr.bf16.mxu1 %v2945_v4  ;;  %v2950_v7 = vld [vmem:[%s4589_s1 + $0x410] ss:$8 sps:$4 sm:$0xff]   ;;  %v2953_v9 = vld [vmem:[%s4589_s1 + $0x424] ss:$8 sps:$4 sm:$0xff]   ;;  %v2956_v11 = vld [vmem:[%s4589_s1 + $0x420] ss:$8 sps:$4 sm:$0xff]  }
   0x5   :  { %2321 = vmatprep.subr.bf16.mxu0 %v2947_v5  ;;  %v2957_v12 = vld [vmem:[%s4589_s1 + $0x34] ss:$8 sps:$4 sm:$0xff]   ;;  %v2961_v14 = vld [vmem:[%s4589_s1 + $0x30] ss:$8 sps:$4 sm:$0xff]   ;;  %v2963_v16 = vld [vmem:[%s4589_s1 + $0x44] ss:$8 sps:$4 sm:$0xff]  }
   0x6   :  { %v2959_v13 = vld [vmem:[%s4589_s1 + $0x434] ss:$8 sps:$4 sm:$0xff]   ;;  %v2962_v15 = vld [vmem:[%s4589_s1 + $0x430] ss:$8 sps:$4 sm:$0xff]   ;;  %v2965_v17 = vld [vmem:[%s4589_s1 + $0x444] ss:$8 sps:$4 sm:$0xff]  }
   0x7   :  { %2110 = vmatpush1.bf16.msra.mxu1 %v2949_v6  ;;  %v2967_v18 = vld [vmem:[%s4589_s1 + $0x40] ss:$8 sps:$4 sm:$0xff]   ;;  %v2969_v20 = vld [vmem:[%s4589_s1 + $0x54] ss:$8 sps:$4 sm:$0xff]   ;;  %v2973_v22 = vld [vmem:[%s4589_s1 + $0x50] ss:$8 sps:$4 sm:$0xff]  }
   0x8   :  { %2322 = vmatpush1.bf16.msra.mxu0 %v2950_v7  ;;  %2111 = vmatprep.subr.bf16.mxu1 %v2951_v8  ;;  %v2968_v19 = vld [vmem:[%s4589_s1 + $0x440] ss:$8 sps:$4 sm:$0xff]   ;;  %v2971_v21 = vld [vmem:[%s4589_s1 + $0x454] ss:$8 sps:$4 sm:$0xff]   ;;  %v2974_v23 = vld [vmem:[%s4589_s1 + $0x450] ss:$8 sps:$4 sm:$0xff]  }
   0x9   :  { %2323 = vmatprep.subr.bf16.mxu0 %v2953_v9  ;;  %v2975_v24 = vld [vmem:[%s4589_s1 + $0x64] ss:$8 sps:$4 sm:$0xff]   ;;  %v2979_v26 = vld [vmem:[%s4589_s1 + $0x60] ss:$8 sps:$4 sm:$0xff]   ;;  %v2981_v28 = vld [vmem:[%s4589_s1 + $0x74] ss:$8 sps:$4 sm:$0xff]  }
   0xa   :  { %v2977_v25 = vld [vmem:[%s4589_s1 + $0x464] ss:$8 sps:$4 sm:$0xff]   ;;  %v2980_v27 = vld [vmem:[%s4589_s1 + $0x460] ss:$8 sps:$4 sm:$0xff]   ;;  %v2983_v29 = vld [vmem:[%s4589_s1 + $0x474] ss:$8 sps:$4 sm:$0xff]  }
   0xb   :  { %2112 = vmatpush1.bf16.msra.mxu1 %v2955_v10  ;;  %v2985_v30 = vld [vmem:[%s4589_s1 + $0x70] ss:$8 sps:$4 sm:$0xff]   ;;  %v2987_v32 = vld [vmem:[%s4589_s1 + $0x84] ss:$8 sps:$4 sm:$0xff]   ;;  %v2991_v34 = vld [vmem:[%s4589_s1 + $0x80] ss:$8 sps:$4 sm:$0xff]  }
   0xc   :  { %2324 = vmatpush1.bf16.msra.mxu0 %v2956_v11  ;;  %2113 = vmatprep.subr.bf16.mxu1 %v2957_v12  ;;  %v2986_v31 = vld [vmem:[%s4589_s1 + $0x470] ss:$8 sps:$4 sm:$0xff]   ;;  %v2989_v33 = vld [vmem:[%s4589_s1 + $0x484] ss:$8 sps:$4 sm:$0xff]   ;;  %v2992_v35 = vld [vmem:[%s4589_s1 + $0x480] ss:$8 sps:$4 sm:$0xff]  }
   0xd   :  { %2325 = vmatprep.subr.bf16.mxu0 %v2959_v13  ;;  %v2993_v36 = vld [vmem:[%s4589_s1 + $0x94] ss:$8 sps:$4 sm:$0xff]   ;;  %v2997_v39 = vld [vmem:[%s4589_s1 + $0x90] ss:$8 sps:$4 sm:$0xff]   ;;  %v2999_v41 = vld [vmem:[%s4589_s1 + $0xa4] ss:$8 sps:$4 sm:$0xff]  }
   0xe   :  { %v2995_v38 = vld [vmem:[%s4589_s1 + $0x494] ss:$8 sps:$4 sm:$0xff]   ;;  %v2998_v40 = vld [vmem:[%s4589_s1 + $0x490] ss:$8 sps:$4 sm:$0xff]   ;;  %v3480_v42 = vshrl.u32 %v119_v37, 7  ;;  %v19_v52 = vld [vmem:[%s4590_s0] sm:$0xff] }
   0xf   :  { %2114 = vmatpush1.bf16.msra.mxu1 %v2961_v14  ;;  %v3001_v43 = vld [vmem:[%s4589_s1 + $0x4a4] ss:$8 sps:$4 sm:$0xff]   ;;  %v3003_v44 = vld [vmem:[%s4589_s1 + $0xa0] ss:$8 sps:$4 sm:$0xff]   ;;  %v3005_v46 = vld [vmem:[%s4589_s1 + $0xb4] ss:$8 sps:$4 sm:$0xff]   ;;  %v52_v54 = vunpack.c.h.bf16 %v19_v52  ;;  %v51_v58 = vunpack.c.l.bf16 %v19_v52 }
  0x10   :  { %2326 = vmatpush1.bf16.msra.mxu0 %v2962_v15  ;;  %2115 = vmatprep.subr.bf16.mxu1 %v2963_v16  ;;  %v3004_v45 = vld [vmem:[%s4589_s1 + $0x4a0] ss:$8 sps:$4 sm:$0xff]   ;;  %v125_v47 = vsub.s32 1, %v3480_v42  ;;  %v3007_v48 = vld [vmem:[%s4589_s1 + $0x4b4] ss:$8 sps:$4 sm:$0xff]   ;;  %v121_v49 = vsub.s32 0, %v3480_v42 }
  0x11   :  { %2327 = vmatprep.subr.bf16.mxu0 %v2965_v17  ;;  %v3009_v50 = vld [vmem:[%s4589_s1 + $0xb0] ss:$8 sps:$4 sm:$0xff]   ;;  %v27_v53 = vld [vmem:[%s4590_s0 + $0x40] sm:$0xff]  ;;  %v3547_v6 = vld [vmem:[%s4591_s2 + $0x8] sm:$0xff] }
  0x12   :  { %v3010_v51 = vld [vmem:[%s4589_s1 + $0x4b0] ss:$8 sps:$4 sm:$0xff]   ;;  %v3514_v55 = vld [vmem:[%s4591_s2] sm:$0xff]  ;;  %v68_v59 = vunpack.c.h.bf16 %v27_v53  ;;  %v67_v63 = vunpack.c.l.bf16 %v27_v53  ;;  %v3552_v7 = vld [vmem:[%s4592_s3 + $0x8] sm:$0xff]  ;;  %v3564_v12 = vrot.slane %v3547_v6, %v125_v47 }
  0x13   :  { %2116 = vmatpush1.bf16.msra.mxu1 %v2967_v18  ;;  %v3519_v56 = vld [vmem:[%s4592_s3] sm:$0xff]  ;;  %v3525_v60 = vrot.slane %v3514_v55, %v125_v47  ;;  %v3540_v2 = vrot.slane %v3514_v55, %v121_v49  ;;  %v3567_v13 = vrot.slane %v3552_v7, %v125_v47  ;;  %v3017_v14 = vld [vmem:[%s4589_s1 + $0xd4] ss:$8 sps:$4 sm:$0xff]  }
  0x14   :  { %2328 = vmatpush1.bf16.msra.mxu0 %v2968_v19  ;;  %2117 = vmatprep.subr.bf16.mxu1 %v2969_v20  ;;  %v3011_v57 = vld [vmem:[%s4589_s1 + $0xc4] ss:$8 sps:$4 sm:$0xff]   ;;  %v3528_v61 = vrot.slane %v3519_v56, %v125_v47  ;;  %v3555_v8 = vrot.slane %v3519_v56, %v121_v49  ;;  %v3015_v9 = vld [vmem:[%s4589_s1 + $0xc0] ss:$8 sps:$4 sm:$0xff]   ;;  %v3019_v19 = vld [vmem:[%s4589_s1 + $0x4d4] ss:$8 sps:$4 sm:$0xff]  }
  0x15   :  { %2329 = vmatprep.subr.bf16.mxu0 %v2971_v21  ;;  %v3013_v62 = vld [vmem:[%s4589_s1 + $0x4c4] ss:$8 sps:$4 sm:$0xff]   ;;  %v200_v3 = vmul.f32 %v3525_v60, %v52_v54  ;;  %v216_v4 = vmul.f32 %v3525_v60, %v68_v59  ;;  %v3016_v10 = vld [vmem:[%s4589_s1 + $0x4c0] ss:$8 sps:$4 sm:$0xff]   ;;  %v199_v18 = vmul.f32 %v3540_v2, %v51_v58  ;;  %v3029_v52 = vld [vmem:[%s4589_s1 + $0xf4] ss:$8 sps:$4 sm:$0xff]  }
  0x16   :  { %v23_v0 = vld [vmem:[%s4590_s0 + $0x20] sm:$0xff]  ;;  %v3031_v54 = vld [vmem:[%s4589_s1 + $0x4f4] ss:$8 sps:$4 sm:$0xff]   ;;  %v3033_v59 = vld [vmem:[%s4589_s1 + $0xf0] ss:$8 sps:$4 sm:$0xff]  }
  0x17   :  { %2118 = vmatpush1.bf16.msra.mxu1 %v2973_v22  ;;  %v31_v1 = vld [vmem:[%s4590_s0 + $0x60] sm:$0xff]  ;;  %v60_v5 = vunpack.c.h.bf16 %v23_v0  ;;  %v348_v15 = vadd.f32 %v3528_v61, %v200_v3  ;;  %v364_v16 = vadd.f32 %v3528_v61, %v216_v4  ;;  %v59_v17 = vunpack.c.l.bf16 %v23_v0  ;;  %v3034_v3 = vld [vmem:[%s4589_s1 + $0x4f0] ss:$8 sps:$4 sm:$0xff]  }
  0x18   :  { %2330 = vmatpush1.bf16.msra.mxu0 %v2974_v23  ;;  %2119 = vmatprep.subr.bf16.mxu1 %v2975_v24  ;;  %v76_v11 = vunpack.c.h.bf16 %v31_v1  ;;  %v75_v20 = vunpack.c.l.bf16 %v31_v1  ;;  %v215_v23 = vmul.f32 %v3540_v2, %v67_v63  ;;  %v3037_v4 = vld [vmem:[%s4589_s1 + $0x104] ss:$8 sps:$4 sm:$0xff]  }
  0x19   :  { %2331 = vmatprep.subr.bf16.mxu0 %v2977_v25  ;;  %v208_v21 = vmul.f32 %v3564_v12, %v60_v5  ;;  %v412_v24 = vmul.f32 0.2, %v348_v15  ;;  %v428_v25 = vmul.f32 0.2, %v364_v16  ;;  %v3040_v5 = vld [vmem:[%s4589_s1 + $0x504] ss:$8 sps:$4 sm:$0xff]  }
  0x1a   :  { %v224_v22 = vmul.f32 %v3564_v12, %v76_v11 }
  0x1b   :  { %2120 = vmatpush1.bf16.msra.mxu1 %v2979_v26  ;;  %v347_v26 = vadd.f32 %v3555_v8, %v199_v18  ;;  %v3044_v18 = vld [vmem:[%s4589_s1 + $0x510] ss:$8 sps:$4 sm:$0xff]  }
  0x1c   :  { %2332 = vmatpush1.bf16.msra.mxu0 %v2980_v27  ;;  %2121 = vmatprep.subr.bf16.mxu1 %v2981_v28  ;;  %v3583_v27 = vrot.slane %v3547_v6, %v121_v49  ;;  %v356_v28 = vadd.f32 %v3567_v13, %v208_v21  ;;  %v3047_v21 = vld [vmem:[%s4589_s1 + $0x120] ss:$8 sps:$4 sm:$0xff]  }
  0x1d   :  { %2333 = vmatprep.subr.bf16.mxu0 %v2983_v29  ;;  %v372_v29 = vadd.f32 %v3567_v13, %v224_v22  ;;  %v3050_v22 = vld [vmem:[%s4589_s1 + $0x520] ss:$8 sps:$4 sm:$0xff]  }
  0x1e   :  { %v207_v37 = vmul.f32 %v3583_v27, %v59_v17  ;;  %v3041_v17 = vld [vmem:[%s4589_s1 + $0x110] ss:$8 sps:$4 sm:$0xff]  }
  0x1f   :  { %2122 = vmatpush1.bf16.msra.mxu1 %v2985_v30  ;;  %v363_v30 = vadd.f32 %v3555_v8, %v215_v23  ;;  %v3055_v23 = vld [vmem:[%s4589_s1 + $0x134] ss:$8 sps:$4 sm:$0xff]  }
  0x20   :  { %2334 = vmatpush1.bf16.msra.mxu0 %v2986_v31  ;;  %2123 = vmatprep.subr.bf16.mxu1 %v2987_v32  ;;  %v3589_v31 = vrot.slane %v3552_v7, %v121_v49  ;;  %v3021_v32 = vld [vmem:[%s4589_s1 + $0xd0] ss:$8 sps:$4 sm:$0xff]  }
  0x21   :  { %2335 = vmatprep.subr.bf16.mxu0 %v2989_v33  ;;  %v3022_v33 = vld [vmem:[%s4589_s1 + $0x4d0] ss:$8 sps:$4 sm:$0xff]   ;;  %v427_v49 = vmul.f32 0.2, %v363_v30 }
  0x23   :  { %2124 = vmatpush1.bf16.msra.mxu1 %v2991_v34  ;;  %v3023_v34 = vld [vmem:[%s4589_s1 + $0xe4] ss:$8 sps:$4 sm:$0xff]   ;;  %v491_v63 = vmax.f32 %v363_v30, %v427_v49  ;;  %v3059_v30 = vld [vmem:[%s4589_s1 + $0x140] ss:$8 sps:$4 sm:$0xff]  }
  0x24   :  { %2336 = vmatpush1.bf16.msra.mxu0 %v2992_v35  ;;  %2125 = vmatprep.subr.bf16.mxu1 %v2993_v36  ;;  %v476_v35 = vmax.f32 %v348_v15, %v412_v24  ;;  %v492_v36 = vmax.f32 %v364_v16, %v428_v25  ;;  %v3043_v15 = vld [vmem:[%s4589_s1 + $0x114] ss:$8 sps:$4 sm:$0xff]   ;;  %v3053_v25 = vld [vmem:[%s4589_s1 + $0x130] ss:$8 sps:$4 sm:$0xff]   ;;  %v47_v49 = vld [vmem:[%s4590_s0 + $0xe0] sm:$0xff] }
  0x25   :  { %2337 = vmatprep.subr.bf16.mxu0 %v2995_v38  ;;  %v3025_v38 = vld [vmem:[%s4589_s1 + $0x4e4] ss:$8 sps:$4 sm:$0xff]   ;;  %v3046_v16 = vld [vmem:[%s4589_s1 + $0x514] ss:$8 sps:$4 sm:$0xff]  }
  0x26   :  { %v3058_v24 = vld [vmem:[%s4589_s1 + $0x534] ss:$8 sps:$4 sm:$0xff]  }
  0x27   :  { %2126 = vmatpush1.bf16.msra.mxu1 %v2997_v39  ;;  %v420_v39 = vmul.f32 0.2, %v356_v28 }
  0x28   :  { %2338 = vmatpush1.bf16.msra.mxu0 %v2998_v40  ;;  %2127 = vmatprep.subr.bf16.mxu1 %v2999_v41  ;;  %v436_v40 = vmul.f32 0.2, %v372_v29  ;;  %v223_v41 = vmul.f32 %v3583_v27, %v75_v20  ;;  %v3052_v20 = vld [vmem:[%s4589_s1 + $0x524] ss:$8 sps:$4 sm:$0xff]  }
  0x29   :  { %2339 = vmatprep.subr.bf16.mxu0 %v3001_v43  ;;  %v540_v43 = vpack.c.bf16 %v492_v36, %v476_v35  ;;  %v484_v47 = vmax.f32 %v356_v28, %v420_v39  ;;  %v3061_v28 = vld [vmem:[%s4589_s1 + $0x144] ss:$8 sps:$4 sm:$0xff]   ;;  %v3065_v35 = vld [vmem:[%s4589_s1 + $0x150] ss:$8 sps:$4 sm:$0xff]  }
  0x2a   :  { %v3068_v36 = vld [vmem:[%s4589_s1 + $0x550] ss:$8 sps:$4 sm:$0xff]   ;;  %v3076_v39 = vld [vmem:[%s4589_s1 + $0x564] ss:$8 sps:$4 sm:$0xff]  }
  0x2b   :  { %2128 = vmatpush1.bf16.msra.mxu1 %v3003_v44  ;;  %v411_v44 = vmul.f32 0.2, %v347_v26  ;;  %2139 = vmatprep.mubr.bf16.mxu1 %v540_v43  ;;  %v3071_v43 = vld [vmem:[%s4589_s1 + $0x160] ss:$8 sps:$4 sm:$0xff]  }
  0x2c   :  { %2340 = vmatpush1.bf16.msra.mxu0 %v3004_v45  ;;  %2129 = vmatprep.subr.bf16.mxu1 %v3005_v46  ;;  %v355_v45 = vadd.f32 %v3589_v31, %v207_v37  ;;  %v3027_v46 = vld [vmem:[%s4589_s1 + $0xe0] ss:$8 sps:$4 sm:$0xff]   ;;  %v3698_v37 = vsub.s32 3, %v3480_v42 }
  0x2d   :  { %2341 = vmatprep.subr.bf16.mxu0 %v3007_v48  ;;  %v500_v48 = vmax.f32 %v372_v29, %v436_v40  ;;  %v3064_v29 = vld [vmem:[%s4589_s1 + $0x544] ss:$8 sps:$4 sm:$0xff]  }
  0x2e   :  { %v419_v53 = vmul.f32 0.2, %v355_v45  ;;  %v35_v40 = vld [vmem:[%s4590_s0 + $0x80] sm:$0xff] }
  0x2f   :  { %2130 = vmatpush1.bf16.msra.mxu1 %v3009_v50  ;;  %v371_v50 = vadd.f32 %v3589_v31, %v223_v41  ;;  %v43_v41 = vld [vmem:[%s4590_s0 + $0xc0] sm:$0xff] }
  0x30   :  { %2342 = vmatpush1.bf16.msra.mxu0 %v3010_v51  ;;  %2131 = vmatprep.subr.bf16.mxu1 %v3011_v57  ;;  %v3028_v51 = vld [vmem:[%s4589_s1 + $0x4e0] ss:$8 sps:$4 sm:$0xff]   ;;  %v548_v57 = vpack.c.bf16 %v500_v48, %v484_v47  ;;  %v483_v0 = vmax.f32 %v355_v45, %v419_v53  ;;  %v100_v45 = vunpack.c.h.bf16 %v43_v41  ;;  %v99_v47 = vunpack.c.l.bf16 %v43_v41 }
  0x31   :  { %2343 = vmatprep.subr.bf16.mxu0 %v3013_v62  ;;  %v435_v58 = vmul.f32 0.2, %v371_v50  ;;  %v475_v62 = vmax.f32 %v347_v26, %v411_v44  ;;  %v3056_v26 = vld [vmem:[%s4589_s1 + $0x530] ss:$8 sps:$4 sm:$0xff]   ;;  %v84_v44 = vunpack.c.h.bf16 %v35_v40  ;;  %v39_v48 = vld [vmem:[%s4590_s0 + $0xa0] sm:$0xff]  ;;  %v3792_v41 = vld [vmem:[%s4590_s0 + $0x28] sm:$0xff] }
  0x32   :  { %2351 = vmatprep.mubr.bf16.mxu0 %v548_v57  ;;  %v3074_v53 = vld [vmem:[%s4589_s1 + $0x560] ss:$8 sps:$4 sm:$0xff]  }
  0x33   :  { %2132 = vmatpush1.bf16.msra.mxu1 %v3015_v9  ;;  %v499_v1 = vmax.f32 %v371_v50, %v435_v58  ;;  %v3035_v9 = vld [vmem:[%s4589_s1 + $0x100] ss:$8 sps:$4 sm:$0xff]   ;;  %v3723_v50 = vrot.slane %v3514_v55, %v3698_v37  ;;  %v232_v57 = vmul.f32 %v3525_v60, %v84_v44  ;;  %v248_v58 = vmul.f32 %v3525_v60, %v100_v45 }
  0x34   :  { %2344 = vmatpush1.bf16.msra.mxu0 %v3016_v10  ;;  %2133 = vmatprep.subr.bf16.mxu1 %v3017_v14  ;;  %v539_v10 = vpack.c.bf16 %v491_v63, %v475_v62  ;;  %v3038_v14 = vld [vmem:[%s4589_s1 + $0x500] ss:$8 sps:$4 sm:$0xff]   ;;  %v108_v62 = vunpack.c.h.bf16 %v47_v49  ;;  %v3082_v63 = vld [vmem:[%s4589_s1 + $0x574] ss:$8 sps:$4 sm:$0xff]  }
  0x35   :  { %2345 = vmatprep.subr.bf16.mxu0 %v3019_v19  ;;  %v547_v11 = vpack.c.bf16 %v499_v1, %v483_v0  ;;  %v3049_v19 = vld [vmem:[%s4589_s1 + $0x124] ss:$8 sps:$4 sm:$0xff]   ;;  %v247_v1 = vmul.f32 %v3540_v2, %v99_v47  ;;  %v380_v60 = vadd.f32 %v3528_v61, %v232_v57 }
  0x37   :  { %2134 = vmatpush1.bf16.msra.mxu1 %v3021_v32  ;;  %v3062_v32 = vld [vmem:[%s4589_s1 + $0x540] ss:$8 sps:$4 sm:$0xff]  }
  0x38   :  { %2346 = vmatpush1.bf16.msra.mxu0 %v3022_v33  ;;  %2135 = vmatprep.subr.bf16.mxu1 %v3023_v34  ;;  %v3067_v33 = vld [vmem:[%s4589_s1 + $0x154] ss:$8 sps:$4 sm:$0xff]  }
  0x39   :  { %2347 = vmatprep.subr.bf16.mxu0 %v3025_v38  ;;  %v3070_v34 = vld [vmem:[%s4589_s1 + $0x554] ss:$8 sps:$4 sm:$0xff]   ;;  %v3073_v38 = vld [vmem:[%s4589_s1 + $0x164] ss:$8 sps:$4 sm:$0xff]  }
  0x3b   :  { %2136 = vmatpush1.bf16.msra.mxu1 %v3027_v46  ;;  %v83_v46 = vunpack.c.l.bf16 %v35_v40 }
  0x3c   :  { %2348 = vmatpush1.bf16.msra.mxu0 %v3028_v51  ;;  %2137 = vmatprep.subr.bf16.mxu1 %v3029_v52  ;;  %v3727_v51 = vrot.slane %v3519_v56, %v3698_v37  ;;  %v3731_v52 = vrot.slane %v3547_v6, %v3698_v37 }
  0x3d   :  { %2349 = vmatprep.subr.bf16.mxu0 %v3031_v54  ;;  %v3079_v54 = vld [vmem:[%s4589_s1 + $0x174] ss:$8 sps:$4 sm:$0xff]   ;;  %v231_v0 = vmul.f32 %v3540_v2, %v83_v46  ;;  %v3085_v2 = vld [vmem:[%s4589_s1 + $0x184] ss:$8 sps:$4 sm:$0xff]  }
  0x3f   :  { %2138 = vmatpush1.bf16.msra.mxu1 %v3033_v59  ;;  %v92_v59 = vunpack.c.h.bf16 %v39_v48 }
  0x40   :  { %2350 = vmatpush1.bf16.msra.mxu0 %v3034_v3  ;;  %2160 = vmatprep.subr.bf16.mxu1 %v3037_v4  ;;  %v91_v3 = vunpack.c.l.bf16 %v39_v48  ;;  %v107_v4 = vunpack.c.l.bf16 %v47_v49  ;;  %v3801_v48 = vld [vmem:[%s4590_s0 + $0x68] sm:$0xff] }
  0x41   :  { %2372 = vmatprep.subr.bf16.mxu0 %v3040_v5  ;;  %v3077_v5 = vld [vmem:[%s4589_s1 + $0x170] ss:$8 sps:$4 sm:$0xff]  }
  0x42   :  { %2140 = vmatmul.mubr.bf16.vlgmr.msra.gmra.mrb[0].mxu1 %v539_v10  ;;  %v240_v10 = vmul.f32 %v3564_v12, %v92_v59  ;;  %v62_v59 = vunpack.c.h.bf16 %v3792_v41 }
  0x43   :  { %2352 = vmatmul.mubr.bf16.vlgmr.msra.gmra.mrb[0].mxu0 %v547_v11  ;;  %2161 = vmatpush1.bf16.msra.mxu1 %v3035_v9  ;;  %v396_v9 = vadd.f32 %v3528_v61, %v248_v58  ;;  %v256_v11 = vmul.f32 %v3564_v12, %v108_v62  ;;  %v395_v61 = vadd.f32 %v3555_v8, %v247_v1  ;;  %v78_v1 = vunpack.c.h.bf16 %v3801_v48 }
  0x44   :  { %2373 = vmatpush1.bf16.msra.mxu0 %v3038_v14  ;;  %2162 = vmatprep.subr.bf16.mxu1 %v3043_v15  ;;  %v3080_v14 = vld [vmem:[%s4589_s1 + $0x570] ss:$8 sps:$4 sm:$0xff]   ;;  %v3088_v15 = vld [vmem:[%s4589_s1 + $0x584] ss:$8 sps:$4 sm:$0xff]   ;;  %v255_v12 = vmul.f32 %v3583_v27, %v107_v4  ;;  %v3811_v62 = vrot.slane %v3552_v7, %v3698_v37  ;;  %v129_v4 = vsub.s32 2, %v3480_v42 }
  0x45   :  { %2374 = vmatprep.subr.bf16.mxu0 %v3046_v16  ;;  %v379_v16 = vadd.f32 %v3555_v8, %v231_v0  ;;  %v3100_v37 = vld [vmem:[%s4589_s1 + $0x5a4] ss:$8 sps:$4 sm:$0xff]  }
  0x46   :  { %v403_v8 = vadd.f32 %v3589_v31, %v255_v12  ;;  %v3106_v12 = vld [vmem:[%s4589_s1 + $0x5b4] ss:$8 sps:$4 sm:$0xff]  }
  0x47   :  { %2163 = vmatpush1.bf16.msra.mxu1 %v3041_v17  ;;  %v239_v17 = vmul.f32 %v3583_v27, %v91_v3  ;;  %v3083_v27 = vld [vmem:[%s4589_s1 + $0x180] ss:$8 sps:$4 sm:$0xff]   ;;  %v3097_v3 = vld [vmem:[%s4589_s1 + $0x1a4] ss:$8 sps:$4 sm:$0xff]  }
  0x48   :  { %2375 = vmatpush1.bf16.msra.mxu0 %v3044_v18  ;;  %2164 = vmatprep.subr.bf16.mxu1 %v3049_v19  ;;  %v444_v18 = vmul.f32 0.2, %v380_v60  ;;  %v460_v19 = vmul.f32 0.2, %v396_v9 }
  0x49   :  { %2376 = vmatprep.subr.bf16.mxu0 %v3052_v20  ;;  %v388_v20 = vadd.f32 %v3567_v13, %v240_v10  ;;  %v226_v10 = vmul.f32 %v3731_v52, %v78_v1  ;;  %v3122_v1 = vld [vmem:[%s4589_s1 + $0x5e0] ss:$8 sps:$4 sm:$0xff]  }
  0x4b   :  { %2165 = vmatpush1.bf16.msra.mxu1 %v3047_v21  ;;  %v404_v21 = vadd.f32 %v3567_v13, %v256_v11 }
  0x4c   :  { %2377 = vmatpush1.bf16.msra.mxu0 %v3050_v22  ;;  %2166 = vmatprep.subr.bf16.mxu1 %v3055_v23  ;;  %v443_v22 = vmul.f32 0.2, %v379_v16  ;;  %v459_v23 = vmul.f32 0.2, %v395_v61 }
  0x4d   :  { %2378 = vmatprep.subr.bf16.mxu0 %v3058_v24  ;;  %v387_v24 = vadd.f32 %v3589_v31, %v239_v17  ;;  %v468_v13 = vmul.f32 0.2, %v404_v21  ;;  %v3091_v31 = vld [vmem:[%s4589_s1 + $0x194] ss:$8 sps:$4 sm:$0xff]  }
  0x4e   :  { %v3103_v17 = vld [vmem:[%s4589_s1 + $0x1b4] ss:$8 sps:$4 sm:$0xff]  }
  0x4f   :  { %2167 = vmatpush1.bf16.msra.mxu1 %v3053_v25  ;;  %v3086_v25 = vld [vmem:[%s4589_s1 + $0x580] ss:$8 sps:$4 sm:$0xff]   ;;  %v532_v40 = vmax.f32 %v404_v21, %v468_v13  ;;  %v3109_v13 = vld [vmem:[%s4589_s1 + $0x1c4] ss:$8 sps:$4 sm:$0xff]  }
  0x50   :  { %2379 = vmatpush1.bf16.msra.mxu0 %v3056_v26  ;;  %2168 = vmatprep.subr.bf16.mxu1 %v3061_v28  ;;  %v508_v26 = vmax.f32 %v380_v60, %v444_v18  ;;  %v524_v28 = vmax.f32 %v396_v9, %v460_v19  ;;  %v210_v60 = vmul.f32 %v3731_v52, %v62_v59 }
  0x51   :  { %2380 = vmatprep.subr.bf16.mxu0 %v3064_v29  ;;  %v452_v29 = vmul.f32 0.2, %v388_v20  ;;  %v3844_v18 = vrot.slane %v3514_v55, %v129_v4 }
  0x53   :  { %2169 = vmatpush1.bf16.msra.mxu1 %v3059_v30  ;;  %v3779_v30 = vld [vmem:[%s4590_s0 + $0x8] sm:$0xff] }
  0x54   :  { %2381 = vmatpush1.bf16.msra.mxu0 %v3062_v32  ;;  %2170 = vmatprep.subr.bf16.mxu1 %v3067_v33  ;;  %v507_v32 = vmax.f32 %v379_v16, %v443_v22  ;;  %v523_v33 = vmax.f32 %v395_v61, %v459_v23  ;;  %v54_v47 = vunpack.c.h.bf16 %v3779_v30  ;;  %v374_v61 = vadd.f32 %v3811_v62, %v226_v10 }
  0x55   :  { %2382 = vmatprep.subr.bf16.mxu0 %v3070_v34  ;;  %v451_v34 = vmul.f32 0.2, %v387_v24  ;;  %v53_v21 = vunpack.c.l.bf16 %v3779_v30 }
  0x56   :  { %v555_v44 = vpack.c.bf16 %v523_v33, %v507_v32  ;;  %v202_v58 = vmul.f32 %v3723_v50, %v54_v47 }
  0x57   :  { %2171 = vmatpush1.bf16.msra.mxu1 %v3065_v35  ;;  %v467_v35 = vmul.f32 0.2, %v403_v8  ;;  %v515_v45 = vmax.f32 %v387_v24, %v451_v34  ;;  %v438_v24 = vmul.f32 0.2, %v374_v61  ;;  %v201_v32 = vmul.f32 %v3844_v18, %v53_v21  ;;  %v3140_v21 = vld [vmem:[%s4589_s1 + $0x610] ss:$8 sps:$4 sm:$0xff]  }
  0x58   :  { %2383 = vmatpush1.bf16.msra.mxu0 %v3068_v36  ;;  %2172 = vmatprep.subr.bf16.mxu1 %v3073_v38  ;;  %v3787_v36 = vld [vmem:[%s4590_s0 + $0x48] sm:$0xff]  ;;  %v556_v38 = vpack.c.bf16 %v524_v28, %v508_v26  ;;  %v3854_v26 = vrot.slane %v3547_v6, %v129_v4 }
  0x59   :  { %2384 = vmatprep.subr.bf16.mxu0 %v3076_v39  ;;  %v516_v39 = vmax.f32 %v388_v20, %v452_v29  ;;  %v531_v46 = vmax.f32 %v403_v8, %v467_v35  ;;  %v69_v22 = vunpack.c.l.bf16 %v3787_v36  ;;  %v3101_v8 = vld [vmem:[%s4589_s1 + $0x1b0] ss:$8 sps:$4 sm:$0xff]   ;;  %v3112_v6 = vld [vmem:[%s4589_s1 + $0x5c4] ss:$8 sps:$4 sm:$0xff]   ;;  %v3868_v35 = vrot.slane %v3519_v56, %v129_v4 }
  0x5a   :  { %2149 = vmatprep.mubr.bf16.mxu1 %v556_v38  ;;  %v3104_v29 = vld [vmem:[%s4589_s1 + $0x5b0] ss:$8 sps:$4 sm:$0xff]  }
  0x5b   :  { %2173 = vmatpush1.bf16.msra.mxu1 %v3071_v43  ;;  %v3094_v43 = vld [vmem:[%s4589_s1 + $0x594] ss:$8 sps:$4 sm:$0xff]   ;;  %v564_v49 = vpack.c.bf16 %v532_v40, %v516_v39  ;;  %v563_v57 = vpack.c.bf16 %v531_v46, %v515_v45  ;;  %v217_v33 = vmul.f32 %v3844_v18, %v69_v22  ;;  %v3876_v40 = vrot.slane %v3552_v7, %v129_v4  ;;  %v3113_v46 = vld [vmem:[%s4589_s1 + $0x1d0] ss:$8 sps:$4 sm:$0xff]   ;;  %v3145_v22 = vld [vmem:[%s4589_s1 + $0x224] ss:$8 sps:$4 sm:$0xff]  }
  0x5c   :  { %2385 = vmatpush1.bf16.msra.mxu0 %v3074_v53  ;;  %2174 = vmatprep.subr.bf16.mxu1 %v3079_v54  ;;  %v70_v53 = vunpack.c.h.bf16 %v3787_v36  ;;  %v3089_v54 = vld [vmem:[%s4589_s1 + $0x190] ss:$8 sps:$4 sm:$0xff]   ;;  %v3107_v36 = vld [vmem:[%s4589_s1 + $0x1c0] ss:$8 sps:$4 sm:$0xff]   ;;  %v349_v7 = vadd.f32 %v3868_v35, %v201_v32 }
  0x5d   :  { %2386 = vmatprep.subr.bf16.mxu0 %v3082_v63  ;;  %2150 = vmatmul.mubr.bf16.gmra.mrb[4].mxu1 %v555_v44  ;;  %v3092_v63 = vld [vmem:[%s4589_s1 + $0x590] ss:$8 sps:$4 sm:$0xff]   ;;  %v3118_v44 = vld [vmem:[%s4589_s1 + $0x5d4] ss:$8 sps:$4 sm:$0xff]   ;;  %v365_v45 = vadd.f32 %v3868_v35, %v217_v33  ;;  %v40_v32 = vld [vmem:[%s4590_s0 + $0xa8] sm:$0xff] }
  0x5e   :  { %v218_v0 = vmul.f32 %v3723_v50, %v70_v53  ;;  %2361 = vmatprep.mubr.bf16.mxu0 %v564_v49  ;;  %v3116_v49 = vld [vmem:[%s4589_s1 + $0x5d0] ss:$8 sps:$4 sm:$0xff]   ;;  %v3121_v53 = vld [vmem:[%s4589_s1 + $0x1e4] ss:$8 sps:$4 sm:$0xff]  }
  0x5f   :  { %2175 = vmatpush1.bf16.msra.mxu1 %v3077_v5  ;;  %v350_v5 = vadd.f32 %v3727_v51, %v202_v58  ;;  %2362 = vmatmul.mubr.bf16.gmra.mrb[4].mxu0 %v563_v57  ;;  %v3119_v57 = vld [vmem:[%s4589_s1 + $0x1e0] ss:$8 sps:$4 sm:$0xff]   ;;  %v413_v58 = vmul.f32 0.2, %v349_v7  ;;  %v429_v59 = vmul.f32 0.2, %v365_v45 }
  0x60   :  { %2387 = vmatpush1.bf16.msra.mxu0 %v3080_v14  ;;  %2176 = vmatprep.subr.bf16.mxu1 %v3085_v2  ;;  %v366_v9 = vadd.f32 %v3727_v51, %v218_v0  ;;  %v358_v14 = vadd.f32 %v3811_v62, %v210_v60  ;;  %v3095_v2 = vld [vmem:[%s4589_s1 + $0x1a0] ss:$8 sps:$4 sm:$0xff]   ;;  %v3125_v4 = vld [vmem:[%s4589_s1 + $0x1f0] ss:$8 sps:$4 sm:$0xff]  }
  0x61   :  { %2388 = vmatprep.subr.bf16.mxu0 %v3088_v15  ;;  %v414_v11 = vmul.f32 0.2, %v350_v5  ;;  %v3098_v15 = vld [vmem:[%s4589_s1 + $0x5a0] ss:$8 sps:$4 sm:$0xff]   ;;  %v493_v60 = vmax.f32 %v365_v45, %v429_v59  ;;  %v93_v45 = vunpack.c.l.bf16 %v40_v32 }
  0x62   :  { %v430_v16 = vmul.f32 0.2, %v366_v9  ;;  %v422_v20 = vmul.f32 0.2, %v358_v14  ;;  %v48_v33 = vld [vmem:[%s4590_s0 + $0xe8] sm:$0xff] }
  0x63   :  { %2177 = vmatpush1.bf16.msra.mxu1 %v3083_v27  ;;  %v478_v19 = vmax.f32 %v350_v5, %v414_v11  ;;  %v61_v27 = vunpack.c.l.bf16 %v3792_v41  ;;  %v3110_v41 = vld [vmem:[%s4589_s1 + $0x5c0] ss:$8 sps:$4 sm:$0xff]   ;;  %v477_v5 = vmax.f32 %v349_v7, %v413_v58  ;;  %v3128_v11 = vld [vmem:[%s4589_s1 + $0x5f0] ss:$8 sps:$4 sm:$0xff]  }
  0x64   :  { %2389 = vmatpush1.bf16.msra.mxu0 %v3086_v25  ;;  %2178 = vmatprep.subr.bf16.mxu1 %v3091_v31  ;;  %v494_v23 = vmax.f32 %v366_v9, %v430_v16  ;;  %v77_v25 = vunpack.c.l.bf16 %v3801_v48  ;;  %v486_v28 = vmax.f32 %v358_v14, %v422_v20  ;;  %v502_v31 = vmax.f32 %v374_v61, %v438_v24  ;;  %v3133_v14 = vld [vmem:[%s4589_s1 + $0x204] ss:$8 sps:$4 sm:$0xff]   ;;  %v3137_v20 = vld [vmem:[%s4589_s1 + $0x210] ss:$8 sps:$4 sm:$0xff]  }
  0x65   :  { %2390 = vmatprep.subr.bf16.mxu0 %v3094_v43  ;;  %v209_v38 = vmul.f32 %v3854_v26, %v61_v27  ;;  %v3115_v43 = vld [vmem:[%s4589_s1 + $0x1d4] ss:$8 sps:$4 sm:$0xff]   ;;  %v541_v16 = vpack.c.bf16 %v493_v60, %v477_v5  ;;  %v3148_v24 = vld [vmem:[%s4589_s1 + $0x624] ss:$8 sps:$4 sm:$0xff]  }
  0x66   :  { %v542_v30 = vpack.c.bf16 %v494_v23, %v478_v19  ;;  %v550_v34 = vpack.c.bf16 %v502_v31, %v486_v28  ;;  %v225_v39 = vmul.f32 %v3854_v26, %v77_v25  ;;  %v3142_v19 = vld [vmem:[%s4589_s1 + $0x614] ss:$8 sps:$4 sm:$0xff]   ;;  %v3949_v23 = vsub.s32 5, %v3480_v42  ;;  %v36_v27 = vld [vmem:[%s4590_s0 + $0x88] sm:$0xff] }
  0x67   :  { %2179 = vmatpush1.bf16.msra.mxu1 %v3089_v54  ;;  %v357_v47 = vadd.f32 %v3876_v40, %v209_v38  ;;  %v3124_v54 = vld [vmem:[%s4589_s1 + $0x5e4] ss:$8 sps:$4 sm:$0xff]   ;;  %v3146_v28 = vld [vmem:[%s4589_s1 + $0x620] ss:$8 sps:$4 sm:$0xff]   ;;  %v3154_v38 = vld [vmem:[%s4589_s1 + $0x634] ss:$8 sps:$4 sm:$0xff]  }
  0x68   :  { %2391 = vmatpush1.bf16.msra.mxu0 %v3092_v63  ;;  %2180 = vmatprep.subr.bf16.mxu1 %v3097_v3  ;;  %v373_v48 = vadd.f32 %v3876_v40, %v225_v39  ;;  %v3127_v3 = vld [vmem:[%s4589_s1 + $0x1f4] ss:$8 sps:$4 sm:$0xff]   ;;  %v44_v25 = vld [vmem:[%s4590_s0 + $0xc8] sm:$0xff] }
  0x69   :  { %2392 = vmatprep.subr.bf16.mxu0 %v3100_v37  ;;  %2192 = vmatprep.mubr.bf16.mxu1 %v542_v30  ;;  %v421_v63 = vmul.f32 0.2, %v357_v47  ;;  %v3130_v37 = vld [vmem:[%s4589_s1 + $0x5f4] ss:$8 sps:$4 sm:$0xff]   ;;  %v85_v30 = vunpack.c.l.bf16 %v36_v27  ;;  %v101_v31 = vunpack.c.l.bf16 %v44_v25 }
  0x6a   :  { %2404 = vmatprep.mubr.bf16.mxu0 %v550_v34  ;;  %v437_v0 = vmul.f32 0.2, %v373_v48  ;;  %v3977_v34 = vrot.slane %v3514_v55, %v3949_v23  ;;  %v3163_v60 = vld [vmem:[%s4589_s1 + $0x254] ss:$8 sps:$4 sm:$0xff]  }
  0x6b   :  { %2181 = vmatpush1.bf16.msra.mxu1 %v3095_v2  ;;  %v485_v9 = vmax.f32 %v357_v47, %v421_v63  ;;  %v3136_v2 = vld [vmem:[%s4589_s1 + $0x604] ss:$8 sps:$4 sm:$0xff]   ;;  %v233_v7 = vmul.f32 %v3844_v18, %v85_v30  ;;  %v249_v55 = vmul.f32 %v3844_v18, %v101_v31  ;;  %v3152_v18 = vld [vmem:[%s4589_s1 + $0x630] ss:$8 sps:$4 sm:$0xff]  }
  0x6c   :  { %2393 = vmatpush1.bf16.msra.mxu0 %v3098_v15  ;;  %2182 = vmatprep.subr.bf16.mxu1 %v3103_v17  ;;  %v501_v10 = vmax.f32 %v373_v48, %v437_v0  ;;  %v3131_v15 = vld [vmem:[%s4589_s1 + $0x200] ss:$8 sps:$4 sm:$0xff]   ;;  %v3164_v31 = vld [vmem:[%s4589_s1 + $0x650] ss:$8 sps:$4 sm:$0xff]  }
  0x6d   :  { %2394 = vmatprep.subr.bf16.mxu0 %v3106_v12  ;;  %v3134_v17 = vld [vmem:[%s4589_s1 + $0x600] ss:$8 sps:$4 sm:$0xff]   ;;  %v3139_v12 = vld [vmem:[%s4589_s1 + $0x214] ss:$8 sps:$4 sm:$0xff]  }
  0x6e   :  { %v549_v61 = vpack.c.bf16 %v501_v10, %v485_v9 }
  0x6f   :  { %2183 = vmatpush1.bf16.msra.mxu1 %v3101_v8  ;;  %v3143_v8 = vld [vmem:[%s4589_s1 + $0x220] ss:$8 sps:$4 sm:$0xff]  }
  0x70   :  { %2395 = vmatpush1.bf16.msra.mxu0 %v3104_v29  ;;  %2184 = vmatprep.subr.bf16.mxu1 %v3109_v13  ;;  %v86_v29 = vunpack.c.h.bf16 %v36_v27  ;;  %v102_v13 = vunpack.c.h.bf16 %v44_v25  ;;  %v4045_v27 = vld [vmem:[%s4590_s0 + $0x70] sm:$0xff] }
  0x71   :  { %2396 = vmatprep.subr.bf16.mxu0 %v3112_v6  ;;  %v3151_v6 = vld [vmem:[%s4589_s1 + $0x234] ss:$8 sps:$4 sm:$0xff]   ;;  %v3161_v25 = vld [vmem:[%s4589_s1 + $0x250] ss:$8 sps:$4 sm:$0xff]  }
  0x72   :  { %v234_v39 = vmul.f32 %v3723_v50, %v86_v29 }
  0x73   :  { %2185 = vmatpush1.bf16.msra.mxu1 %v3107_v36  ;;  %v3981_v36 = vrot.slane %v3519_v56, %v3949_v23  ;;  %v3149_v56 = vld [vmem:[%s4589_s1 + $0x230] ss:$8 sps:$4 sm:$0xff]  }
  0x74   :  { %2397 = vmatpush1.bf16.msra.mxu0 %v3110_v41  ;;  %2186 = vmatprep.subr.bf16.mxu1 %v3115_v43  ;;  %v250_v41 = vmul.f32 %v3723_v50, %v102_v13  ;;  %v94_v43 = vunpack.c.h.bf16 %v40_v32  ;;  %v382_v47 = vadd.f32 %v3727_v51, %v234_v39  ;;  %v4054_v13 = vld [vmem:[%s4591_s2 + $0x8] sm:$0xff] }
  0x75   :  { %2398 = vmatprep.subr.bf16.mxu0 %v3118_v44  ;;  %v110_v44 = vunpack.c.h.bf16 %v48_v33  ;;  %v4058_v30 = vrot.slane %v4054_v13, %v3949_v23  ;;  %v3172_v39 = vld [vmem:[%s4589_s1 + $0x664] ss:$8 sps:$4 sm:$0xff]  }
  0x76   :  { %v398_v48 = vadd.f32 %v3727_v51, %v250_v41  ;;  %v241_v51 = vmul.f32 %v3854_v26, %v93_v45  ;;  %v446_v58 = vmul.f32 0.2, %v382_v47 }
  0x77   :  { %2187 = vmatpush1.bf16.msra.mxu1 %v3113_v46  ;;  %v109_v46 = vunpack.c.l.bf16 %v48_v33  ;;  %v258_v50 = vmul.f32 %v3731_v52, %v110_v44  ;;  %v4076_v44 = vld [vmem:[%s4592_s3 + $0x8] sm:$0xff] }
  0x78   :  { %2399 = vmatpush1.bf16.msra.mxu0 %v3116_v49  ;;  %2188 = vmatprep.subr.bf16.mxu1 %v3121_v53  ;;  %v242_v49 = vmul.f32 %v3731_v52, %v94_v43  ;;  %v3157_v53 = vld [vmem:[%s4589_s1 + $0x244] ss:$8 sps:$4 sm:$0xff]   ;;  %v462_v59 = vmul.f32 0.2, %v398_v48  ;;  %v389_v5 = vadd.f32 %v3876_v40, %v241_v51  ;;  %v510_v9 = vmax.f32 %v382_v47, %v446_v58 }
  0x79   :  { %2400 = vmatprep.subr.bf16.mxu0 %v3124_v54  ;;  %v381_v54 = vadd.f32 %v3868_v35, %v233_v7  ;;  %v3160_v52 = vld [vmem:[%s4589_s1 + $0x644] ss:$8 sps:$4 sm:$0xff]   ;;  %v406_v0 = vadd.f32 %v3811_v62, %v258_v50  ;;  %v80_v43 = vunpack.c.h.bf16 %v4045_v27  ;;  %v4080_v7 = vrot.slane %v4076_v44, %v3949_v23 }
  0x7a   :  { %v390_v63 = vadd.f32 %v3811_v62, %v242_v49  ;;  %v526_v62 = vmax.f32 %v398_v48, %v462_v59  ;;  %v3175_v49 = vld [vmem:[%s4589_s1 + $0x274] ss:$8 sps:$4 sm:$0xff]  }
  0x7b   :  { %2189 = vmatpush1.bf16.msra.mxu1 %v3119_v57  ;;  %v397_v57 = vadd.f32 %v3868_v35, %v249_v55  ;;  %v3158_v35 = vld [vmem:[%s4589_s1 + $0x640] ss:$8 sps:$4 sm:$0xff]   ;;  %v228_v23 = vmul.f32 %v4058_v30, %v80_v43 }
  0x7c   :  { %2401 = vmatpush1.bf16.msra.mxu0 %v3122_v1  ;;  %2190 = vmatprep.subr.bf16.mxu1 %v3127_v3  ;;  %v3155_v1 = vld [vmem:[%s4589_s1 + $0x240] ss:$8 sps:$4 sm:$0xff]   ;;  %v445_v3 = vmul.f32 0.2, %v381_v54  ;;  %v454_v10 = vmul.f32 0.2, %v390_v63 }
  0x7d   :  { %2402 = vmatprep.subr.bf16.mxu0 %v3130_v37  ;;  %v461_v37 = vmul.f32 0.2, %v397_v57 }
  0x7f   :  { %2191 = vmatpush1.bf16.msra.mxu1 %v3125_v4  ;;  %v257_v4 = vmul.f32 %v3854_v26, %v109_v46  ;;  %v3166_v26 = vld [vmem:[%s4589_s1 + $0x654] ss:$8 sps:$4 sm:$0xff]   ;;  %v3167_v46 = vld [vmem:[%s4589_s1 + $0x260] ss:$8 sps:$4 sm:$0xff]  }
  0x80   :  { %2403 = vmatpush1.bf16.msra.mxu0 %v3128_v11  ;;  %2213 = vmatprep.subr.bf16.mxu1 %v3133_v14  ;;  %v470_v11 = vmul.f32 0.2, %v406_v0  ;;  %v4025_v14 = vld [vmem:[%s4590_s0 + $0x10] sm:$0xff] }
  0x81   :  { %2425 = vmatprep.subr.bf16.mxu0 %v3136_v2  ;;  %v509_v2 = vmax.f32 %v381_v54, %v445_v3 }
  0x82   :  { %2193 = vmatmul.mubr.bf16.vlgmr.msra.gmra.mrb[0].mxu1 %v541_v16  ;;  %v405_v16 = vadd.f32 %v3876_v40, %v257_v4  ;;  %v56_v40 = vunpack.c.h.bf16 %v4025_v14 }
  0x83   :  { %2405 = vmatmul.mubr.bf16.vlgmr.msra.gmra.mrb[0].mxu0 %v549_v61  ;;  %2214 = vmatpush1.bf16.msra.mxu1 %v3131_v15  ;;  %v525_v15 = vmax.f32 %v397_v57, %v461_v37  ;;  %v453_v61 = vmul.f32 0.2, %v389_v5  ;;  %v376_v57 = vadd.f32 %v4080_v7, %v228_v23 }
  0x84   :  { %2426 = vmatpush1.bf16.msra.mxu0 %v3134_v17  ;;  %2215 = vmatprep.subr.bf16.mxu1 %v3139_v12  ;;  %v4034_v17 = vld [vmem:[%s4590_s0 + $0x50] sm:$0xff]  ;;  %v558_v12 = vpack.c.bf16 %v526_v62, %v510_v9  ;;  %v204_v33 = vmul.f32 %v3977_v34, %v56_v40  ;;  %v3182_v62 = vld [vmem:[%s4589_s1 + $0x680] ss:$8 sps:$4 sm:$0xff]  }
  0x85   :  { %2427 = vmatprep.subr.bf16.mxu0 %v3142_v19  ;;  %v518_v19 = vmax.f32 %v390_v63, %v454_v10  ;;  %v72_v29 = vunpack.c.h.bf16 %v4034_v17  ;;  %v440_v59 = vmul.f32 0.2, %v376_v57  ;;  %v3173_v63 = vld [vmem:[%s4589_s1 + $0x270] ss:$8 sps:$4 sm:$0xff]   ;;  %v3187_v10 = vld [vmem:[%s4589_s1 + $0x294] ss:$8 sps:$4 sm:$0xff]  }
  0x86   :  { %2202 = vmatprep.mubr.bf16.mxu1 %v558_v12  ;;  %v352_v45 = vadd.f32 %v3981_v36, %v204_v33 }
  0x87   :  { %2216 = vmatpush1.bf16.msra.mxu1 %v3137_v20  ;;  %v534_v20 = vmax.f32 %v406_v0, %v470_v11  ;;  %v220_v41 = vmul.f32 %v3977_v34, %v72_v29  ;;  %v3176_v0 = vld [vmem:[%s4589_s1 + $0x670] ss:$8 sps:$4 sm:$0xff]   ;;  %v504_v4 = vmax.f32 %v376_v57, %v440_v59  ;;  %v3190_v11 = vld [vmem:[%s4589_s1 + $0x694] ss:$8 sps:$4 sm:$0xff]  }
  0x88   :  { %2428 = vmatpush1.bf16.msra.mxu0 %v3140_v21  ;;  %2217 = vmatprep.subr.bf16.mxu1 %v3145_v22  ;;  %v4039_v21 = vld [vmem:[%s4590_s0 + $0x30] sm:$0xff]  ;;  %v557_v22 = vpack.c.bf16 %v525_v15, %v509_v2  ;;  %v416_v50 = vmul.f32 0.2, %v352_v45  ;;  %v71_v2 = vunpack.c.l.bf16 %v4034_v17  ;;  %v4130_v15 = vld [vmem:[%s4591_s2] sm:$0xff] }
  0x89   :  { %2429 = vmatprep.subr.bf16.mxu0 %v3148_v24  ;;  %v469_v24 = vmul.f32 0.2, %v405_v16  ;;  %v368_v47 = vadd.f32 %v3981_v36, %v220_v41  ;;  %v63_v12 = vunpack.c.l.bf16 %v4039_v21  ;;  %v3188_v17 = vld [vmem:[%s4589_s1 + $0x690] ss:$8 sps:$4 sm:$0xff]  }
  0x8a   :  { %2203 = vmatmul.mubr.bf16.gmra.mrb[4].mxu1 %v557_v22  ;;  %v480_v51 = vmax.f32 %v352_v45, %v416_v50  ;;  %v3205_v45 = vld [vmem:[%s4589_s1 + $0x2c4] ss:$8 sps:$4 sm:$0xff]   ;;  %v3206_v50 = vld [vmem:[%s4589_s1 + $0x6c0] ss:$8 sps:$4 sm:$0xff]   ;;  %v3209_v57 = vld [vmem:[%s4589_s1 + $0x2d0] ss:$8 sps:$4 sm:$0xff]  }
  0x8b   :  { %2218 = vmatpush1.bf16.msra.mxu1 %v3143_v8  ;;  %v517_v8 = vmax.f32 %v389_v5, %v453_v61  ;;  %v533_v32 = vmax.f32 %v405_v16, %v469_v24  ;;  %v137_v5 = vsub.s32 4, %v3480_v42  ;;  %v3185_v61 = vld [vmem:[%s4589_s1 + $0x290] ss:$8 sps:$4 sm:$0xff]  }
  0x8c   :  { %2430 = vmatpush1.bf16.msra.mxu0 %v3146_v28  ;;  %2219 = vmatprep.subr.bf16.mxu1 %v3151_v6  ;;  %v566_v28 = vpack.c.bf16 %v534_v20, %v518_v19  ;;  %v3169_v6 = vld [vmem:[%s4589_s1 + $0x264] ss:$8 sps:$4 sm:$0xff]   ;;  %v79_v19 = vunpack.c.l.bf16 %v4045_v27  ;;  %v3191_v27 = vld [vmem:[%s4589_s1 + $0x2a0] ss:$8 sps:$4 sm:$0xff]  }
  0x8d   :  { %2431 = vmatprep.subr.bf16.mxu0 %v3154_v38  ;;  %v64_v38 = vunpack.c.h.bf16 %v4039_v21  ;;  %v565_v55 = vpack.c.bf16 %v533_v32, %v517_v8  ;;  %v4133_v16 = vrot.slane %v4130_v15, %v137_v5  ;;  %v3193_v20 = vld [vmem:[%s4589_s1 + $0x2a4] ss:$8 sps:$4 sm:$0xff]   ;;  %v4168_v29 = vrot.slane %v4076_v44, %v137_v5  ;;  %v3202_v32 = vld [vmem:[%s4589_s1 + $0x6b4] ss:$8 sps:$4 sm:$0xff]  }
  0x8e   :  { %2414 = vmatprep.mubr.bf16.mxu0 %v566_v28  ;;  %v3196_v21 = vld [vmem:[%s4589_s1 + $0x6a4] ss:$8 sps:$4 sm:$0xff]  }
  0x8f   :  { %2220 = vmatpush1.bf16.msra.mxu1 %v3149_v56  ;;  %v3170_v56 = vld [vmem:[%s4589_s1 + $0x660] ss:$8 sps:$4 sm:$0xff]   ;;  %v212_v48 = vmul.f32 %v4058_v30, %v64_v38  ;;  %2415 = vmatmul.mubr.bf16.gmra.mrb[4].mxu0 %v565_v55  ;;  %v219_v24 = vmul.f32 %v4133_v16, %v71_v2  ;;  %v3200_v55 = vld [vmem:[%s4589_s1 + $0x6b0] ss:$8 sps:$4 sm:$0xff]  }
  0x90   :  { %2432 = vmatpush1.bf16.msra.mxu0 %v3152_v18  ;;  %2221 = vmatprep.subr.bf16.mxu1 %v3157_v53  ;;  %v3178_v18 = vld [vmem:[%s4589_s1 + $0x674] ss:$8 sps:$4 sm:$0xff]   ;;  %v432_v53 = vmul.f32 0.2, %v368_v47  ;;  %v4157_v8 = vld [vmem:[%s4592_s3] sm:$0xff] }
  0x91   :  { %2433 = vmatprep.subr.bf16.mxu0 %v3160_v52  ;;  %v360_v54 = vadd.f32 %v4080_v7, %v212_v48  ;;  %v4160_v40 = vrot.slane %v4157_v8, %v137_v5 }
  0x92   :  { %v496_v52 = vmax.f32 %v368_v47, %v432_v53  ;;  %v3214_v53 = vld [vmem:[%s4589_s1 + $0x6d4] ss:$8 sps:$4 sm:$0xff]  }
  0x93   :  { %2222 = vmatpush1.bf16.msra.mxu1 %v3155_v1  ;;  %v424_v58 = vmul.f32 0.2, %v360_v54  ;;  %v3181_v1 = vld [vmem:[%s4589_s1 + $0x284] ss:$8 sps:$4 sm:$0xff]   ;;  %v367_v38 = vadd.f32 %v4160_v40, %v219_v24 }
  0x94   :  { %2434 = vmatpush1.bf16.msra.mxu0 %v3158_v35  ;;  %2223 = vmatprep.subr.bf16.mxu1 %v3163_v60  ;;  %v3184_v35 = vld [vmem:[%s4589_s1 + $0x684] ss:$8 sps:$4 sm:$0xff]   ;;  %v544_v3 = vpack.c.bf16 %v496_v52, %v480_v51  ;;  %v3179_v60 = vld [vmem:[%s4589_s1 + $0x280] ss:$8 sps:$4 sm:$0xff]  }
  0x95   :  { %2435 = vmatprep.subr.bf16.mxu0 %v3166_v26  ;;  %v488_v37 = vmax.f32 %v360_v54, %v424_v58  ;;  %v55_v26 = vunpack.c.l.bf16 %v4025_v14  ;;  %v4141_v14 = vrot.slane %v4054_v13, %v137_v5  ;;  %v431_v48 = vmul.f32 0.2, %v367_v38  ;;  %v37_v5 = vld [vmem:[%s4590_s0 + $0x90] sm:$0xff] }
  0x96   :  { %2245 = vmatprep.mubr.bf16.mxu1 %v544_v3  ;;  %v4208_v54 = vsub.s32 7, %v3480_v42  ;;  %v3218_v3 = vld [vmem:[%s4589_s1 + $0x6e0] ss:$8 sps:$4 sm:$0xff]  }
  0x97   :  { %2224 = vmatpush1.bf16.msra.mxu1 %v3161_v25  ;;  %v552_v9 = vpack.c.bf16 %v504_v4, %v488_v37  ;;  %v203_v22 = vmul.f32 %v4133_v16, %v55_v26  ;;  %v211_v25 = vmul.f32 %v4141_v14, %v63_v12  ;;  %v227_v28 = vmul.f32 %v4141_v14, %v79_v19  ;;  %v49_v26 = vld [vmem:[%s4590_s0 + $0xf0] sm:$0xff] }
  0x98   :  { %2436 = vmatpush1.bf16.msra.mxu0 %v3164_v31  ;;  %2225 = vmatprep.subr.bf16.mxu1 %v3169_v6  ;;  %v3194_v31 = vld [vmem:[%s4589_s1 + $0x6a0] ss:$8 sps:$4 sm:$0xff]   ;;  %v3199_v6 = vld [vmem:[%s4589_s1 + $0x2b4] ss:$8 sps:$4 sm:$0xff]   ;;  %v495_v52 = vmax.f32 %v367_v38, %v431_v48 }
  0x99   :  { %2437 = vmatprep.subr.bf16.mxu0 %v3172_v39  ;;  %2457 = vmatprep.mubr.bf16.mxu0 %v552_v9  ;;  %v351_v33 = vadd.f32 %v4160_v40, %v203_v22  ;;  %v3197_v39 = vld [vmem:[%s4589_s1 + $0x2b0] ss:$8 sps:$4 sm:$0xff]   ;;  %v359_v41 = vadd.f32 %v4168_v29, %v211_v25  ;;  %v375_v43 = vadd.f32 %v4168_v29, %v227_v28  ;;  %v3223_v12 = vld [vmem:[%s4589_s1 + $0x2f4] ss:$8 sps:$4 sm:$0xff]   ;;  %v111_v22 = vunpack.c.l.bf16 %v49_v26 }
  0x9a   :  { %v41_v9 = vld [vmem:[%s4590_s0 + $0xb0] sm:$0xff] }
  0x9b   :  { %2226 = vmatpush1.bf16.msra.mxu1 %v3167_v46  ;;  %v3208_v46 = vld [vmem:[%s4589_s1 + $0x6c4] ss:$8 sps:$4 sm:$0xff]   ;;  %v415_v47 = vmul.f32 0.2, %v351_v33  ;;  %v423_v23 = vmul.f32 0.2, %v359_v41  ;;  %v96_v2 = vunpack.c.h.bf16 %v41_v9  ;;  %v259_v38 = vmul.f32 %v4141_v14, %v111_v22 }
  0x9c   :  { %2438 = vmatpush1.bf16.msra.mxu0 %v3170_v56  ;;  %2227 = vmatprep.subr.bf16.mxu1 %v3175_v49  ;;  %v3203_v56 = vld [vmem:[%s4589_s1 + $0x2c0] ss:$8 sps:$4 sm:$0xff]   ;;  %v439_v49 = vmul.f32 0.2, %v375_v43  ;;  %v3226_v19 = vld [vmem:[%s4589_s1 + $0x6f4] ss:$8 sps:$4 sm:$0xff]   ;;  %v4342_v22 = vrot.slane %v4076_v44, %v4208_v54 }
  0x9d   :  { %2439 = vmatprep.subr.bf16.mxu0 %v3178_v18  ;;  %v3211_v18 = vld [vmem:[%s4589_s1 + $0x2d4] ss:$8 sps:$4 sm:$0xff]   ;;  %v479_v51 = vmax.f32 %v351_v33, %v415_v47  ;;  %v487_v58 = vmax.f32 %v359_v41, %v423_v23  ;;  %v244_v25 = vmul.f32 %v4058_v30, %v96_v2 }
  0x9e   :  { %v503_v59 = vmax.f32 %v375_v43, %v439_v49 }
  0x9f   :  { %2228 = vmatpush1.bf16.msra.mxu1 %v3173_v63  ;;  %v3212_v63 = vld [vmem:[%s4589_s1 + $0x6d0] ss:$8 sps:$4 sm:$0xff]   ;;  %v4228_v37 = vpack.c.bf16 %v495_v52, %v479_v51  ;;  %v392_v43 = vadd.f32 %v4080_v7, %v244_v25 }
  0xa0   :  { %2440 = vmatpush1.bf16.msra.mxu0 %v3176_v0  ;;  %2229 = vmatprep.subr.bf16.mxu1 %v3181_v1  ;;  %v3217_v0 = vld [vmem:[%s4589_s1 + $0x2e4] ss:$8 sps:$4 sm:$0xff]   ;;  %v4230_v4 = vpack.c.bf16 %v503_v59, %v487_v58 }
  0xa1   :  { %2441 = vmatprep.subr.bf16.mxu0 %v3184_v35  ;;  %v3220_v1 = vld [vmem:[%s4589_s1 + $0x6e4] ss:$8 sps:$4 sm:$0xff]   ;;  %v3215_v35 = vld [vmem:[%s4589_s1 + $0x2e0] ss:$8 sps:$4 sm:$0xff]   ;;  %v456_v48 = vmul.f32 0.2, %v392_v43 }
  0xa3   :  { %2230 = vmatpush1.bf16.msra.mxu1 %v3179_v60  ;;  %v45_v60 = vld [vmem:[%s4590_s0 + $0xd0] sm:$0xff]  ;;  %v520_v52 = vmax.f32 %v392_v43, %v456_v48  ;;  %v3253_v48 = vld [vmem:[%s4589_s1 + $0x344] ss:$8 sps:$4 sm:$0xff]  }
  0xa4   :  { %2442 = vmatpush1.bf16.msra.mxu0 %v3182_v62  ;;  %2231 = vmatprep.subr.bf16.mxu1 %v3187_v10  ;;  %v4243_v62 = vrot.slane %v4130_v15, %v4208_v54  ;;  %v88_v10 = vunpack.c.h.bf16 %v37_v5 }
  0xa5   :  { %2443 = vmatprep.subr.bf16.mxu0 %v3190_v11  ;;  %v104_v11 = vunpack.c.h.bf16 %v45_v60 }
  0xa6   :  { %v236_v24 = vmul.f32 %v3977_v34, %v88_v10  ;;  %v4316_v10 = vld [vmem:[%s4590_s0 + $0x38] sm:$0xff] }
  0xa7   :  { %2232 = vmatpush1.bf16.msra.mxu1 %v3185_v61  ;;  %v87_v61 = vunpack.c.l.bf16 %v37_v5 }
  0xa8   :  { %2444 = vmatpush1.bf16.msra.mxu0 %v3188_v17  ;;  %2233 = vmatprep.subr.bf16.mxu1 %v3193_v20  ;;  %v112_v17 = vunpack.c.h.bf16 %v49_v26  ;;  %v103_v20 = vunpack.c.l.bf16 %v45_v60 }
  0xa9   :  { %2445 = vmatprep.subr.bf16.mxu0 %v3196_v21  ;;  %v95_v21 = vunpack.c.l.bf16 %v41_v9  ;;  %v235_v28 = vmul.f32 %v4133_v16, %v87_v61  ;;  %v4323_v61 = vld [vmem:[%s4590_s0 + $0x78] sm:$0xff] }
  0xaa   :  { %v82_v25 = vunpack.c.h.bf16 %v4323_v61 }
  0xab   :  { %2234 = vmatpush1.bf16.msra.mxu1 %v3191_v27  ;;  %v252_v27 = vmul.f32 %v3977_v34, %v104_v11  ;;  %v243_v33 = vmul.f32 %v4141_v14, %v95_v21  ;;  %v3224_v34 = vld [vmem:[%s4589_s1 + $0x6f0] ss:$8 sps:$4 sm:$0xff]   ;;  %v66_v21 = vunpack.c.h.bf16 %v4316_v10 }
  0xac   :  { %2446 = vmatpush1.bf16.msra.mxu0 %v3194_v31  ;;  %2235 = vmatprep.subr.bf16.mxu1 %v3199_v6  ;;  %v3221_v31 = vld [vmem:[%s4589_s1 + $0x2f0] ss:$8 sps:$4 sm:$0xff]   ;;  %v260_v6 = vmul.f32 %v4058_v30, %v112_v17  ;;  %v3229_v30 = vld [vmem:[%s4589_s1 + $0x304] ss:$8 sps:$4 sm:$0xff]  }
  0xad   :  { %2447 = vmatprep.subr.bf16.mxu0 %v3202_v32  ;;  %v251_v32 = vmul.f32 %v4133_v16, %v103_v20  ;;  %v400_v41 = vadd.f32 %v3981_v36, %v252_v27  ;;  %v3232_v16 = vld [vmem:[%s4589_s1 + $0x704] ss:$8 sps:$4 sm:$0xff]   ;;  %v391_v23 = vadd.f32 %v4168_v29, %v243_v33 }
  0xae   :  { %v408_v14 = vadd.f32 %v4080_v7, %v260_v6  ;;  %v3241_v17 = vld [vmem:[%s4589_s1 + $0x324] ss:$8 sps:$4 sm:$0xff]  }
  0xaf   :  { %2236 = vmatpush1.bf16.msra.mxu1 %v3197_v39  ;;  %v384_v39 = vadd.f32 %v3981_v36, %v236_v24  ;;  %v4283_v36 = vld [vmem:[%s4590_s0 + $0x18] sm:$0xff]  ;;  %v464_v47 = vmul.f32 0.2, %v400_v41  ;;  %v455_v58 = vmul.f32 0.2, %v391_v23 }
  0xb0   :  { %2448 = vmatpush1.bf16.msra.mxu0 %v3200_v55  ;;  %2237 = vmatprep.subr.bf16.mxu1 %v3205_v45  ;;  %v383_v55 = vadd.f32 %v4160_v40, %v235_v28  ;;  %v399_v45 = vadd.f32 %v4160_v40, %v251_v32  ;;  %v472_v49 = vmul.f32 0.2, %v408_v14  ;;  %v3230_v40 = vld [vmem:[%s4589_s1 + $0x700] ss:$8 sps:$4 sm:$0xff]   ;;  %v58_v9 = vunpack.c.h.bf16 %v4283_v36  ;;  %v3244_v20 = vld [vmem:[%s4589_s1 + $0x724] ss:$8 sps:$4 sm:$0xff]  }
  0xb1   :  { %2449 = vmatprep.subr.bf16.mxu0 %v3208_v46  ;;  %v3227_v46 = vld [vmem:[%s4589_s1 + $0x300] ss:$8 sps:$4 sm:$0xff]   ;;  %v528_v51 = vmax.f32 %v400_v41, %v464_v47  ;;  %v519_v26 = vmax.f32 %v391_v23, %v455_v58  ;;  %v3250_v41 = vld [vmem:[%s4589_s1 + $0x734] ss:$8 sps:$4 sm:$0xff]   ;;  %v3256_v23 = vld [vmem:[%s4589_s1 + $0x744] ss:$8 sps:$4 sm:$0xff]  }
  0xb2   :  { %v447_v7 = vmul.f32 0.2, %v383_v55  ;;  %v536_v59 = vmax.f32 %v408_v14, %v472_v49  ;;  %v3239_v32 = vld [vmem:[%s4589_s1 + $0x320] ss:$8 sps:$4 sm:$0xff]   ;;  %v3260_v58 = vld [vmem:[%s4589_s1 + $0x750] ss:$8 sps:$4 sm:$0xff]  }
  0xb3   :  { %2238 = vmatpush1.bf16.msra.mxu1 %v3203_v56  ;;  %v448_v56 = vmul.f32 0.2, %v384_v39 }
  0xb4   :  { %2450 = vmatpush1.bf16.msra.mxu0 %v3206_v50  ;;  %2239 = vmatprep.subr.bf16.mxu1 %v3211_v18  ;;  %v463_v50 = vmul.f32 0.2, %v399_v45  ;;  %v407_v18 = vadd.f32 %v4168_v29, %v259_v38  ;;  %v3238_v29 = vld [vmem:[%s4589_s1 + $0x714] ss:$8 sps:$4 sm:$0xff]   ;;  %v511_v5 = vmax.f32 %v383_v55, %v447_v7  ;;  %v568_v11 = vpack.c.bf16 %v536_v59, %v520_v52  ;;  %v3257_v52 = vld [vmem:[%s4589_s1 + $0x350] ss:$8 sps:$4 sm:$0xff]  }
  0xb5   :  { %2451 = vmatprep.subr.bf16.mxu0 %v3214_v53  ;;  %v3235_v53 = vld [vmem:[%s4589_s1 + $0x314] ss:$8 sps:$4 sm:$0xff]   ;;  %v3268_v59 = vld [vmem:[%s4589_s1 + $0x764] ss:$8 sps:$4 sm:$0xff]  }
  0xb6   :  { %v527_v60 = vmax.f32 %v399_v45, %v463_v50  ;;  %v3245_v45 = vld [vmem:[%s4589_s1 + $0x330] ss:$8 sps:$4 sm:$0xff]  }
  0xb7   :  { %2240 = vmatpush1.bf16.msra.mxu1 %v3209_v57  ;;  %v512_v57 = vmax.f32 %v384_v39, %v448_v56  ;;  %v3247_v39 = vld [vmem:[%s4589_s1 + $0x334] ss:$8 sps:$4 sm:$0xff]  }
  0xb8   :  { %2452 = vmatpush1.bf16.msra.mxu0 %v3212_v63  ;;  %2241 = vmatprep.subr.bf16.mxu1 %v3217_v0  ;;  %v471_v63 = vmul.f32 0.2, %v407_v18  ;;  %v4302_v0 = vld [vmem:[%s4590_s0 + $0x58] sm:$0xff]  ;;  %v559_v28 = vpack.c.bf16 %v527_v60, %v511_v5 }
  0xb9   :  { %2453 = vmatprep.subr.bf16.mxu0 %v3220_v1  ;;  %v4306_v1 = vrot.slane %v4157_v8, %v4208_v54  ;;  %v3271_v5 = vld [vmem:[%s4589_s1 + $0x374] ss:$8 sps:$4 sm:$0xff]  }
  0xba   :  { %v535_v2 = vmax.f32 %v407_v18, %v471_v63  ;;  %v3251_v18 = vld [vmem:[%s4589_s1 + $0x340] ss:$8 sps:$4 sm:$0xff]   ;;  %v3274_v60 = vld [vmem:[%s4589_s1 + $0x774] ss:$8 sps:$4 sm:$0xff]  }
  0xbb   :  { %2242 = vmatpush1.bf16.msra.mxu1 %v3215_v35  ;;  %v4310_v35 = vrot.slane %v4054_v13, %v4208_v54  ;;  %v3242_v54 = vld [vmem:[%s4589_s1 + $0x720] ss:$8 sps:$4 sm:$0xff]  }
  0xbc   :  { %2454 = vmatpush1.bf16.msra.mxu0 %v3218_v3  ;;  %2243 = vmatprep.subr.bf16.mxu1 %v3223_v12  ;;  %v560_v3 = vpack.c.bf16 %v528_v51, %v512_v57  ;;  %v3233_v12 = vld [vmem:[%s4589_s1 + $0x310] ss:$8 sps:$4 sm:$0xff]   ;;  %v3259_v57 = vld [vmem:[%s4589_s1 + $0x354] ss:$8 sps:$4 sm:$0xff]   ;;  %v3263_v63 = vld [vmem:[%s4589_s1 + $0x360] ss:$8 sps:$4 sm:$0xff]  }
  0xbd   :  { %2455 = vmatprep.subr.bf16.mxu0 %v3226_v19  ;;  %v206_v19 = vmul.f32 %v4243_v62, %v58_v9  ;;  %v214_v6 = vmul.f32 %v4310_v35, %v66_v21  ;;  %v3262_v51 = vld [vmem:[%s4589_s1 + $0x754] ss:$8 sps:$4 sm:$0xff]   ;;  %v3269_v9 = vld [vmem:[%s4589_s1 + $0x370] ss:$8 sps:$4 sm:$0xff]   ;;  %v3289_v21 = vld [vmem:[%s4589_s1 + $0x3a4] ss:$8 sps:$4 sm:$0xff]  }
  0xbf   :  { %2244 = vmatpush1.bf16.msra.mxu1 %v3221_v31  ;;  %v354_v27 = vadd.f32 %v4306_v1, %v206_v19  ;;  %v567_v31 = vpack.c.bf16 %v535_v2, %v519_v26  ;;  %v362_v43 = vadd.f32 %v4342_v22, %v214_v6  ;;  %v3277_v26 = vld [vmem:[%s4589_s1 + $0x384] ss:$8 sps:$4 sm:$0xff]   ;;  %v3286_v19 = vld [vmem:[%s4589_s1 + $0x794] ss:$8 sps:$4 sm:$0xff]  }
  0xc0   :  { %2456 = vmatpush1.bf16.msra.mxu0 %v3224_v34  ;;  %2266 = vmatprep.subr.bf16.mxu1 %v3229_v30  ;;  %v230_v34 = vmul.f32 %v4310_v35, %v82_v25  ;;  %v3280_v2 = vld [vmem:[%s4589_s1 + $0x784] ss:$8 sps:$4 sm:$0xff]   ;;  %v3287_v25 = vld [vmem:[%s4589_s1 + $0x3a0] ss:$8 sps:$4 sm:$0xff]   ;;  %v3298_v6 = vld [vmem:[%s4589_s1 + $0x7b4] ss:$8 sps:$4 sm:$0xff]  }
  0xc1   :  { %2478 = vmatprep.subr.bf16.mxu0 %v3232_v16  ;;  %v418_v38 = vmul.f32 0.2, %v354_v27  ;;  %v426_v55 = vmul.f32 0.2, %v362_v43 }
  0xc2   :  { %2246 = vmatmul.mubr.bf16.vlgmr.msra.gmra.mrb[0].mxu1 %v4228_v37  ;;  %v3236_v37 = vld [vmem:[%s4589_s1 + $0x710] ss:$8 sps:$4 sm:$0xff]   ;;  %v378_v14 = vadd.f32 %v4342_v22, %v230_v34 }
  0xc3   :  { %2458 = vmatmul.mubr.bf16.vlgmr.msra.gmra.mrb[0].mxu0 %v4230_v4  ;;  %2267 = vmatpush1.bf16.msra.mxu1 %v3227_v46  ;;  %v74_v4 = vunpack.c.h.bf16 %v4302_v0  ;;  %v482_v16 = vmax.f32 %v354_v27, %v418_v38  ;;  %v3248_v46 = vld [vmem:[%s4589_s1 + $0x730] ss:$8 sps:$4 sm:$0xff]   ;;  %v490_v49 = vmax.f32 %v362_v43, %v426_v55  ;;  %v145_v27 = vsub.s32 6, %v3480_v42 }
  0xc4   :  { %2479 = vmatpush1.bf16.msra.mxu0 %v3230_v40  ;;  %2268 = vmatprep.subr.bf16.mxu1 %v3235_v53  ;;  %v442_v47 = vmul.f32 0.2, %v378_v14  ;;  %v3254_v40 = vld [vmem:[%s4589_s1 + $0x740] ss:$8 sps:$4 sm:$0xff]   ;;  %v4464_v42 = vld [vmem:[%s4590_s0 + $0x98] sm:$0xff] }
  0xc5   :  { %2480 = vmatprep.subr.bf16.mxu0 %v3238_v29  ;;  %2255 = vmatprep.mubr.bf16.mxu1 %v560_v3  ;;  %v222_v24 = vmul.f32 %v4243_v62, %v74_v4  ;;  %v3265_v29 = vld [vmem:[%s4589_s1 + $0x364] ss:$8 sps:$4 sm:$0xff]   ;;  %v3266_v3 = vld [vmem:[%s4589_s1 + $0x760] ss:$8 sps:$4 sm:$0xff]   ;;  %v3283_v4 = vld [vmem:[%s4589_s1 + $0x394] ss:$8 sps:$4 sm:$0xff]   ;;  %v90_v43 = vunpack.c.h.bf16 %v4464_v42 }
  0xc6   :  { %2467 = vmatprep.mubr.bf16.mxu0 %v568_v11  ;;  %v506_v50 = vmax.f32 %v378_v14, %v442_v47  ;;  %v3272_v11 = vld [vmem:[%s4589_s1 + $0x770] ss:$8 sps:$4 sm:$0xff]   ;;  %v3304_v14 = vld [vmem:[%s4589_s1 + $0x7c4] ss:$8 sps:$4 sm:$0xff]  }
  0xc7   :  { %2269 = vmatpush1.bf16.msra.mxu1 %v3233_v12  ;;  %v370_v33 = vadd.f32 %v4306_v1, %v222_v24  ;;  %v3275_v12 = vld [vmem:[%s4589_s1 + $0x380] ss:$8 sps:$4 sm:$0xff]   ;;  %v3292_v24 = vld [vmem:[%s4589_s1 + $0x7a4] ss:$8 sps:$4 sm:$0xff]   ;;  %v4478_v38 = vld [vmem:[%s4590_s0 + $0xb8] sm:$0xff] }
  0xc8   :  { %2481 = vmatpush1.bf16.msra.mxu0 %v3236_v37  ;;  %2270 = vmatprep.subr.bf16.mxu1 %v3241_v17  ;;  %v554_v53 = vpack.c.bf16 %v506_v50, %v490_v49  ;;  %v3278_v37 = vld [vmem:[%s4589_s1 + $0x780] ss:$8 sps:$4 sm:$0xff]   ;;  %v3281_v17 = vld [vmem:[%s4589_s1 + $0x390] ss:$8 sps:$4 sm:$0xff]  }
  0xc9   :  { %2482 = vmatprep.subr.bf16.mxu0 %v3244_v20  ;;  %v434_v30 = vmul.f32 0.2, %v370_v33  ;;  %v3284_v20 = vld [vmem:[%s4589_s1 + $0x790] ss:$8 sps:$4 sm:$0xff]   ;;  %v3299_v49 = vld [vmem:[%s4589_s1 + $0x3c0] ss:$8 sps:$4 sm:$0xff]  }
  0xca   :  { %2256 = vmatmul.mubr.bf16.gmra.mrb[4].mxu1 %v559_v28  ;;  %v3290_v28 = vld [vmem:[%s4589_s1 + $0x7a0] ss:$8 sps:$4 sm:$0xff]   ;;  %v4483_v34 = vld [vmem:[%s4590_s0 + $0xf8] sm:$0xff] }
  0xcb   :  { %2468 = vmatmul.mubr.bf16.gmra.mrb[4].mxu0 %v567_v31  ;;  %2271 = vmatpush1.bf16.msra.mxu1 %v3239_v32  ;;  %v498_v56 = vmax.f32 %v370_v33, %v434_v30  ;;  %v3295_v31 = vld [vmem:[%s4589_s1 + $0x3b4] ss:$8 sps:$4 sm:$0xff]   ;;  %v57_v32 = vunpack.c.l.bf16 %v4283_v36  ;;  %v73_v36 = vunpack.c.l.bf16 %v4302_v0  ;;  %v3293_v30 = vld [vmem:[%s4589_s1 + $0x3b0] ss:$8 sps:$4 sm:$0xff]  }
  0xcc   :  { %2483 = vmatpush1.bf16.msra.mxu0 %v3242_v54  ;;  %2272 = vmatprep.subr.bf16.mxu1 %v3247_v39  ;;  %v4468_v54 = vrot.slane %v4130_v15, %v145_v27  ;;  %v4473_v33 = vld [vmem:[%s4590_s0 + $0xd8] sm:$0xff]  ;;  %v65_v15 = vunpack.c.l.bf16 %v4316_v10  ;;  %v81_v39 = vunpack.c.l.bf16 %v4323_v61  ;;  %v98_v10 = vunpack.c.h.bf16 %v4478_v38 }
  0xcd   :  { %2484 = vmatprep.subr.bf16.mxu0 %v3250_v41  ;;  %v546_v7 = vpack.c.bf16 %v498_v56, %v482_v16  ;;  %2510 = vmatprep.mubr.bf16.mxu0 %v554_v53  ;;  %v178_v41 = vrot.slane %v4054_v13, %v145_v27  ;;  %v3296_v16 = vld [vmem:[%s4589_s1 + $0x7b0] ss:$8 sps:$4 sm:$0xff]   ;;  %v106_v0 = vunpack.c.h.bf16 %v4473_v33  ;;  %v114_v61 = vunpack.c.h.bf16 %v4483_v34  ;;  %v3301_v13 = vld [vmem:[%s4589_s1 + $0x3c4] ss:$8 sps:$4 sm:$0xff]  }
  0xce   :  { %v205_v55 = vmul.f32 %v4468_v54, %v57_v32  ;;  %v246_v50 = vmul.f32 %v4310_v35, %v98_v10 }
  0xcf   :  { %2273 = vmatpush1.bf16.msra.mxu1 %v3245_v45  ;;  %2298 = vmatprep.mubr.bf16.mxu1 %v546_v7  ;;  %v4507_v45 = vrot.slane %v4157_v8, %v145_v27  ;;  %v213_v56 = vmul.f32 %v178_v41, %v65_v15  ;;  %v229_v47 = vmul.f32 %v178_v41, %v81_v39  ;;  %v3302_v7 = vld [vmem:[%s4589_s1 + $0x7c0] ss:$8 sps:$4 sm:$0xff]  }
  0xd0   :  { %2485 = vmatpush1.bf16.msra.mxu0 %v3248_v46  ;;  %2274 = vmatprep.subr.bf16.mxu1 %v3253_v48  ;;  %v221_v46 = vmul.f32 %v4468_v54, %v73_v36  ;;  %v326_v48 = vrot.slane %v4076_v44, %v145_v27  ;;  %v254_v8 = vmul.f32 %v4243_v62, %v106_v0  ;;  %v3307_v44 = vld [vmem:[%s4589_s1 + $0x3d4] ss:$8 sps:$4 sm:$0xff]  }
  0xd1   :  { %2486 = vmatprep.subr.bf16.mxu0 %v3256_v23  ;;  %v238_v23 = vmul.f32 %v4243_v62, %v90_v43  ;;  %v353_v53 = vadd.f32 %v4507_v45, %v205_v55  ;;  %v3320_v43 = vld [vmem:[%s4589_s1 + $0x7f0] ss:$8 sps:$4 sm:$0xff]  }
  0xd2   :  { %v377_v62 = vadd.f32 %v326_v48, %v229_v47 }
  0xd3   :  { %2275 = vmatpush1.bf16.msra.mxu1 %v3251_v18  ;;  %v262_v18 = vmul.f32 %v4310_v35, %v114_v61  ;;  %v386_v35 = vadd.f32 %v4306_v1, %v238_v23 }
  0xd4   :  { %2487 = vmatpush1.bf16.msra.mxu0 %v3254_v40  ;;  %2276 = vmatprep.subr.bf16.mxu1 %v3259_v57  ;;  %v3310_v40 = vld [vmem:[%s4589_s1 + $0x7d4] ss:$8 sps:$4 sm:$0xff]   ;;  %v369_v57 = vadd.f32 %v4507_v45, %v221_v46 }
  0xd5   :  { %2488 = vmatprep.subr.bf16.mxu0 %v3262_v51  ;;  %v361_v51 = vadd.f32 %v326_v48, %v213_v56 }
  0xd7   :  { %2277 = vmatpush1.bf16.msra.mxu1 %v3257_v52  ;;  %v89_v52 = vunpack.c.l.bf16 %v4464_v42 }
  0xd8   :  { %2489 = vmatpush1.bf16.msra.mxu0 %v3260_v58  ;;  %2278 = vmatprep.subr.bf16.mxu1 %v3265_v29  ;;  %v105_v58 = vunpack.c.l.bf16 %v4473_v33  ;;  %v97_v29 = vunpack.c.l.bf16 %v4478_v38 }
  0xd9   :  { %2490 = vmatprep.subr.bf16.mxu0 %v3268_v59  ;;  %v113_v59 = vunpack.c.l.bf16 %v4483_v34 }
  0xdb   :  { %2279 = vmatpush1.bf16.msra.mxu1 %v3263_v63  ;;  %v3305_v63 = vld [vmem:[%s4589_s1 + $0x3d0] ss:$8 sps:$4 sm:$0xff]  }
  0xdc   :  { %2491 = vmatpush1.bf16.msra.mxu0 %v3266_v3  ;;  %2280 = vmatprep.subr.bf16.mxu1 %v3271_v5  ;;  %v3308_v3 = vld [vmem:[%s4589_s1 + $0x7d0] ss:$8 sps:$4 sm:$0xff]   ;;  %v402_v5 = vadd.f32 %v4306_v1, %v254_v8  ;;  %v237_v1 = vmul.f32 %v4468_v54, %v89_v52 }
  0xdd   :  { %2492 = vmatprep.subr.bf16.mxu0 %v3274_v60  ;;  %v394_v60 = vadd.f32 %v4342_v22, %v246_v50 }
  0xde   :  { %v466_v27 = vmul.f32 0.2, %v402_v5  ;;  %v385_v38 = vadd.f32 %v4507_v45, %v237_v1 }
  0xdf   :  { %2281 = vmatpush1.bf16.msra.mxu1 %v3269_v9  ;;  %v410_v9 = vadd.f32 %v4342_v22, %v262_v18  ;;  %v3311_v22 = vld [vmem:[%s4589_s1 + $0x3e0] ss:$8 sps:$4 sm:$0xff]  }
  0xe0   :  { %2493 = vmatpush1.bf16.msra.mxu0 %v3272_v11  ;;  %2282 = vmatprep.subr.bf16.mxu1 %v3277_v26  ;;  %v3313_v11 = vld [vmem:[%s4589_s1 + $0x3e4] ss:$8 sps:$4 sm:$0xff]   ;;  %v449_v61 = vmul.f32 0.2, %v385_v38 }
  0xe1   :  { %2494 = vmatprep.subr.bf16.mxu0 %v3280_v2  ;;  %v3316_v26 = vld [vmem:[%s4589_s1 + $0x7e4] ss:$8 sps:$4 sm:$0xff]   ;;  %v417_v2 = vmul.f32 0.2, %v353_v53 }
  0xe2   :  { %v513_v47 = vmax.f32 %v385_v38, %v449_v61 }
  0xe3   :  { %2283 = vmatpush1.bf16.msra.mxu1 %v3275_v12  ;;  %v433_v12 = vmul.f32 0.2, %v369_v57  ;;  %v481_v42 = vmax.f32 %v353_v53, %v417_v2 }
  0xe4   :  { %2495 = vmatpush1.bf16.msra.mxu0 %v3278_v37  ;;  %2284 = vmatprep.subr.bf16.mxu1 %v3283_v4  ;;  %v425_v37 = vmul.f32 0.2, %v361_v51  ;;  %v441_v4 = vmul.f32 0.2, %v377_v62 }
  0xe5   :  { %2496 = vmatprep.subr.bf16.mxu0 %v3286_v19  ;;  %v3314_v19 = vld [vmem:[%s4589_s1 + $0x7e0] ss:$8 sps:$4 sm:$0xff]   ;;  %v497_v32 = vmax.f32 %v369_v57, %v433_v12 }
  0xe6   :  { %v505_v33 = vmax.f32 %v377_v62, %v441_v4 }
  0xe7   :  { %2285 = vmatpush1.bf16.msra.mxu1 %v3281_v17  ;;  %v450_v17 = vmul.f32 0.2, %v386_v35  ;;  %v545_v10 = vpack.c.bf16 %v497_v32, %v481_v42 }
  0xe8   :  { %2497 = vmatpush1.bf16.msra.mxu0 %v3284_v20  ;;  %2286 = vmatprep.subr.bf16.mxu1 %v3289_v21  ;;  %v253_v20 = vmul.f32 %v4468_v54, %v105_v58  ;;  %v245_v21 = vmul.f32 %v178_v41, %v97_v29  ;;  %v489_v54 = vmax.f32 %v361_v51, %v425_v37 }
  0xe9   :  { %2498 = vmatprep.subr.bf16.mxu0 %v3292_v24  ;;  %v261_v24 = vmul.f32 %v178_v41, %v113_v59  ;;  %v514_v34 = vmax.f32 %v386_v35, %v450_v17  ;;  %v3317_v41 = vld [vmem:[%s4589_s1 + $0x3f0] ss:$8 sps:$4 sm:$0xff]  }
  0xea   :  { %v401_v36 = vadd.f32 %v4507_v45, %v253_v20  ;;  %v393_v15 = vadd.f32 %v326_v48, %v245_v21 }
  0xeb   :  { %2287 = vmatpush1.bf16.msra.mxu1 %v3287_v25  ;;  %v458_v25 = vmul.f32 0.2, %v394_v60  ;;  %v409_v39 = vadd.f32 %v326_v48, %v261_v24 }
  0xec   :  { %2499 = vmatpush1.bf16.msra.mxu0 %v3290_v28  ;;  %2288 = vmatprep.subr.bf16.mxu1 %v3295_v31  ;;  %v474_v28 = vmul.f32 0.2, %v410_v9  ;;  %v3319_v31 = vld [vmem:[%s4589_s1 + $0x3f4] ss:$8 sps:$4 sm:$0xff]   ;;  %v457_v55 = vmul.f32 0.2, %v393_v15 }
  0xed   :  { %2500 = vmatprep.subr.bf16.mxu0 %v3298_v6  ;;  %v3322_v6 = vld [vmem:[%s4589_s1 + $0x7f4] ss:$8 sps:$4 sm:$0xff]   ;;  %v473_v45 = vmul.f32 0.2, %v409_v39 }
  0xee   :  { %v538_v0 = vmax.f32 %v410_v9, %v474_v28  ;;  %v521_v23 = vmax.f32 %v393_v15, %v457_v55 }
  0xef   :  { %2289 = vmatpush1.bf16.msra.mxu1 %v3293_v30  ;;  %v530_v30 = vmax.f32 %v402_v5, %v466_v27 }
  0xf0   :  { %2501 = vmatpush1.bf16.msra.mxu0 %v3296_v16  ;;  %2290 = vmatprep.subr.bf16.mxu1 %v3301_v13  ;;  %v522_v16 = vmax.f32 %v394_v60, %v458_v25  ;;  %v553_v13 = vpack.c.bf16 %v505_v33, %v489_v54 }
  0xf1   :  { %2502 = vmatprep.subr.bf16.mxu0 %v3304_v14  ;;  %v465_v14 = vmul.f32 0.2, %v401_v36  ;;  %v562_v46 = vpack.c.bf16 %v530_v30, %v514_v34 }
  0xf2   :  { %v570_v56 = vpack.c.bf16 %v538_v0, %v522_v16 }
  0xf3   :  { %2291 = vmatpush1.bf16.msra.mxu1 %v3299_v49  ;;  %v529_v48 = vmax.f32 %v401_v36, %v465_v14  ;;  %v537_v49 = vmax.f32 %v409_v39, %v473_v45 }
  0xf4   :  { %2503 = vmatpush1.bf16.msra.mxu0 %v3302_v7  ;;  %2292 = vmatprep.subr.bf16.mxu1 %v3307_v44 }
  0xf5   :  { %2504 = vmatprep.subr.bf16.mxu0 %v3310_v40  ;;  %v561_v7 = vpack.c.bf16 %v529_v48, %v513_v47  ;;  %v569_v8 = vpack.c.bf16 %v537_v49, %v521_v23 }
  0xf7   :  { %2293 = vmatpush1.bf16.msra.mxu1 %v3305_v63 }
  0xf8   :  { %2505 = vmatpush1.bf16.msra.mxu0 %v3308_v3  ;;  %2294 = vmatprep.subr.bf16.mxu1 %v3313_v11 }
  0xf9   :  { %2506 = vmatprep.subr.bf16.mxu0 %v3316_v26 }
  0xfb   :  { %2295 = vmatpush1.bf16.msra.mxu1 %v3311_v22 }
  0xfc   :  { %2507 = vmatpush1.bf16.msra.mxu0 %v3314_v19  ;;  %2296 = vmatprep.subr.bf16.mxu1 %v3319_v31 }
  0xfd   :  { %2508 = vmatprep.subr.bf16.mxu0 %v3322_v6 }
  0xff   :  { %2297 = vmatpush1.bf16.msra.mxu1 %v3317_v41 }
 0x100   :  { %2509 = vmatpush1.bf16.msra.mxu0 %v3320_v43 }
 0x102   :  { %2299 = vmatmul.mubr.bf16.vlgmr.msra.gmra.mrb[0].mxu1 %v545_v10 }
 0x103   :  { %2511 = vmatmul.mubr.bf16.vlgmr.msra.gmra.mrb[0].mxu0 %v553_v13  ;;  %2308 = vmatprep.mubr.bf16.mxu1 %v562_v46 }
 0x104   :  { %2520 = vmatprep.mubr.bf16.mxu0 %v570_v56 }
 0x10a   :  { %2309 = vmatmul.mubr.bf16.gmra.mrb[4].mxu1 %v561_v7 }
 0x10b   :  { %2521 = vmatmul.mubr.bf16.gmra.mrb[4].mxu0 %v569_v8 }
 0x1d5   :  { %v2300_v50 = vpop.f32.mrb[0].mxu1 }
 0x1d6   :  { %v2512_v18 = vpop.f32.mrb[0].mxu0  ;;  %v2302_v40 = vpop.f32.mrb[1].mxu1 }
 0x1d7   :  { %v2883_v44 = vadd.f32 %v2512_v18, %v2300_v50  ;;  %v2514_v53 = vpop.f32.mrb[1].mxu0  ;;  %v2304_v51 = vpop.f32.mrb[2].mxu1 }
 0x1d8   :  { %v2884_v57 = vadd.f32 %v2514_v53, %v2302_v40  ;;  %v2516_v62 = vpop.f32.mrb[2].mxu0  ;;  %v2306_v35 = vpop.f32.mrb[3].mxu1 }
 0x1d9   :  { %v2885_v52 = vadd.f32 %v2516_v62, %v2304_v51  ;;  %v2518_v58 = vpop.f32.mrb[3].mxu0  ;;  %v2549_v63 = vmul.f32 %v2883_v44, %v2883_v44 }
 0x1da   :  { %v2879_v29 = vpack.c.bf16 %v2884_v57, %v2883_v44  ;;  %v2886_v59 = vadd.f32 %v2518_v58, %v2306_v35  ;;  %v2550_v60 = vmul.f32 %v2884_v57, %v2884_v57 }
 0x1db   :  { %v2531_v3 = vadd.f32 %v2885_v52, %v2883_v44  ;;  %v2551_v5 = vmul.f32 %v2885_v52, %v2885_v52 }
 0x1dc   :  { %2607 = vst [vmem:[%s4593_s4] sm:$0xff] %v2879_v29  ;;  %v2540_v9 = vadd.f32 %v2886_v59, %v2884_v57  ;;  %v2552_v11 = vmul.f32 %v2886_v59, %v2886_v59  ;;  %v2880_v26 = vpack.c.bf16 %v2886_v59, %v2885_v52 }
 0x1dd   :  { %v2557_v2 = vadd.f32 %v2551_v5, %v2549_v63  ;;  %v2310_v37 = vpop.f32.mrb[4].mxu1 }
 0x1de   :  { %v2566_v12 = vadd.f32 %v2552_v11, %v2550_v60  ;;  %2608 = vst [vmem:[%s4593_s4 + $0x8] sm:$0xff] %v2880_v26  ;;  %v2522_v4 = vpop.f32.mrb[4].mxu0  ;;  %v2312_v22 = vpop.f32.mrb[5].mxu1 }
 0x1df   :  { %v2887_v1 = vadd.f32 %v2522_v4, %v2310_v37  ;;  %v2524_v19 = vpop.f32.mrb[5].mxu0  ;;  %v2314_v20 = vpop.f32.mrb[6].mxu1 }
 0x1e0   :  { %v2888_v17 = vadd.f32 %v2524_v19, %v2312_v22  ;;  %v2526_v21 = vpop.f32.mrb[6].mxu0  ;;  %v2316_v28 = vpop.f32.mrb[7].mxu1 }
 0x1e1   :  { %v2532_v24 = vadd.f32 %v2887_v1, %v2531_v3  ;;  %v2553_v27 = vmul.f32 %v2887_v1, %v2887_v1  ;;  %v2889_v25 = vadd.f32 %v2526_v21, %v2314_v20  ;;  %v2528_v31 = vpop.f32.mrb[7].mxu0 }
 0x1e2   :  { %v2541_v6 = vadd.f32 %v2888_v17, %v2540_v9  ;;  %v2554_v42 = vmul.f32 %v2888_v17, %v2888_v17  ;;  %v2881_v32 = vpack.c.bf16 %v2888_v17, %v2887_v1  ;;  %v2890_v54 = vadd.f32 %v2528_v31, %v2316_v28 }
 0x1e3   :  { %v2558_v33 = vadd.f32 %v2557_v2, %v2553_v27  ;;  %v2533_v38 = vadd.f32 %v2889_v25, %v2532_v24  ;;  %v2555_v34 = vmul.f32 %v2889_v25, %v2889_v25 }
 0x1e4   :  { %v2567_v36 = vadd.f32 %v2566_v12, %v2554_v42  ;;  %2609 = vst [vmem:[%s4593_s4 + $0x10] sm:$0xff] %v2881_v32  ;;  %v2542_v15 = vadd.f32 %v2890_v54, %v2541_v6  ;;  %v2556_v39 = vmul.f32 %v2890_v54, %v2890_v54  ;;  %v2882_v41 = vpack.c.bf16 %v2890_v54, %v2889_v25 }
 0x1e5   :  { %v2534_v43 = vrot.slane %v2533_v38, 4  ;;  %v2559_v30 = vadd.f32 %v2558_v33, %v2555_v34 }
 0x1e6   :  { %v2543_v16 = vrot.slane %v2542_v15, 4  ;;  %v2568_v0 = vadd.f32 %v2567_v36, %v2556_v39  ;;  %2610 = vst [vmem:[%s4593_s4 + $0x18] sm:$0xff] %v2882_v41 }
 0x1e7   :  { %v2535_v10 = vadd.f32 %v2534_v43, %v2533_v38  ;;  %v2560_v61 = vrot.slane %v2559_v30, 4 }
 0x1e8   :  { %v2544_v13 = vadd.f32 %v2543_v16, %v2542_v15  ;;  %v2569_v14 = vrot.slane %v2568_v0, 4 }
 0x1e9   :  { %v2536_v55 = vrot.slane %v2535_v10, 2  ;;  %v2561_v45 = vadd.f32 %v2560_v61, %v2559_v30 }
 0x1ea   :  { %v2545_v46 = vrot.slane %v2544_v13, 2  ;;  %v2570_v56 = vadd.f32 %v2569_v14, %v2568_v0 }
 0x1eb   :  { %v2537_v47 = vadd.f32 %v2536_v55, %v2535_v10  ;;  %v2562_v48 = vrot.slane %v2561_v45, 2 }
 0x1ec   :  { %v2546_v23 = vadd.f32 %v2545_v46, %v2544_v13  ;;  %v2571_v49 = vrot.slane %v2570_v56, 2 }
 0x1ed   :  { %v2538_v7 = vrot.slane %v2537_v47, 1  ;;  %v2563_v8 = vadd.f32 %v2562_v48, %v2561_v45 }
 0x1ee   :  { %v2547_v50 = vrot.slane %v2546_v23, 1  ;;  %v2572_v18 = vadd.f32 %v2571_v49, %v2570_v56 }
 0x1ef   :  { %v2564_v44 = vrot.slane %v2563_v8, 1  ;;  %v2539_v53 = vadd.f32 %v2538_v7, %v2537_v47 }
 0x1f0   :  { %v2573_v40 = vrot.slane %v2572_v18, 1  ;;  %v2548_v51 = vadd.f32 %v2547_v50, %v2546_v23 }
 0x1f1   :  { %v2565_v57 = vadd.f32 %v2564_v44, %v2563_v8 }
 0x1f2   :  { %v2574_v62 = vadd.f32 %v2573_v40, %v2572_v18 }
 0x1f3   :  { %v2576_v52 = vsel %vm2575_vm0, %v2539_v53, %v2565_v57 }
 0x1f4   :  { %v2579_v35 = vsel %vm2578_vm1, %v2576_v52, 0.0  ;;  %v2577_v58 = vsel %vm2575_vm0, %v2548_v51, %v2574_v62 }
 0x1f5   :  { %2581 = vst [vmem:[%s4594_s5] sm:$0xff] %v2579_v35  ;;  %v2580_v29 = vsel %vm2578_vm1, %v2577_v58, 0.0 }
 0x1f6   :  { %2582 = vst [vmem:[%s4594_s5 + $0x8] sm:$0xff] %v2580_v29 }

// kernel: discriminator_forward.7
= control target key start
LH: loop header
LB: loop body
LE: loop exit
PB: predicated region body
PF: predicated region fallthrough
CT: control target
= control target key end

     0   :  { %v51_v21 = vlaneseq  ;;  %s2947_s1 = inlined_call_operand.vmem [shape: bf16[2304,128], index: 1, kind: input, shape index: {}]   ;;  %s2948_s0 = inlined_call_operand.vmem [shape: bf16[8,2304], index: 0, kind: input, shape index: {}]   ;;  %s2949_s2 = inlined_call_operand.vmem [shape: f32[1,2304], index: 2, kind: input, shape index: {}]   ;;  %s2950_s3 = inlined_call_operand.vmem [shape: f32[1,2304], index: 3, kind: input, shape index: {}]   ;;  %s2951_s4 = inlined_call_operand.vmem [shape: f32[8,128], index: 4, kind: output, shape index: {}]  }
   0x1   :  { %v2192_v0 = vld [vmem:[%s2947_s1 + $0x40] sm:$0xff]   ;;  %v2196_v4 = vld [vmem:[%s2947_s1 + $0x48] sm:$0xff]   ;;  %v2200_v8 = vld [vmem:[%s2947_s1 + $0x50] sm:$0xff]  }
   0x2   :  { %v2193_v1 = vld [vmem:[%s2947_s1 + $0xc0] sm:$0xff]   ;;  %1994 = vmatprep.subr.bf16.mxu0 %v2192_v0  ;;  %v2197_v5 = vld [vmem:[%s2947_s1 + $0xc8] sm:$0xff]   ;;  %v2201_v9 = vld [vmem:[%s2947_s1 + $0xd0] sm:$0xff]   ;;  %v2440_v26 = vshrl.u32 %v51_v21, 7 }
   0x3   :  { %v2194_v2 = vld [vmem:[%s2947_s1] sm:$0xff]   ;;  %2016 = vmatprep.subr.bf16.mxu1 %v2193_v1  ;;  %v2198_v6 = vld [vmem:[%s2947_s1 + $0x8] sm:$0xff]   ;;  %v2202_v10 = vld [vmem:[%s2947_s1 + $0x10] sm:$0xff]  }
   0x4   :  { %v2195_v3 = vld [vmem:[%s2947_s1 + $0x80] sm:$0xff]   ;;  %1995 = vmatpush3.bf16.msra.mxu0 %v2194_v2  ;;  %v2199_v7 = vld [vmem:[%s2947_s1 + $0x88] sm:$0xff]   ;;  %v2203_v11 = vld [vmem:[%s2947_s1 + $0x90] sm:$0xff]   ;;  %v2455_v31 = vsub.s32 1, %v2440_v26  ;;  %v2461_v33 = vsub.s32 3, %v2440_v26  ;;  %v2467_v35 = vsub.s32 0, %v2440_v26 }
   0x5   :  { %2017 = vmatpush3.bf16.msra.mxu1 %v2195_v3  ;;  %1996 = vmatprep.subr.bf16.mxu0 %v2196_v4  ;;  %v2204_v12 = vld [vmem:[%s2947_s1 + $0x58] sm:$0xff]   ;;  %v2208_v16 = vld [vmem:[%s2947_s1 + $0x60] sm:$0xff]   ;;  %v2212_v20 = vld [vmem:[%s2947_s1 + $0x68] sm:$0xff]   ;;  %v2473_v37 = vsub.s32 2, %v2440_v26 }
   0x6   :  { %2018 = vmatprep.subr.bf16.mxu1 %v2197_v5  ;;  %v2205_v13 = vld [vmem:[%s2947_s1 + $0xd8] sm:$0xff]   ;;  %v2209_v17 = vld [vmem:[%s2947_s1 + $0xe0] sm:$0xff]   ;;  %v2213_v22 = vld [vmem:[%s2947_s1 + $0xe8] sm:$0xff]  }
   0x7   :  { %v2206_v14 = vld [vmem:[%s2947_s1 + $0x18] sm:$0xff]   ;;  %v2210_v18 = vld [vmem:[%s2947_s1 + $0x20] sm:$0xff]   ;;  %v2214_v23 = vld [vmem:[%s2947_s1 + $0x28] sm:$0xff]  }
   0x8   :  { %1997 = vmatpush3.bf16.msra.mxu0 %v2198_v6  ;;  %v2207_v15 = vld [vmem:[%s2947_s1 + $0x98] sm:$0xff]   ;;  %v2211_v19 = vld [vmem:[%s2947_s1 + $0xa0] sm:$0xff]   ;;  %v2215_v24 = vld [vmem:[%s2947_s1 + $0xa8] sm:$0xff]  }
   0x9   :  { %2019 = vmatpush3.bf16.msra.mxu1 %v2199_v7  ;;  %1998 = vmatprep.subr.bf16.mxu0 %v2200_v8  ;;  %v2216_v25 = vld [vmem:[%s2947_s1 + $0x70] sm:$0xff]   ;;  %v2220_v30 = vld [vmem:[%s2947_s1 + $0x78] sm:$0xff]   ;;  %v18_v38 = vld [vmem:[%s2948_s0] sm:$0xff] }
   0xa   :  { %2020 = vmatprep.subr.bf16.mxu1 %v2201_v9  ;;  %v2217_v27 = vld [vmem:[%s2947_s1 + $0xf0] sm:$0xff]   ;;  %v2221_v32 = vld [vmem:[%s2947_s1 + $0xf8] sm:$0xff]   ;;  %v2481_v39 = vld [vmem:[%s2949_s2] sm:$0xff]  ;;  %v27_v41 = vunpack.c.l.bf16 %v18_v38  ;;  %v28_v42 = vunpack.c.h.bf16 %v18_v38 }
   0xb   :  { %v2218_v28 = vld [vmem:[%s2947_s1 + $0x30] sm:$0xff]   ;;  %v2222_v34 = vld [vmem:[%s2947_s1 + $0x38] sm:$0xff]   ;;  %v2486_v40 = vld [vmem:[%s2950_s3] sm:$0xff]  ;;  %v58_v43 = vrot.slane %v2481_v39, %v2455_v31  ;;  %v66_v48 = vrot.slane %v2481_v39, %v2461_v33  ;;  %v54_v52 = vrot.slane %v2481_v39, %v2467_v35  ;;  %v62_v54 = vrot.slane %v2481_v39, %v2473_v37 }
   0xc   :  { %1999 = vmatpush3.bf16.msra.mxu0 %v2202_v10  ;;  %v2219_v29 = vld [vmem:[%s2947_s1 + $0xb0] sm:$0xff]   ;;  %v2223_v36 = vld [vmem:[%s2947_s1 + $0xb8] sm:$0xff]   ;;  %v172_v44 = vrot.slane %v2486_v40, %v2455_v31  ;;  %v19_v45 = vld [vmem:[%s2948_s0 + $0x8] sm:$0xff]  ;;  %v180_v49 = vrot.slane %v2486_v40, %v2461_v33  ;;  %v168_v53 = vrot.slane %v2486_v40, %v2467_v35  ;;  %v176_v56 = vrot.slane %v2486_v40, %v2473_v37 }
   0xd   :  { %2021 = vmatpush3.bf16.msra.mxu1 %v2203_v11  ;;  %2000 = vmatprep.subr.bf16.mxu0 %v2204_v12  ;;  %v29_v46 = vunpack.c.l.bf16 %v19_v45  ;;  %v30_v47 = vunpack.c.h.bf16 %v19_v45  ;;  %v2224_v50 = vld [vmem:[%s2947_s1 + $0x140] sm:$0xff]   ;;  %v142_v51 = vmul.f32 %v58_v43, %v28_v42  ;;  %v141_v59 = vmul.f32 %v54_v52, %v27_v41  ;;  %v2228_v12 = vld [vmem:[%s2947_s1 + $0x148] sm:$0xff]   ;;  %v2235_v21 = vld [vmem:[%s2947_s1 + $0x190] sm:$0xff]  }
   0xe   :  { %2022 = vmatprep.subr.bf16.mxu1 %v2205_v13  ;;  %v2226_v57 = vld [vmem:[%s2947_s1 + $0x1c0] sm:$0xff]   ;;  %v2246_v38 = vld [vmem:[%s2947_s1 + $0x1e8] sm:$0xff]   ;;  %v2580_v41 = vsub.s32 7, %v2440_v26  ;;  %v2586_v43 = vsub.s32 6, %v2440_v26  ;;  %v2248_v45 = vld [vmem:[%s2947_s1 + $0x170] sm:$0xff]  }
   0xf   :  { %v144_v55 = vmul.f32 %v66_v48, %v30_v47  ;;  %v256_v58 = vadd.f32 %v172_v44, %v142_v51  ;;  %v143_v60 = vmul.f32 %v62_v54, %v29_v46  ;;  %v255_v63 = vadd.f32 %v168_v53, %v141_v59  ;;  %v2225_v6 = vld [vmem:[%s2947_s1 + $0x100] sm:$0xff]   ;;  %v2245_v42 = vld [vmem:[%s2947_s1 + $0x128] sm:$0xff]   ;;  %v20_v48 = vld [vmem:[%s2948_s0 + $0x10] sm:$0xff] }
  0x10   :  { %2001 = vmatpush3.bf16.msra.mxu0 %v2206_v14  ;;  %v2227_v10 = vld [vmem:[%s2947_s1 + $0x180] sm:$0xff]   ;;  %v2247_v44 = vld [vmem:[%s2947_s1 + $0x1a8] sm:$0xff]   ;;  %v2249_v51 = vld [vmem:[%s2947_s1 + $0x130] sm:$0xff]   ;;  %v31_v52 = vunpack.c.l.bf16 %v20_v48  ;;  %v32_v53 = vunpack.c.h.bf16 %v20_v48  ;;  %v82_v54 = vrot.slane %v2481_v39, %v2580_v41  ;;  %v192_v59 = vrot.slane %v2486_v40, %v2586_v43 }
  0x11   :  { %2023 = vmatpush3.bf16.msra.mxu1 %v2207_v15  ;;  %2002 = vmatprep.subr.bf16.mxu0 %v2208_v16  ;;  %v258_v61 = vadd.f32 %v180_v49, %v144_v55  ;;  %v274_v62 = vmul.f32 0.2, %v256_v58  ;;  %v257_v0 = vadd.f32 %v176_v56, %v143_v60  ;;  %v273_v3 = vmul.f32 0.2, %v255_v63  ;;  %v2230_v15 = vld [vmem:[%s2947_s1 + $0x1c8] sm:$0xff]   ;;  %v2251_v56 = vld [vmem:[%s2947_s1 + $0x1b0] sm:$0xff]  }
  0x12   :  { %2024 = vmatprep.subr.bf16.mxu1 %v2209_v17  ;;  %v2229_v16 = vld [vmem:[%s2947_s1 + $0x108] sm:$0xff]   ;;  %v78_v55 = vrot.slane %v2481_v39, %v2586_v43  ;;  %v2274_v48 = vld [vmem:[%s2947_s1 + $0x2e0] sm:$0xff]  }
  0x13   :  { %v276_v1 = vmul.f32 0.2, %v258_v61  ;;  %v292_v2 = vmax.f32 %v256_v58, %v274_v62  ;;  %v275_v4 = vmul.f32 0.2, %v257_v0  ;;  %v291_v8 = vmax.f32 %v255_v63, %v273_v3  ;;  %v2231_v17 = vld [vmem:[%s2947_s1 + $0x188] sm:$0xff]  }
  0x14   :  { %2003 = vmatpush3.bf16.msra.mxu0 %v2210_v18  ;;  %v2232_v18 = vld [vmem:[%s2947_s1 + $0x150] sm:$0xff]   ;;  %v196_v58 = vrot.slane %v2486_v40, %v2580_v41 }
  0x15   :  { %2025 = vmatpush3.bf16.msra.mxu1 %v2211_v19  ;;  %2004 = vmatprep.subr.bf16.mxu0 %v2212_v20  ;;  %v294_v5 = vmax.f32 %v258_v61, %v276_v1  ;;  %v310_v7 = vpack.c.bf16 %v292_v2, %v292_v2  ;;  %v293_v9 = vmax.f32 %v257_v0, %v275_v4  ;;  %v2234_v19 = vld [vmem:[%s2947_s1 + $0x1d0] sm:$0xff]   ;;  %v2254_v0 = vld [vmem:[%s2947_s1 + $0x1f8] sm:$0xff]  }
  0x16   :  { %2026 = vmatprep.subr.bf16.mxu1 %v2213_v22  ;;  %v309_v13 = vpack.c.bf16 %v291_v8, %v291_v8  ;;  %v2233_v20 = vld [vmem:[%s2947_s1 + $0x110] sm:$0xff]   ;;  %v2236_v22 = vld [vmem:[%s2947_s1 + $0x158] sm:$0xff]  }
  0x17   :  { %v312_v11 = vpack.c.bf16 %v294_v5, %v294_v5  ;;  %1511 = vmatprep.mubr.bf16.mxu0 %v310_v7  ;;  %v311_v14 = vpack.c.bf16 %v293_v9, %v293_v9  ;;  %v2255_v2 = vld [vmem:[%s2947_s1 + $0x1b8] sm:$0xff]  }
  0x18   :  { %2005 = vmatpush3.bf16.msra.mxu0 %v2214_v23  ;;  %v2238_v23 = vld [vmem:[%s2947_s1 + $0x1d8] sm:$0xff]  }
  0x19   :  { %2027 = vmatpush3.bf16.msra.mxu1 %v2215_v24  ;;  %2006 = vmatprep.subr.bf16.mxu0 %v2216_v25  ;;  %v2237_v24 = vld [vmem:[%s2947_s1 + $0x118] sm:$0xff]  }
  0x1a   :  { %2028 = vmatprep.subr.bf16.mxu1 %v2217_v27  ;;  %1551 = vmatprep.mubr.bf16.mxu1 %v312_v11  ;;  %v2239_v25 = vld [vmem:[%s2947_s1 + $0x198] sm:$0xff]   ;;  %v2240_v27 = vld [vmem:[%s2947_s1 + $0x160] sm:$0xff]  }
  0x1b   :  { %v2258_v11 = vld [vmem:[%s2947_s1 + $0x2c0] sm:$0xff]  }
  0x1c   :  { %2007 = vmatpush3.bf16.msra.mxu0 %v2218_v28  ;;  %v2242_v28 = vld [vmem:[%s2947_s1 + $0x1e0] sm:$0xff]  }
  0x1d   :  { %2029 = vmatpush3.bf16.msra.mxu1 %v2219_v29  ;;  %2008 = vmatprep.subr.bf16.mxu0 %v2220_v30  ;;  %v2241_v29 = vld [vmem:[%s2947_s1 + $0x120] sm:$0xff]  }
  0x1e   :  { %2030 = vmatprep.subr.bf16.mxu1 %v2221_v32  ;;  %v2243_v30 = vld [vmem:[%s2947_s1 + $0x1a0] sm:$0xff]   ;;  %v2568_v32 = vsub.s32 5, %v2440_v26 }
  0x20   :  { %2009 = vmatpush3.bf16.msra.mxu0 %v2222_v34  ;;  %v2244_v34 = vld [vmem:[%s2947_s1 + $0x168] sm:$0xff]   ;;  %v74_v46 = vrot.slane %v2481_v39, %v2568_v32  ;;  %v188_v49 = vrot.slane %v2486_v40, %v2568_v32 }
  0x21   :  { %2031 = vmatpush3.bf16.msra.mxu1 %v2223_v36  ;;  %2038 = vmatprep.subr.bf16.mxu0 %v2224_v50  ;;  %v2574_v36 = vsub.s32 4, %v2440_v26  ;;  %v2250_v26 = vld [vmem:[%s2947_s1 + $0x1f0] sm:$0xff]  }
  0x22   :  { %2060 = vmatprep.subr.bf16.mxu1 %v2226_v57  ;;  %v21_v57 = vld [vmem:[%s2948_s0 + $0x18] sm:$0xff]  ;;  %v146_v60 = vmul.f32 %v74_v46, %v32_v53  ;;  %v2279_v53 = vld [vmem:[%s2947_s1 + $0x2a8] sm:$0xff]  }
  0x23   :  { %1512 = vmatmul.mubr.bf16.vlgmr.msra.gmra.mrb[0].mxu0 %v309_v13  ;;  %v70_v47 = vrot.slane %v2481_v39, %v2574_v36  ;;  %v184_v50 = vrot.slane %v2486_v40, %v2574_v36  ;;  %v2252_v39 = vld [vmem:[%s2947_s1 + $0x178] sm:$0xff]   ;;  %v33_v62 = vunpack.c.l.bf16 %v21_v57  ;;  %v34_v63 = vunpack.c.h.bf16 %v21_v57  ;;  %v22_v57 = vld [vmem:[%s2948_s0 + $0x20] sm:$0xff] }
  0x24   :  { %1552 = vmatmul.mubr.bf16.vlgmr.msra.gmra.mrb[0].mxu1 %v311_v14  ;;  %2039 = vmatpush3.bf16.msra.mxu0 %v2225_v6  ;;  %v2253_v40 = vld [vmem:[%s2947_s1 + $0x138] sm:$0xff]   ;;  %v260_v1 = vadd.f32 %v188_v49, %v146_v60  ;;  %v2256_v6 = vld [vmem:[%s2947_s1 + $0x240] sm:$0xff]   ;;  %v36_v60 = vunpack.c.h.bf16 %v22_v57 }
  0x25   :  { %2061 = vmatpush3.bf16.msra.mxu1 %v2227_v10  ;;  %2040 = vmatprep.subr.bf16.mxu0 %v2228_v12  ;;  %v145_v61 = vmul.f32 %v70_v47, %v31_v52  ;;  %v148_v4 = vmul.f32 %v82_v54, %v34_v63  ;;  %v147_v5 = vmul.f32 %v78_v55, %v33_v62  ;;  %v2271_v46 = vld [vmem:[%s2947_s1 + $0x298] sm:$0xff]   ;;  %v2272_v47 = vld [vmem:[%s2947_s1 + $0x260] sm:$0xff]   ;;  %v2278_v52 = vld [vmem:[%s2947_s1 + $0x2e8] sm:$0xff]  }
  0x26   :  { %2062 = vmatprep.subr.bf16.mxu1 %v2230_v15  ;;  %v278_v7 = vmul.f32 0.2, %v260_v1  ;;  %v2275_v49 = vld [vmem:[%s2947_s1 + $0x2a0] sm:$0xff]   ;;  %v2280_v54 = vld [vmem:[%s2947_s1 + $0x270] sm:$0xff]   ;;  %v2734_v62 = vld [vmem:[%s2950_s3 + $0x8] sm:$0xff] }
  0x27   :  { %v259_v3 = vadd.f32 %v184_v50, %v145_v61  ;;  %v262_v9 = vadd.f32 %v196_v58, %v148_v4  ;;  %v261_v10 = vadd.f32 %v192_v59, %v147_v5  ;;  %v2276_v50 = vld [vmem:[%s2947_s1 + $0x268] sm:$0xff]   ;;  %v2281_v55 = vld [vmem:[%s2947_s1 + $0x230] sm:$0xff]  }
  0x28   :  { %2041 = vmatpush3.bf16.msra.mxu0 %v2229_v16  ;;  %v296_v12 = vmax.f32 %v260_v1, %v278_v7  ;;  %v2257_v16 = vld [vmem:[%s2947_s1 + $0x200] sm:$0xff]   ;;  %v2724_v58 = vld [vmem:[%s2949_s2 + $0x8] sm:$0xff]  ;;  %v2283_v59 = vld [vmem:[%s2947_s1 + $0x2b0] sm:$0xff]   ;;  %v200_v1 = vrot.slane %v2734_v62, %v2467_v35 }
  0x29   :  { %2063 = vmatpush3.bf16.msra.mxu1 %v2231_v17  ;;  %2042 = vmatprep.subr.bf16.mxu0 %v2232_v18  ;;  %v277_v8 = vmul.f32 0.2, %v259_v3  ;;  %v280_v14 = vmul.f32 0.2, %v262_v9  ;;  %v279_v15 = vmul.f32 0.2, %v261_v10  ;;  %v90_v61 = vrot.slane %v2724_v58, %v2455_v31 }
  0x2a   :  { %2064 = vmatprep.subr.bf16.mxu1 %v2234_v19  ;;  %v314_v17 = vpack.c.bf16 %v296_v12, %v296_v12  ;;  %v86_v63 = vrot.slane %v2724_v58, %v2467_v35  ;;  %v94_v7 = vrot.slane %v2724_v58, %v2473_v37  ;;  %v208_v12 = vrot.slane %v2734_v62, %v2473_v37 }
  0x2b   :  { %v295_v13 = vmax.f32 %v259_v3, %v277_v8  ;;  %v298_v19 = vmax.f32 %v262_v9, %v280_v14  ;;  %v2285_v3 = vld [vmem:[%s2947_s1 + $0x238] sm:$0xff]   ;;  %v150_v4 = vmul.f32 %v90_v61, %v36_v60  ;;  %v2307_v60 = vld [vmem:[%s2947_s1 + $0x3a0] sm:$0xff]   ;;  %v2309_v61 = vld [vmem:[%s2947_s1 + $0x328] sm:$0xff]  }
  0x2c   :  { %2043 = vmatpush3.bf16.msra.mxu0 %v2233_v20  ;;  %v2259_v20 = vld [vmem:[%s2947_s1 + $0x280] sm:$0xff]   ;;  %1591 = vmatprep.mubr.bf16.mxu0 %v314_v17  ;;  %v2286_v8 = vld [vmem:[%s2947_s1 + $0x2f8] sm:$0xff]  }
  0x2d   :  { %2065 = vmatpush3.bf16.msra.mxu1 %v2235_v21  ;;  %2044 = vmatprep.subr.bf16.mxu0 %v2236_v22  ;;  %v313_v18 = vpack.c.bf16 %v295_v13, %v295_v13  ;;  %v297_v21 = vmax.f32 %v261_v10, %v279_v15  ;;  %v2260_v22 = vld [vmem:[%s2947_s1 + $0x248] sm:$0xff]   ;;  %v2287_v14 = vld [vmem:[%s2947_s1 + $0x2b8] sm:$0xff]  }
  0x2e   :  { %2066 = vmatprep.subr.bf16.mxu1 %v2238_v23  ;;  %v316_v23 = vpack.c.bf16 %v298_v19, %v298_v19 }
  0x30   :  { %2045 = vmatpush3.bf16.msra.mxu0 %v2237_v24  ;;  %v2261_v24 = vld [vmem:[%s2947_s1 + $0x208] sm:$0xff]   ;;  %1631 = vmatprep.mubr.bf16.mxu1 %v316_v23 }
  0x31   :  { %2067 = vmatpush3.bf16.msra.mxu1 %v2239_v25  ;;  %2046 = vmatprep.subr.bf16.mxu0 %v2240_v27  ;;  %v315_v25 = vpack.c.bf16 %v297_v21, %v297_v21  ;;  %v2262_v27 = vld [vmem:[%s2947_s1 + $0x2c8] sm:$0xff]   ;;  %v2290_v21 = vld [vmem:[%s2947_s1 + $0x3c0] sm:$0xff]  }
  0x32   :  { %2068 = vmatprep.subr.bf16.mxu1 %v2242_v28  ;;  %v2263_v28 = vld [vmem:[%s2947_s1 + $0x288] sm:$0xff]  }
  0x34   :  { %2047 = vmatpush3.bf16.msra.mxu0 %v2241_v29  ;;  %v2264_v29 = vld [vmem:[%s2947_s1 + $0x250] sm:$0xff]  }
  0x35   :  { %2069 = vmatpush3.bf16.msra.mxu1 %v2243_v30  ;;  %2048 = vmatprep.subr.bf16.mxu0 %v2244_v34  ;;  %v2265_v30 = vld [vmem:[%s2947_s1 + $0x210] sm:$0xff]  }
  0x36   :  { %2070 = vmatprep.subr.bf16.mxu1 %v2246_v38  ;;  %v2266_v34 = vld [vmem:[%s2947_s1 + $0x2d0] sm:$0xff]  }
  0x37   :  { %v2267_v38 = vld [vmem:[%s2947_s1 + $0x290] sm:$0xff]  }
  0x38   :  { %2049 = vmatpush3.bf16.msra.mxu0 %v2245_v42  ;;  %v2268_v42 = vld [vmem:[%s2947_s1 + $0x258] sm:$0xff]  }
  0x39   :  { %2071 = vmatpush3.bf16.msra.mxu1 %v2247_v44  ;;  %2050 = vmatprep.subr.bf16.mxu0 %v2248_v45  ;;  %v2269_v44 = vld [vmem:[%s2947_s1 + $0x218] sm:$0xff]  }
  0x3a   :  { %2072 = vmatprep.subr.bf16.mxu1 %v2250_v26  ;;  %v2270_v45 = vld [vmem:[%s2947_s1 + $0x2d8] sm:$0xff]   ;;  %v2273_v26 = vld [vmem:[%s2947_s1 + $0x220] sm:$0xff]  }
  0x3c   :  { %2051 = vmatpush3.bf16.msra.mxu0 %v2249_v51  ;;  %v2277_v51 = vld [vmem:[%s2947_s1 + $0x228] sm:$0xff]  }
  0x3d   :  { %2073 = vmatpush3.bf16.msra.mxu1 %v2251_v56  ;;  %2052 = vmatprep.subr.bf16.mxu0 %v2252_v39  ;;  %v2282_v56 = vld [vmem:[%s2947_s1 + $0x2f0] sm:$0xff]   ;;  %v35_v39 = vunpack.c.l.bf16 %v22_v57  ;;  %v2305_v57 = vld [vmem:[%s2947_s1 + $0x320] sm:$0xff]  }
  0x3e   :  { %2074 = vmatprep.subr.bf16.mxu1 %v2254_v0  ;;  %v2284_v0 = vld [vmem:[%s2947_s1 + $0x278] sm:$0xff]  }
  0x3f   :  { %v149_v5 = vmul.f32 %v86_v63, %v35_v39  ;;  %v2308_v39 = vld [vmem:[%s2947_s1 + $0x368] sm:$0xff]  }
  0x40   :  { %2053 = vmatpush3.bf16.msra.mxu0 %v2253_v40  ;;  %v204_v40 = vrot.slane %v2734_v62, %v2455_v31  ;;  %v2310_v63 = vld [vmem:[%s2947_s1 + $0x3e8] sm:$0xff]  }
  0x41   :  { %2075 = vmatpush3.bf16.msra.mxu1 %v2255_v2  ;;  %2082 = vmatprep.subr.bf16.mxu0 %v2256_v6  ;;  %v98_v2 = vrot.slane %v2724_v58, %v2461_v33  ;;  %v23_v6 = vld [vmem:[%s2948_s0 + $0x28] sm:$0xff]  ;;  %v263_v15 = vadd.f32 %v200_v1, %v149_v5  ;;  %v106_v1 = vrot.slane %v2724_v58, %v2568_v32  ;;  %v2314_v5 = vld [vmem:[%s2947_s1 + $0x3f0] sm:$0xff]  }
  0x42   :  { %2104 = vmatprep.subr.bf16.mxu1 %v2258_v11  ;;  %v37_v9 = vunpack.c.l.bf16 %v23_v6  ;;  %v38_v10 = vunpack.c.h.bf16 %v23_v6  ;;  %v212_v11 = vrot.slane %v2734_v62, %v2461_v33  ;;  %v264_v13 = vadd.f32 %v204_v40, %v150_v4  ;;  %v2311_v40 = vld [vmem:[%s2947_s1 + $0x3a8] sm:$0xff]   ;;  %v24_v4 = vld [vmem:[%s2948_s0 + $0x30] sm:$0xff] }
  0x43   :  { %1592 = vmatmul.mubr.bf16.vlgmr.msra.gmra.mrb[4].mxu0 %v313_v18  ;;  %v281_v33 = vmul.f32 0.2, %v263_v15  ;;  %v39_v6 = vunpack.c.l.bf16 %v24_v4 }
  0x44   :  { %2083 = vmatpush3.bf16.msra.mxu0 %v2257_v16  ;;  %1632 = vmatmul.mubr.bf16.vlgmr.msra.gmra.mrb[4].mxu1 %v315_v25  ;;  %v2288_v16 = vld [vmem:[%s2947_s1 + $0x340] sm:$0xff]   ;;  %v152_v17 = vmul.f32 %v98_v2, %v38_v10  ;;  %v151_v18 = vmul.f32 %v94_v7, %v37_v9  ;;  %v282_v19 = vmul.f32 0.2, %v264_v13  ;;  %v102_v2 = vrot.slane %v2724_v58, %v2574_v36  ;;  %v2315_v10 = vld [vmem:[%s2947_s1 + $0x3b0] sm:$0xff]  }
  0x45   :  { %2084 = vmatprep.subr.bf16.mxu0 %v2260_v22  ;;  %2105 = vmatpush3.bf16.msra.mxu1 %v2259_v20  ;;  %v299_v23 = vmax.f32 %v263_v15, %v281_v33  ;;  %v2289_v25 = vld [vmem:[%s2947_s1 + $0x300] sm:$0xff]   ;;  %v40_v7 = vunpack.c.h.bf16 %v24_v4  ;;  %v216_v9 = vrot.slane %v2734_v62, %v2574_v36  ;;  %v25_v36 = vld [vmem:[%s2948_s0 + $0x38] sm:$0xff] }
  0x46   :  { %2106 = vmatprep.subr.bf16.mxu1 %v2262_v27  ;;  %v266_v20 = vadd.f32 %v212_v11, %v152_v17  ;;  %v265_v37 = vadd.f32 %v208_v12, %v151_v18  ;;  %v300_v22 = vmax.f32 %v264_v13, %v282_v19  ;;  %v2316_v11 = vld [vmem:[%s2947_s1 + $0x378] sm:$0xff]   ;;  %v114_v12 = vrot.slane %v2724_v58, %v2580_v41 }
  0x47   :  { %v110_v13 = vrot.slane %v2724_v58, %v2586_v43  ;;  %v2317_v15 = vld [vmem:[%s2947_s1 + $0x338] sm:$0xff]   ;;  %v42_v17 = vunpack.c.h.bf16 %v25_v36  ;;  %v228_v18 = vrot.slane %v2734_v62, %v2580_v41  ;;  %v224_v19 = vrot.slane %v2734_v62, %v2586_v43 }
  0x48   :  { %2085 = vmatpush3.bf16.msra.mxu0 %v2261_v24  ;;  %v284_v24 = vmul.f32 0.2, %v266_v20  ;;  %v283_v27 = vmul.f32 0.2, %v265_v37  ;;  %v2318_v58 = vld [vmem:[%s2947_s1 + $0x3f8] sm:$0xff]  }
  0x49   :  { %2086 = vmatprep.subr.bf16.mxu0 %v2264_v29  ;;  %2107 = vmatpush3.bf16.msra.mxu1 %v2263_v28  ;;  %v318_v28 = vpack.c.bf16 %v300_v22, %v300_v22  ;;  %v317_v29 = vpack.c.bf16 %v299_v23, %v299_v23  ;;  %v2319_v41 = vld [vmem:[%s2947_s1 + $0x3b8] sm:$0xff]  }
  0x4a   :  { %2108 = vmatprep.subr.bf16.mxu1 %v2266_v34  ;;  %v301_v34 = vmax.f32 %v265_v37, %v283_v27  ;;  %v2320_v37 = vld [vmem:[%s2947_s1 + $0x440] sm:$0xff]  }
  0x4b   :  { %1671 = vmatprep.mubr.bf16.mxu0 %v318_v28 }
  0x4c   :  { %2087 = vmatpush3.bf16.msra.mxu0 %v2265_v30  ;;  %v302_v30 = vmax.f32 %v266_v20, %v284_v24 }
  0x4d   :  { %2088 = vmatprep.subr.bf16.mxu0 %v2268_v42  ;;  %2109 = vmatpush3.bf16.msra.mxu1 %v2267_v38  ;;  %v2292_v38 = vld [vmem:[%s2947_s1 + $0x348] sm:$0xff]   ;;  %v2291_v42 = vld [vmem:[%s2947_s1 + $0x380] sm:$0xff]  }
  0x4e   :  { %2110 = vmatprep.subr.bf16.mxu1 %v2270_v45  ;;  %v319_v45 = vpack.c.bf16 %v301_v34, %v301_v34 }
  0x50   :  { %2089 = vmatpush3.bf16.msra.mxu0 %v2269_v44  ;;  %v320_v44 = vpack.c.bf16 %v302_v30, %v302_v30 }
  0x51   :  { %2090 = vmatprep.subr.bf16.mxu0 %v2272_v47  ;;  %2111 = vmatpush3.bf16.msra.mxu1 %v2271_v46  ;;  %v2293_v46 = vld [vmem:[%s2947_s1 + $0x308] sm:$0xff]  }
  0x52   :  { %2112 = vmatprep.subr.bf16.mxu1 %v2274_v48  ;;  %v2294_v47 = vld [vmem:[%s2947_s1 + $0x3c8] sm:$0xff]   ;;  %1711 = vmatprep.mubr.bf16.mxu1 %v320_v44 }
  0x53   :  { %v2295_v48 = vld [vmem:[%s2947_s1 + $0x388] sm:$0xff]  }
  0x54   :  { %2091 = vmatpush3.bf16.msra.mxu0 %v2273_v26  ;;  %v2296_v26 = vld [vmem:[%s2947_s1 + $0x350] sm:$0xff]  }
  0x55   :  { %2092 = vmatprep.subr.bf16.mxu0 %v2276_v50  ;;  %2113 = vmatpush3.bf16.msra.mxu1 %v2275_v49  ;;  %v2297_v49 = vld [vmem:[%s2947_s1 + $0x310] sm:$0xff]  }
  0x56   :  { %2114 = vmatprep.subr.bf16.mxu1 %v2278_v52  ;;  %v2298_v50 = vld [vmem:[%s2947_s1 + $0x3d0] sm:$0xff]  }
  0x57   :  { %v2299_v52 = vld [vmem:[%s2947_s1 + $0x390] sm:$0xff]  }
  0x58   :  { %2093 = vmatpush3.bf16.msra.mxu0 %v2277_v51  ;;  %v2300_v51 = vld [vmem:[%s2947_s1 + $0x358] sm:$0xff]  }
  0x59   :  { %2094 = vmatprep.subr.bf16.mxu0 %v2280_v54  ;;  %2115 = vmatpush3.bf16.msra.mxu1 %v2279_v53  ;;  %v2301_v53 = vld [vmem:[%s2947_s1 + $0x318] sm:$0xff]  }
  0x5a   :  { %2116 = vmatprep.subr.bf16.mxu1 %v2282_v56  ;;  %v2302_v54 = vld [vmem:[%s2947_s1 + $0x3d8] sm:$0xff]  }
  0x5b   :  { %v2303_v56 = vld [vmem:[%s2947_s1 + $0x398] sm:$0xff]  }
  0x5c   :  { %2095 = vmatpush3.bf16.msra.mxu0 %v2281_v55  ;;  %v2304_v55 = vld [vmem:[%s2947_s1 + $0x360] sm:$0xff]  }
  0x5d   :  { %2096 = vmatprep.subr.bf16.mxu0 %v2284_v0  ;;  %2117 = vmatpush3.bf16.msra.mxu1 %v2283_v59  ;;  %v2306_v59 = vld [vmem:[%s2947_s1 + $0x3e0] sm:$0xff]   ;;  %v2312_v0 = vld [vmem:[%s2947_s1 + $0x370] sm:$0xff]  }
  0x5e   :  { %2118 = vmatprep.subr.bf16.mxu1 %v2286_v8  ;;  %v220_v8 = vrot.slane %v2734_v62, %v2568_v32  ;;  %v153_v32 = vmul.f32 %v102_v2, %v39_v6  ;;  %v2330_v2 = vld [vmem:[%s2947_s1 + $0x468] sm:$0xff]   ;;  %v2332_v6 = vld [vmem:[%s2947_s1 + $0x470] sm:$0xff]  }
  0x60   :  { %2097 = vmatpush3.bf16.msra.mxu0 %v2285_v3  ;;  %v2313_v3 = vld [vmem:[%s2947_s1 + $0x330] sm:$0xff]   ;;  %v267_v20 = vadd.f32 %v216_v9, %v153_v32  ;;  %v2334_v9 = vld [vmem:[%s2947_s1 + $0x478] sm:$0xff]  }
  0x61   :  { %2126 = vmatprep.subr.bf16.mxu0 %v2288_v16  ;;  %2119 = vmatpush3.bf16.msra.mxu1 %v2287_v14  ;;  %v154_v14 = vmul.f32 %v106_v1, %v40_v7  ;;  %v41_v16 = vunpack.c.l.bf16 %v25_v36 }
  0x62   :  { %2148 = vmatprep.subr.bf16.mxu1 %v2290_v21  ;;  %v156_v21 = vmul.f32 %v114_v12, %v42_v17  ;;  %v285_v43 = vmul.f32 0.2, %v267_v20 }
  0x63   :  { %1672 = vmatmul.mubr.bf16.vlgmr.msra.gmra.mrb[8].mxu0 %v317_v29  ;;  %v268_v33 = vadd.f32 %v220_v8, %v154_v14  ;;  %v155_v22 = vmul.f32 %v110_v13, %v41_v16  ;;  %v2333_v8 = vld [vmem:[%s2947_s1 + $0x430] sm:$0xff]  }
  0x64   :  { %2127 = vmatpush3.bf16.msra.mxu0 %v2289_v25  ;;  %1712 = vmatmul.mubr.bf16.vlgmr.msra.gmra.mrb[8].mxu1 %v319_v45  ;;  %v270_v62 = vadd.f32 %v228_v18, %v156_v21  ;;  %v303_v27 = vmax.f32 %v267_v20, %v285_v43  ;;  %v2322_v45 = vld [vmem:[%s2947_s1 + $0x448] sm:$0xff]  }
  0x65   :  { %2128 = vmatprep.subr.bf16.mxu0 %v2292_v38  ;;  %2149 = vmatpush3.bf16.msra.mxu1 %v2291_v42  ;;  %v286_v23 = vmul.f32 0.2, %v268_v33  ;;  %v269_v24 = vadd.f32 %v224_v19, %v155_v22  ;;  %v2321_v38 = vld [vmem:[%s2947_s1 + $0x400] sm:$0xff]  }
  0x66   :  { %2150 = vmatprep.subr.bf16.mxu1 %v2294_v47  ;;  %v288_v28 = vmul.f32 0.2, %v270_v62  ;;  %v321_v34 = vpack.c.bf16 %v303_v27, %v303_v27 }
  0x67   :  { %v304_v25 = vmax.f32 %v268_v33, %v286_v23  ;;  %v287_v29 = vmul.f32 0.2, %v269_v24 }
  0x68   :  { %2129 = vmatpush3.bf16.msra.mxu0 %v2293_v46  ;;  %v306_v42 = vmax.f32 %v270_v62, %v288_v28 }
  0x69   :  { %2130 = vmatprep.subr.bf16.mxu0 %v2296_v26  ;;  %2151 = vmatpush3.bf16.msra.mxu1 %v2295_v48  ;;  %v322_v30 = vpack.c.bf16 %v304_v25, %v304_v25  ;;  %v305_v44 = vmax.f32 %v269_v24, %v287_v29  ;;  %v2323_v26 = vld [vmem:[%s2947_s1 + $0x408] sm:$0xff]   ;;  %v2324_v48 = vld [vmem:[%s2947_s1 + $0x450] sm:$0xff]  }
  0x6a   :  { %2152 = vmatprep.subr.bf16.mxu1 %v2298_v50  ;;  %v324_v46 = vpack.c.bf16 %v306_v42, %v306_v42  ;;  %v26_v50 = vld [vmem:[%s2948_s0 + $0x40] sm:$0xff] }
  0x6b   :  { %1751 = vmatprep.mubr.bf16.mxu0 %v322_v30  ;;  %v323_v47 = vpack.c.bf16 %v305_v44, %v305_v44 }
  0x6c   :  { %2131 = vmatpush3.bf16.msra.mxu0 %v2297_v49  ;;  %1791 = vmatprep.mubr.bf16.mxu1 %v324_v46  ;;  %v2325_v49 = vld [vmem:[%s2947_s1 + $0x410] sm:$0xff]  }
  0x6d   :  { %2132 = vmatprep.subr.bf16.mxu0 %v2300_v51  ;;  %2153 = vmatpush3.bf16.msra.mxu1 %v2299_v52  ;;  %v47_v51 = vld [vmem:[%s2949_s2 + $0x10] sm:$0x3]  ;;  %v2326_v52 = vld [vmem:[%s2947_s1 + $0x458] sm:$0xff]  }
  0x6e   :  { %2154 = vmatprep.subr.bf16.mxu1 %v2302_v54  ;;  %v122_v54 = vrot.slane %v47_v51, %v2455_v31 }
  0x70   :  { %2133 = vmatpush3.bf16.msra.mxu0 %v2301_v53  ;;  %v44_v53 = vunpack.c.h.bf16 %v26_v50 }
  0x71   :  { %2134 = vmatprep.subr.bf16.mxu0 %v2304_v55  ;;  %2155 = vmatpush3.bf16.msra.mxu1 %v2303_v56  ;;  %v161_v55 = vld [vmem:[%s2950_s3 + $0x10] sm:$0x3] }
  0x72   :  { %2156 = vmatprep.subr.bf16.mxu1 %v2306_v59  ;;  %v236_v56 = vrot.slane %v161_v55, %v2455_v31  ;;  %v118_v59 = vrot.slane %v47_v51, %v2467_v35  ;;  %v2329_v31 = vld [vmem:[%s2947_s1 + $0x420] sm:$0xff]  }
  0x74   :  { %2135 = vmatpush3.bf16.msra.mxu0 %v2305_v57  ;;  %v43_v57 = vunpack.c.l.bf16 %v26_v50 }
  0x75   :  { %2136 = vmatprep.subr.bf16.mxu0 %v2308_v39  ;;  %2157 = vmatpush3.bf16.msra.mxu1 %v2307_v60  ;;  %v158_v39 = vmul.f32 %v122_v54, %v44_v53  ;;  %v2327_v60 = vld [vmem:[%s2947_s1 + $0x418] sm:$0xff]  }
  0x76   :  { %2158 = vmatprep.subr.bf16.mxu1 %v2310_v63  ;;  %v157_v1 = vmul.f32 %v118_v59, %v43_v57 }
  0x77   :  { %v272_v63 = vadd.f32 %v236_v56, %v158_v39 }
  0x78   :  { %2137 = vmatpush3.bf16.msra.mxu0 %v2309_v61  ;;  %v2328_v61 = vld [vmem:[%s2947_s1 + $0x460] sm:$0xff]  }
  0x79   :  { %2138 = vmatprep.subr.bf16.mxu0 %v2312_v0  ;;  %2159 = vmatpush3.bf16.msra.mxu1 %v2311_v40  ;;  %v232_v0 = vrot.slane %v161_v55, %v2467_v35  ;;  %v290_v40 = vmul.f32 0.2, %v272_v63  ;;  %v2331_v35 = vld [vmem:[%s2947_s1 + $0x428] sm:$0xff]  }
  0x7a   :  { %2160 = vmatprep.subr.bf16.mxu1 %v2314_v5 }
  0x7b   :  { %v271_v5 = vadd.f32 %v232_v0, %v157_v1 }
  0x7c   :  { %2139 = vmatpush3.bf16.msra.mxu0 %v2313_v3  ;;  %v308_v3 = vmax.f32 %v272_v63, %v290_v40 }
  0x7d   :  { %2140 = vmatprep.subr.bf16.mxu0 %v2316_v11  ;;  %2161 = vmatpush3.bf16.msra.mxu1 %v2315_v10  ;;  %v289_v7 = vmul.f32 0.2, %v271_v5  ;;  %v2335_v11 = vld [vmem:[%s2947_s1 + $0x438] sm:$0xff]  }
  0x7e   :  { %2162 = vmatprep.subr.bf16.mxu1 %v2318_v58  ;;  %v326_v4 = vpack.c.bf16 %v308_v3, %v308_v3 }
  0x7f   :  { %v307_v10 = vmax.f32 %v271_v5, %v289_v7 }
  0x80   :  { %2141 = vmatpush3.bf16.msra.mxu0 %v2317_v15 }
  0x81   :  { %2170 = vmatprep.subr.bf16.mxu0 %v2320_v37  ;;  %2163 = vmatpush3.bf16.msra.mxu1 %v2319_v41  ;;  %v325_v12 = vpack.c.bf16 %v307_v10, %v307_v10 }
  0x83   :  { %1752 = vmatmul.mubr.bf16.vlgmr.msra.gmra.mrb[12].mxu0 %v321_v34 }
  0x84   :  { %2171 = vmatpush3.bf16.msra.mxu0 %v2321_v38  ;;  %1792 = vmatmul.mubr.bf16.vlgmr.msra.gmra.mrb[12].mxu1 %v323_v47 }
  0x85   :  { %2172 = vmatprep.subr.bf16.mxu0 %v2322_v45  ;;  %1831 = vmatprep.mubr.bf16.mxu0 %v326_v4 }
  0x88   :  { %2173 = vmatpush3.bf16.msra.mxu0 %v2323_v26 }
  0x89   :  { %2174 = vmatprep.subr.bf16.mxu0 %v2324_v48 }
  0x8c   :  { %2175 = vmatpush3.bf16.msra.mxu0 %v2325_v49 }
  0x8d   :  { %2176 = vmatprep.subr.bf16.mxu0 %v2326_v52 }
  0x90   :  { %2177 = vmatpush3.bf16.msra.mxu0 %v2327_v60 }
  0x91   :  { %2178 = vmatprep.subr.bf16.mxu0 %v2328_v61 }
  0x94   :  { %2179 = vmatpush3.bf16.msra.mxu0 %v2329_v31 }
  0x95   :  { %2180 = vmatprep.subr.bf16.mxu0 %v2330_v2 }
  0x98   :  { %2181 = vmatpush3.bf16.msra.mxu0 %v2331_v35 }
  0x99   :  { %2182 = vmatprep.subr.bf16.mxu0 %v2332_v6 }
  0x9c   :  { %2183 = vmatpush3.bf16.msra.mxu0 %v2333_v8 }
  0x9d   :  { %2184 = vmatprep.subr.bf16.mxu0 %v2334_v9 }
  0xa0   :  { %2185 = vmatpush3.bf16.msra.mxu0 %v2335_v11 }
  0xa3   :  { %1832 = vmatmul.mubr.bf16.vlgmr.msra.gmra.mrb[16].mxu0 %v325_v12 }
  0xf6   :  { %v2010_v13 = vpop.f32.mrb[0].mxu0 }
  0xf7   :  { %v2032_v14 = vpop.f32.mrb[0].mxu1  ;;  %v2011_v32 = vpop.f32.mrb[1].mxu0 }
  0xf8   :  { %v2033_v36 = vpop.f32.mrb[1].mxu1  ;;  %v2012_v15 = vadd.f32 %v2011_v32, %v2010_v13  ;;  %v2013_v17 = vpop.f32.mrb[2].mxu0 }
  0xf9   :  { %v2034_v16 = vadd.f32 %v2033_v36, %v2032_v14  ;;  %v2035_v18 = vpop.f32.mrb[2].mxu1  ;;  %v2014_v19 = vpop.f32.mrb[3].mxu0 }
  0xfa   :  { %v2036_v58 = vpop.f32.mrb[3].mxu1 }
  0xfb   :  { %v1554_v33 = vadd.f32 %v2034_v16, %v2012_v15 }
 0x116   :  { %v2054_v20 = vpop.f32.mrb[4].mxu0 }
 0x117   :  { %v2055_v37 = vpop.f32.mrb[5].mxu0  ;;  %v2076_v23 = vpop.f32.mrb[4].mxu1 }
 0x118   :  { %v2056_v21 = vadd.f32 %v2055_v37, %v2054_v20  ;;  %v2057_v22 = vpop.f32.mrb[6].mxu0  ;;  %v2077_v43 = vpop.f32.mrb[5].mxu1 }
 0x119   :  { %v2058_v41 = vpop.f32.mrb[7].mxu0  ;;  %v2078_v24 = vadd.f32 %v2077_v43, %v2076_v23  ;;  %v2079_v25 = vpop.f32.mrb[6].mxu1 }
 0x11a   :  { %v1594_v62 = vadd.f32 %v2056_v21, %v1554_v33  ;;  %v2080_v27 = vpop.f32.mrb[7].mxu1 }
 0x11c   :  { %v1634_v28 = vadd.f32 %v2078_v24, %v1594_v62 }
 0x136   :  { %v2098_v29 = vpop.f32.mrb[8].mxu0 }
 0x137   :  { %v2099_v30 = vpop.f32.mrb[9].mxu0  ;;  %v2120_v42 = vpop.f32.mrb[8].mxu1 }
 0x138   :  { %v2100_v34 = vadd.f32 %v2099_v30, %v2098_v29  ;;  %v2101_v38 = vpop.f32.mrb[10].mxu0  ;;  %v2121_v46 = vpop.f32.mrb[9].mxu1 }
 0x139   :  { %v2102_v44 = vpop.f32.mrb[11].mxu0  ;;  %v2122_v47 = vadd.f32 %v2121_v46, %v2120_v42  ;;  %v2123_v26 = vpop.f32.mrb[10].mxu1 }
 0x13a   :  { %v1674_v45 = vadd.f32 %v2100_v34, %v1634_v28  ;;  %v2124_v48 = vpop.f32.mrb[11].mxu1 }
 0x13c   :  { %v1714_v49 = vadd.f32 %v2122_v47, %v1674_v45 }
 0x156   :  { %v2142_v50 = vpop.f32.mrb[12].mxu0 }
 0x157   :  { %v2143_v51 = vpop.f32.mrb[13].mxu0  ;;  %v2164_v54 = vpop.f32.mrb[12].mxu1 }
 0x158   :  { %v2144_v52 = vadd.f32 %v2143_v51, %v2142_v50  ;;  %v2145_v53 = vpop.f32.mrb[14].mxu0  ;;  %v2165_v57 = vpop.f32.mrb[13].mxu1 }
 0x159   :  { %v2146_v55 = vpop.f32.mrb[15].mxu0  ;;  %v2166_v59 = vadd.f32 %v2165_v57, %v2164_v54  ;;  %v2167_v39 = vpop.f32.mrb[14].mxu1 }
 0x15a   :  { %v1754_v56 = vadd.f32 %v2144_v52, %v1714_v49  ;;  %v2168_v60 = vpop.f32.mrb[15].mxu1 }
 0x15c   :  { %v1794_v61 = vadd.f32 %v2166_v59, %v1754_v56 }
 0x176   :  { %v2186_v63 = vpop.f32.mrb[16].mxu0 }
 0x177   :  { %v2187_v0 = vpop.f32.mrb[17].mxu0 }
 0x178   :  { %v2188_v40 = vadd.f32 %v2187_v0, %v2186_v63  ;;  %v2189_v1 = vpop.f32.mrb[18].mxu0 }
 0x179   :  { %v2190_v31 = vpop.f32.mrb[19].mxu0 }
 0x17a   :  { %v1834_v2 = vadd.f32 %v2188_v40, %v1794_v61 }
 0x17c   :  { %v1839_v3 = vsub.f32 0.0, %v1834_v2 }
 0x17e   :  { %v1840_v4 = vmul.f32 1.442695, %v1839_v3 }
 0x180   :  { %2336 = vpow2.f32 %v1840_v4 }
 0x18a   :  { %v2337_v5 = vpop.eup %2336 }
 0x18b   :  { %v1842_v35 = vadd.f32 1.0, %v2337_v5 }
 0x18d   :  { %2338 = vrcp.f32 %v1842_v35 }
 0x197   :  { %v2339_v6 = vpop.eup %2338 }
 0x198   :  { %1845 = vst [vmem:[%s2951_s4] sm:$0xff] %v2339_v6 }

</bundles_post_ra>
